<compile_context>
chip_gen: v7x
topology: tpu7x:2x2x1
jax: 0.10.0
libtpu: 0.0.40
codegen_flags: <defaults>
</compile_context>

<pallas_src>
import jax
import jax.numpy as jnp
from jax.experimental import pallas as pl
from jax.experimental.pallas import tpu as pltpu

# ---- model hyper-parameters (small, consistent with the module) ----
EMB_DIM = 32            # embedding_dimensions
N_HEADS = 4             # attention_count
HEAD_DIM = EMB_DIM // N_HEADS
EXPAN = 2               # expan_factor
FF_DIM = EXPAN * EMB_DIM
NUM_LAYERS = 2
OUTPUT_DIM = 3
NUM_FEATURES = 16       # 4 (group 1) + 12 (group 2), fixed by EncoderModel.forward
SEQ_LEN = NUM_FEATURES + 1
VOCAB = 10
BATCH = 2
BS = BATCH * SEQ_LEN    # 34 tokens total
LN_EPS = 1e-5
ATT_SCALE = 1.0 / (float(EMB_DIM) ** 0.5)   # PyTorch divides by sqrt(embedding_dimensions)
OUT_PAD = 128           # lane-dense classifier output width (sliced to OUTPUT_DIM outside)
NEG_INF = -1e30


def _layer_norm(x, g, b):
    mu = jnp.mean(x, axis=-1, keepdims=True)
    var = jnp.mean((x - mu) ** 2, axis=-1, keepdims=True)
    return (x - mu) * jax.lax.rsqrt(var + LN_EPS) * g + b


def classifier_kernel(idx_ref,                          # SMEM (BATCH*NUM_FEATURES,) int32
                      emb_ref, cls_ref,                 # (NF*VOCAB, 1, D) f32, (1, D) f32
                      wqk_ref, wvo_ref, bo_ref,         # (L, D, H*D) bf16 x2, (L, 1, D) f32
                      ln1g_ref, ln1b_ref,               # (L, 1, D) f32
                      w1_ref, b1_ref, w2_ref, b2_ref,   # (L, D, F) bf16, (L,1,F), (L,F,D) bf16, (L,1,D)
                      ln2g_ref, ln2b_ref,               # (L, 1, D) f32
                      fcw_ref, fcb_ref,                 # (D, OUT_PAD) bf16, (1, OUT_PAD) f32
                      out_ref,                          # (BS, OUT_PAD) f32
                      x_scr):                           # VMEM scratch (BS, D) f32
    # ---- embedding gather (group bias pre-folded into the table) + CLS concat ----
    for b in range(BATCH):
        x_scr[pl.ds(b * SEQ_LEN, 1), :] = cls_ref[...]
        for i in range(NUM_FEATURES):
            tok = idx_ref[b * NUM_FEATURES + i]                    # SMEM scalar
            x_scr[pl.ds(b * SEQ_LEN + 1 + i, 1), :] = emb_ref[i * VOCAB + tok]
    x = x_scr[...]                                                 # (BS, D) f32

    # ---- block-diagonal additive mask: attend only within the same batch element ----
    r = jax.lax.broadcasted_iota(jnp.int32, (BS, BS), 0)
    c = jax.lax.broadcasted_iota(jnp.int32, (BS, BS), 1)
    same = None
    for b in range(BATCH):
        lo, hi = b * SEQ_LEN, (b + 1) * SEQ_LEN
        blk = (r >= lo) & (r < hi) & (c >= lo) & (c < hi)
        same = blk if same is None else (same | blk)
    mask_bias = jnp.where(same, 0.0, NEG_INF).astype(jnp.float32)  # (BS, BS)

    for l in range(NUM_LAYERS):
        # ----- multi-head attention (Wq@Wk^T and Wv@Wo pre-folded, heads stacked) -----
        xb = x.astype(jnp.bfloat16)
        t_all = jnp.dot(xb, wqk_ref[l], preferred_element_type=jnp.float32)    # (BS, H*D)
        voh_all = jnp.dot(xb, wvo_ref[l], preferred_element_type=jnp.float32)  # (BS, H*D)
        voh_b = voh_all.astype(jnp.bfloat16)
        attn = jnp.zeros((BS, EMB_DIM), jnp.float32)
        for h in range(N_HEADS):
            t = t_all[:, h * EMB_DIM:(h + 1) * EMB_DIM]                        # (BS, D)
            s = jax.lax.dot_general(t.astype(jnp.bfloat16), xb,
                                    (((1,), (1,)), ((), ())),
                                    preferred_element_type=jnp.float32)        # (BS, BS)
            s = s * ATT_SCALE + mask_bias
            m = jnp.max(s, axis=-1, keepdims=True)
            e = jnp.exp(s - m)
            p = e * pl.reciprocal(jnp.sum(e, axis=-1, keepdims=True), approx=True)
            voh = voh_b[:, h * EMB_DIM:(h + 1) * EMB_DIM]                      # (BS, D)
            attn = attn + jnp.dot(p.astype(jnp.bfloat16), voh,
                                  preferred_element_type=jnp.float32)
        attn = attn + bo_ref[l]
        # dropout -> identity at inference time
        x = _layer_norm(x + attn, ln1g_ref[l], ln1b_ref[l])

        # ----- feed-forward -----
        xb = x.astype(jnp.bfloat16)
        h1 = jnp.dot(xb, w1_ref[l], preferred_element_type=jnp.float32) + b1_ref[l]
        h1 = jnp.maximum(h1, 0.0)
        ff = jnp.dot(h1.astype(jnp.bfloat16), w2_ref[l],
                     preferred_element_type=jnp.float32) + b2_ref[l]
        x = _layer_norm(x + ff, ln2g_ref[l], ln2b_ref[l])

    # ----- classifier head, lane-dense (padded to 128), all tokens; CLS sliced outside -----
    logits = jnp.dot(x.astype(jnp.bfloat16), fcw_ref[...],
                     preferred_element_type=jnp.float32) + fcb_ref[...]
    out_ref[...] = jax.nn.sigmoid(logits)                          # (BS, OUT_PAD)


def prepare_params(params):
    """One-time weight preprocessing into kernel-ready layouts (pure JAX, off the hot path)."""
    L, D, H, Hd, F = NUM_LAYERS, EMB_DIM, N_HEADS, HEAD_DIM, FF_DIM

    # group biases folded into the embedding tables (tables 0..3 -> gb1, 4..15 -> gb2)
    emb = params["emb"].astype(jnp.float32)
    emb = emb.at[:4].add(params["gb1"]).at[4:].add(params["gb2"])
    emb = emb.reshape(NUM_FEATURES * VOCAB, 1, D)                  # leading-dim gather layout

    # per-head folds: Wqk_h = Wq_h @ Wk_h^T (score), Wvo_h = Wv_h @ Wo_h (value->output),
    # stacked over heads along the output dim -> lane-dense (D, H*D) = (32, 128)
    wq = params["wq_t"].reshape(L, D, H, Hd)
    wk = params["wk_t"].reshape(L, D, H, Hd)
    wv = params["wv_t"].reshape(L, D, H, Hd)
    wo = params["wo_t"].reshape(L, H, Hd, D)
    wqk = jnp.einsum("ldhe,lkhe->ldhk", wq, wk).reshape(L, D, H * D)
    wvo = jnp.einsum("ldhe,lhek->ldhk", wv, wo).reshape(L, D, H * D)

    # lane-dense (128-wide) classifier head
    fcw = jnp.zeros((D, OUT_PAD), jnp.float32).at[:, :OUTPUT_DIM].set(params["fcw_t"])
    fcb = jnp.zeros((1, OUT_PAD), jnp.float32).at[:, :OUTPUT_DIM].set(params["fcb"])

    return dict(
        emb=emb,
        cls=params["cls"].reshape(1, D).astype(jnp.float32),
        wqk=wqk.astype(jnp.bfloat16),
        wvo=wvo.astype(jnp.bfloat16),
        bo=params["bo"].reshape(L, 1, D),
        ln1g=params["ln1g"].reshape(L, 1, D), ln1b=params["ln1b"].reshape(L, 1, D),
        w1=params["w1_t"].astype(jnp.bfloat16), b1=params["b1"].reshape(L, 1, F),
        w2=params["w2_t"].astype(jnp.bfloat16), b2=params["b2"].reshape(L, 1, D),
        ln2g=params["ln2g"].reshape(L, 1, D), ln2b=params["ln2b"].reshape(L, 1, D),
        fcw=fcw.astype(jnp.bfloat16), fcb=fcb,
    )


@jax.jit
def classifier_forward(x_idx, kp):
    B = x_idx.shape[0]
    assert B == BATCH
    idx_flat = x_idx.reshape(-1).astype(jnp.int32)                 # (B*NUM_FEATURES,)

    tensor_args = (kp["emb"], kp["cls"], kp["wqk"], kp["wvo"], kp["bo"],
                   kp["ln1g"], kp["ln1b"], kp["w1"], kp["b1"], kp["w2"], kp["b2"],
                   kp["ln2g"], kp["ln2b"], kp["fcw"], kp["fcb"])

    def full_spec(a):
        n = a.ndim
        return pl.BlockSpec(a.shape, lambda i, idx, _n=n: (0,) * _n)

    out = pl.pallas_call(
        classifier_kernel,
        out_shape=jax.ShapeDtypeStruct((BS, OUT_PAD), jnp.float32),
        grid_spec=pltpu.PrefetchScalarGridSpec(
            num_scalar_prefetch=1,          # x_idx lands in SMEM
            grid=(1,),                      # whole batch in a single grid step
            in_specs=[full_spec(a) for a in tensor_args],
            out_specs=pl.BlockSpec((BS, OUT_PAD), lambda i, idx: (0, 0)),
            scratch_shapes=[pltpu.VMEM((BS, EMB_DIM), jnp.float32)],
        ),
        compiler_params=pltpu.CompilerParams(
            dimension_semantics=("arbitrary",)),
    )(idx_flat, *tensor_args)

    # CLS token is row b*SEQ_LEN of the flat slab; real logits are the first OUTPUT_DIM lanes
    return out.reshape(B, SEQ_LEN, OUT_PAD)[:, 0, :OUTPUT_DIM]     # (B, OUTPUT_DIM)


def reference_forward(x_idx, params):
    """Pure-JAX reference mirroring the PyTorch forward (inference mode)."""
    B = x_idx.shape[0]
    emb_tables = params["emb"]
    x = jnp.stack([emb_tables[i][x_idx[:, i]] for i in range(NUM_FEATURES)], axis=1)
    x = x.at[:, :4, :].add(params["gb1"])
    x = x.at[:, 4:, :].add(params["gb2"])
    cls_tok = jnp.broadcast_to(params["cls"], (B, 1, EMB_DIM))
    x = jnp.concatenate([cls_tok, x], axis=1)                      # (B, S, D)
    for l in range(NUM_LAYERS):
        q = x @ params["wq_t"][l]
        k = x @ params["wk_t"][l]
        v = x @ params["wv_t"][l]
        qh = q.reshape(B, SEQ_LEN, N_HEADS, HEAD_DIM).transpose(0, 2, 1, 3)
        kh = k.reshape(B, SEQ_LEN, N_HEADS, HEAD_DIM).transpose(0, 2, 1, 3)
        vh = v.reshape(B, SEQ_LEN, N_HEADS, HEAD_DIM).transpose(0, 2, 1, 3)
        s = jnp.einsum("bhqd,bhkd->bhqk", qh, kh) * ATT_SCALE
        p = jax.nn.softmax(s, axis=-1)
        a = jnp.einsum("bhqk,bhkd->bhqd", p, vh)
        a = a.transpose(0, 2, 1, 3).reshape(B, SEQ_LEN, EMB_DIM)
        a = a @ params["wo_t"][l] + params["bo"][l]
        x = _layer_norm(x + a, params["ln1g"][l], params["ln1b"][l])
        h1 = jnp.maximum(x @ params["w1_t"][l] + params["b1"][l], 0.0)
        ff = h1 @ params["w2_t"][l] + params["b2"][l]
        x = _layer_norm(x + ff, params["ln2g"][l], params["ln2b"][l])
    cls = x[:, 0]
    return jax.nn.sigmoid(cls @ params["fcw_t"] + params["fcb"][0])


def init_params(key):
    ks = jax.random.split(key, 16)
    emb = jax.random.normal(ks[0], (NUM_FEATURES, VOCAB, EMB_DIM), jnp.float32)
    emb_std = jnp.std(emb[0])
    gb1 = jax.random.normal(ks[1], ()) * emb_std
    gb2 = jax.random.normal(ks[2], ()) * emb_std
    cls = jax.random.normal(ks[3], (1, 1, EMB_DIM), jnp.float32)

    def lin(k, fan_in, shape):
        bound = 1.0 / jnp.sqrt(float(fan_in))
        return jax.random.uniform(k, shape, jnp.float32, -bound, bound)

    L, D, F = NUM_LAYERS, EMB_DIM, FF_DIM
    params = dict(
        emb=emb, gb1=gb1, gb2=gb2, cls=cls,
        # weights stored already transposed: (in_dim, out_dim), stacked over layers
        wq_t=lin(ks[4], D, (L, D, D)),
        wk_t=lin(ks[5], D, (L, D, D)),
        wv_t=lin(ks[6], D, (L, D, D)),
        wo_t=lin(ks[7], D, (L, D, D)),
        bo=lin(ks[8], D, (L, D)),
        ln1g=jnp.ones((L, D), jnp.float32), ln1b=jnp.zeros((L, D), jnp.float32),
        w1_t=lin(ks[9], D, (L, D, F)),  b1=lin(ks[10], D, (L, F)),
        w2_t=lin(ks[11], F, (L, F, D)), b2=lin(ks[12], F, (L, D)),
        ln2g=jnp.ones((L, D), jnp.float32), ln2b=jnp.zeros((L, D), jnp.float32),
        fcw_t=lin(ks[13], D, (D, OUTPUT_DIM)),
        fcb=lin(ks[14], D, (1, OUTPUT_DIM)),
    )
    return params


if __name__ == "__main__":
    key = jax.random.PRNGKey(0)
    k_params, k_x = jax.random.split(key)
    params = init_params(k_params)
    x_idx = jax.random.randint(k_x, (BATCH, NUM_FEATURES), 0, VOCAB, dtype=jnp.int32)

    kp = prepare_params(params)           # one-time weight preprocessing
    out = classifier_forward(x_idx, kp)
    out = jax.block_until_ready(out)

    ref = reference_forward(x_idx, params)
    assert out.shape == (BATCH, OUTPUT_DIM), out.shape
    assert bool(jnp.all(jnp.isfinite(out)))
    # bf16 MXU inputs vs fp32 reference: post-sigmoid error well under 3e-2
    assert bool(jnp.allclose(out, ref, atol=3e-2, rtol=3e-2)), (out, ref)
    print("KERNEL_OK")
</pallas_src>

<mosaic_0001>
module attributes {stable_mosaic.version = 11 : i64} {
  func.func @classifier_kernel(%arg0: i32, %arg1: memref<32xi32, #tpu.memory_space<smem>>, %arg2: memref<160x1x32xf32, #tpu.memory_space<vmem>>, %arg3: memref<1x32xf32, #tpu.memory_space<vmem>>, %arg4: memref<2x32x128xbf16, #tpu.memory_space<vmem>>, %arg5: memref<2x32x128xbf16, #tpu.memory_space<vmem>>, %arg6: memref<2x1x32xf32, #tpu.memory_space<vmem>>, %arg7: memref<2x1x32xf32, #tpu.memory_space<vmem>>, %arg8: memref<2x1x32xf32, #tpu.memory_space<vmem>>, %arg9: memref<2x32x64xbf16, #tpu.memory_space<vmem>>, %arg10: memref<2x1x64xf32, #tpu.memory_space<vmem>>, %arg11: memref<2x64x32xbf16, #tpu.memory_space<vmem>>, %arg12: memref<2x1x32xf32, #tpu.memory_space<vmem>>, %arg13: memref<2x1x32xf32, #tpu.memory_space<vmem>>, %arg14: memref<2x1x32xf32, #tpu.memory_space<vmem>>, %arg15: memref<32x128xbf16, #tpu.memory_space<vmem>>, %arg16: memref<1x128xf32, #tpu.memory_space<vmem>>, %arg17: memref<34x128xf32, #tpu.memory_space<vmem>>, %arg18: memref<34x32xf32, #tpu.memory_space<vmem>>) attributes {dimension_semantics = [#tpu.dimension_semantics<arbitrary>], iteration_bounds = array<i64: 1>, scalar_prefetch = 1 : i64, scratch_operands = 1 : i64, tpu.core_type = #tpu.core_type<tc>, window_params = [{pipeline_mode = #tpu.pipeline_mode<synchronous>, transform_indices = @transform_0, window_bounds = array<i64: 160, 1, 32>}, {pipeline_mode = #tpu.pipeline_mode<synchronous>, transform_indices = @transform_1, window_bounds = array<i64: 1, 32>}, {pipeline_mode = #tpu.pipeline_mode<synchronous>, transform_indices = @transform_2, window_bounds = array<i64: 2, 32, 128>}, {pipeline_mode = #tpu.pipeline_mode<synchronous>, transform_indices = @transform_3, window_bounds = array<i64: 2, 32, 128>}, {pipeline_mode = #tpu.pipeline_mode<synchronous>, transform_indices = @transform_4, window_bounds = array<i64: 2, 1, 32>}, {pipeline_mode = #tpu.pipeline_mode<synchronous>, transform_indices = @transform_5, window_bounds = array<i64: 2, 1, 32>}, {pipeline_mode = #tpu.pipeline_mode<synchronous>, transform_indices = @transform_6, window_bounds = array<i64: 2, 1, 32>}, {pipeline_mode = #tpu.pipeline_mode<synchronous>, transform_indices = @transform_7, window_bounds = array<i64: 2, 32, 64>}, {pipeline_mode = #tpu.pipeline_mode<synchronous>, transform_indices = @transform_8, window_bounds = array<i64: 2, 1, 64>}, {pipeline_mode = #tpu.pipeline_mode<synchronous>, transform_indices = @transform_9, window_bounds = array<i64: 2, 64, 32>}, {pipeline_mode = #tpu.pipeline_mode<synchronous>, transform_indices = @transform_10, window_bounds = array<i64: 2, 1, 32>}, {pipeline_mode = #tpu.pipeline_mode<synchronous>, transform_indices = @transform_11, window_bounds = array<i64: 2, 1, 32>}, {pipeline_mode = #tpu.pipeline_mode<synchronous>, transform_indices = @transform_12, window_bounds = array<i64: 2, 1, 32>}, {pipeline_mode = #tpu.pipeline_mode<synchronous>, transform_indices = @transform_13, window_bounds = array<i64: 32, 128>}, {pipeline_mode = #tpu.pipeline_mode<synchronous>, transform_indices = @transform_14, window_bounds = array<i64: 1, 128>}, {pipeline_mode = #tpu.pipeline_mode<synchronous>, transform_indices = @transform_15, window_bounds = array<i64: 34, 128>}]} {
    %c0 = arith.constant 0 : index
    %c0_0 = arith.constant 0 : index
    %0 = vector.load %arg3[%c0, %c0_0] : memref<1x32xf32, #tpu.memory_space<vmem>>, vector<1x32xf32>
    %c0_1 = arith.constant 0 : index
    %c0_2 = arith.constant 0 : index
    %1 = vector.load %arg18[%c0_1, %c0_2] : memref<34x32xf32, #tpu.memory_space<vmem>>, vector<1x32xf32>
    tpu.vector_store %arg18[%c0_1, %c0_2], %0 {strides = array<i32>} : memref<34x32xf32, #tpu.memory_space<vmem>>, vector<1x32xf32>,
    %c0_3 = arith.constant 0 : index
    %2 = memref.load %arg1[%c0_3] : memref<32xi32, #tpu.memory_space<smem>>
    %c0_i32 = arith.constant 0 : i32
    %3 = arith.addi %c0_i32, %2 : i32
    %4 = arith.index_cast %3 : i32 to index
    %c0_4 = arith.constant 0 : index
    %c0_5 = arith.constant 0 : index
    %5 = vector.load %arg2[%4, %c0_4, %c0_5] : memref<160x1x32xf32, #tpu.memory_space<vmem>>, vector<1x1x32xf32>
    %6 = vector.shape_cast %5 : vector<1x1x32xf32> to vector<1x32xf32>
    %c1 = arith.constant 1 : index
    %c0_6 = arith.constant 0 : index
    %7 = vector.load %arg18[%c1, %c0_6] : memref<34x32xf32, #tpu.memory_space<vmem>>, vector<1x32xf32>
    tpu.vector_store %arg18[%c1, %c0_6], %6 {strides = array<i32>} : memref<34x32xf32, #tpu.memory_space<vmem>>, vector<1x32xf32>,
    %c1_7 = arith.constant 1 : index
    %8 = memref.load %arg1[%c1_7] : memref<32xi32, #tpu.memory_space<smem>>
    %c10_i32 = arith.constant 10 : i32
    %9 = arith.addi %c10_i32, %8 : i32
    %10 = arith.index_cast %9 : i32 to index
    %c0_8 = arith.constant 0 : index
    %c0_9 = arith.constant 0 : index
    %11 = vector.load %arg2[%10, %c0_8, %c0_9] : memref<160x1x32xf32, #tpu.memory_space<vmem>>, vector<1x1x32xf32>
    %12 = vector.shape_cast %11 : vector<1x1x32xf32> to vector<1x32xf32>
    %c2 = arith.constant 2 : index
    %c0_10 = arith.constant 0 : index
    %13 = vector.load %arg18[%c2, %c0_10] : memref<34x32xf32, #tpu.memory_space<vmem>>, vector<1x32xf32>
    tpu.vector_store %arg18[%c2, %c0_10], %12 {strides = array<i32>} : memref<34x32xf32, #tpu.memory_space<vmem>>, vector<1x32xf32>,
    %c2_11 = arith.constant 2 : index
    %14 = memref.load %arg1[%c2_11] : memref<32xi32, #tpu.memory_space<smem>>
    %c20_i32 = arith.constant 20 : i32
    %15 = arith.addi %c20_i32, %14 : i32
    %16 = arith.index_cast %15 : i32 to index
    %c0_12 = arith.constant 0 : index
    %c0_13 = arith.constant 0 : index
    %17 = vector.load %arg2[%16, %c0_12, %c0_13] : memref<160x1x32xf32, #tpu.memory_space<vmem>>, vector<1x1x32xf32>
    %18 = vector.shape_cast %17 : vector<1x1x32xf32> to vector<1x32xf32>
    %c3 = arith.constant 3 : index
    %c0_14 = arith.constant 0 : index
    %19 = vector.load %arg18[%c3, %c0_14] : memref<34x32xf32, #tpu.memory_space<vmem>>, vector<1x32xf32>
    tpu.vector_store %arg18[%c3, %c0_14], %18 {strides = array<i32>} : memref<34x32xf32, #tpu.memory_space<vmem>>, vector<1x32xf32>,
    %c3_15 = arith.constant 3 : index
    %20 = memref.load %arg1[%c3_15] : memref<32xi32, #tpu.memory_space<smem>>
    %c30_i32 = arith.constant 30 : i32
    %21 = arith.addi %c30_i32, %20 : i32
    %22 = arith.index_cast %21 : i32 to index
    %c0_16 = arith.constant 0 : index
    %c0_17 = arith.constant 0 : index
    %23 = vector.load %arg2[%22, %c0_16, %c0_17] : memref<160x1x32xf32, #tpu.memory_space<vmem>>, vector<1x1x32xf32>
    %24 = vector.shape_cast %23 : vector<1x1x32xf32> to vector<1x32xf32>
    %c4 = arith.constant 4 : index
    %c0_18 = arith.constant 0 : index
    %25 = vector.load %arg18[%c4, %c0_18] : memref<34x32xf32, #tpu.memory_space<vmem>>, vector<1x32xf32>
    tpu.vector_store %arg18[%c4, %c0_18], %24 {strides = array<i32>} : memref<34x32xf32, #tpu.memory_space<vmem>>, vector<1x32xf32>,
    %c4_19 = arith.constant 4 : index
    %26 = memref.load %arg1[%c4_19] : memref<32xi32, #tpu.memory_space<smem>>
    %c40_i32 = arith.constant 40 : i32
    %27 = arith.addi %c40_i32, %26 : i32
    %28 = arith.index_cast %27 : i32 to index
    %c0_20 = arith.constant 0 : index
    %c0_21 = arith.constant 0 : index
    %29 = vector.load %arg2[%28, %c0_20, %c0_21] : memref<160x1x32xf32, #tpu.memory_space<vmem>>, vector<1x1x32xf32>
    %30 = vector.shape_cast %29 : vector<1x1x32xf32> to vector<1x32xf32>
    %c5 = arith.constant 5 : index
    %c0_22 = arith.constant 0 : index
    %31 = vector.load %arg18[%c5, %c0_22] : memref<34x32xf32, #tpu.memory_space<vmem>>, vector<1x32xf32>
    tpu.vector_store %arg18[%c5, %c0_22], %30 {strides = array<i32>} : memref<34x32xf32, #tpu.memory_space<vmem>>, vector<1x32xf32>,
    %c5_23 = arith.constant 5 : index
    %32 = memref.load %arg1[%c5_23] : memref<32xi32, #tpu.memory_space<smem>>
    %c50_i32 = arith.constant 50 : i32
    %33 = arith.addi %c50_i32, %32 : i32
    %34 = arith.index_cast %33 : i32 to index
    %c0_24 = arith.constant 0 : index
    %c0_25 = arith.constant 0 : index
    %35 = vector.load %arg2[%34, %c0_24, %c0_25] : memref<160x1x32xf32, #tpu.memory_space<vmem>>, vector<1x1x32xf32>
    %36 = vector.shape_cast %35 : vector<1x1x32xf32> to vector<1x32xf32>
    %c6 = arith.constant 6 : index
    %c0_26 = arith.constant 0 : index
    %37 = vector.load %arg18[%c6, %c0_26] : memref<34x32xf32, #tpu.memory_space<vmem>>, vector<1x32xf32>
    tpu.vector_store %arg18[%c6, %c0_26], %36 {strides = array<i32>} : memref<34x32xf32, #tpu.memory_space<vmem>>, vector<1x32xf32>,
    %c6_27 = arith.constant 6 : index
    %38 = memref.load %arg1[%c6_27] : memref<32xi32, #tpu.memory_space<smem>>
    %c60_i32 = arith.constant 60 : i32
    %39 = arith.addi %c60_i32, %38 : i32
    %40 = arith.index_cast %39 : i32 to index
    %c0_28 = arith.constant 0 : index
    %c0_29 = arith.constant 0 : index
    %41 = vector.load %arg2[%40, %c0_28, %c0_29] : memref<160x1x32xf32, #tpu.memory_space<vmem>>, vector<1x1x32xf32>
    %42 = vector.shape_cast %41 : vector<1x1x32xf32> to vector<1x32xf32>
    %c7 = arith.constant 7 : index
    %c0_30 = arith.constant 0 : index
    %43 = vector.load %arg18[%c7, %c0_30] : memref<34x32xf32, #tpu.memory_space<vmem>>, vector<1x32xf32>
    tpu.vector_store %arg18[%c7, %c0_30], %42 {strides = array<i32>} : memref<34x32xf32, #tpu.memory_space<vmem>>, vector<1x32xf32>,
    %c7_31 = arith.constant 7 : index
    %44 = memref.load %arg1[%c7_31] : memref<32xi32, #tpu.memory_space<smem>>
    %c70_i32 = arith.constant 70 : i32
    %45 = arith.addi %c70_i32, %44 : i32
    %46 = arith.index_cast %45 : i32 to index
    %c0_32 = arith.constant 0 : index
    %c0_33 = arith.constant 0 : index
    %47 = vector.load %arg2[%46, %c0_32, %c0_33] : memref<160x1x32xf32, #tpu.memory_space<vmem>>, vector<1x1x32xf32>
    %48 = vector.shape_cast %47 : vector<1x1x32xf32> to vector<1x32xf32>
    %c8 = arith.constant 8 : index
    %c0_34 = arith.constant 0 : index
    %49 = vector.load %arg18[%c8, %c0_34] : memref<34x32xf32, #tpu.memory_space<vmem>>, vector<1x32xf32>
    tpu.vector_store %arg18[%c8, %c0_34], %48 {strides = array<i32>} : memref<34x32xf32, #tpu.memory_space<vmem>>, vector<1x32xf32>,
    %c8_35 = arith.constant 8 : index
    %50 = memref.load %arg1[%c8_35] : memref<32xi32, #tpu.memory_space<smem>>
    %c80_i32 = arith.constant 80 : i32
    %51 = arith.addi %c80_i32, %50 : i32
    %52 = arith.index_cast %51 : i32 to index
    %c0_36 = arith.constant 0 : index
    %c0_37 = arith.constant 0 : index
    %53 = vector.load %arg2[%52, %c0_36, %c0_37] : memref<160x1x32xf32, #tpu.memory_space<vmem>>, vector<1x1x32xf32>
    %54 = vector.shape_cast %53 : vector<1x1x32xf32> to vector<1x32xf32>
    %c9 = arith.constant 9 : index
    %c0_38 = arith.constant 0 : index
    %55 = vector.load %arg18[%c9, %c0_38] : memref<34x32xf32, #tpu.memory_space<vmem>>, vector<1x32xf32>
    tpu.vector_store %arg18[%c9, %c0_38], %54 {strides = array<i32>} : memref<34x32xf32, #tpu.memory_space<vmem>>, vector<1x32xf32>,
    %c9_39 = arith.constant 9 : index
    %56 = memref.load %arg1[%c9_39] : memref<32xi32, #tpu.memory_space<smem>>
    %c90_i32 = arith.constant 90 : i32
    %57 = arith.addi %c90_i32, %56 : i32
    %58 = arith.index_cast %57 : i32 to index
    %c0_40 = arith.constant 0 : index
    %c0_41 = arith.constant 0 : index
    %59 = vector.load %arg2[%58, %c0_40, %c0_41] : memref<160x1x32xf32, #tpu.memory_space<vmem>>, vector<1x1x32xf32>
    %60 = vector.shape_cast %59 : vector<1x1x32xf32> to vector<1x32xf32>
    %c10 = arith.constant 10 : index
    %c0_42 = arith.constant 0 : index
    %61 = vector.load %arg18[%c10, %c0_42] : memref<34x32xf32, #tpu.memory_space<vmem>>, vector<1x32xf32>
    tpu.vector_store %arg18[%c10, %c0_42], %60 {strides = array<i32>} : memref<34x32xf32, #tpu.memory_space<vmem>>, vector<1x32xf32>,
    %c10_43 = arith.constant 10 : index
    %62 = memref.load %arg1[%c10_43] : memref<32xi32, #tpu.memory_space<smem>>
    %c100_i32 = arith.constant 100 : i32
    %63 = arith.addi %c100_i32, %62 : i32
    %64 = arith.index_cast %63 : i32 to index
    %c0_44 = arith.constant 0 : index
    %c0_45 = arith.constant 0 : index
    %65 = vector.load %arg2[%64, %c0_44, %c0_45] : memref<160x1x32xf32, #tpu.memory_space<vmem>>, vector<1x1x32xf32>
    %66 = vector.shape_cast %65 : vector<1x1x32xf32> to vector<1x32xf32>
    %c11 = arith.constant 11 : index
    %c0_46 = arith.constant 0 : index
    %67 = vector.load %arg18[%c11, %c0_46] : memref<34x32xf32, #tpu.memory_space<vmem>>, vector<1x32xf32>
    tpu.vector_store %arg18[%c11, %c0_46], %66 {strides = array<i32>} : memref<34x32xf32, #tpu.memory_space<vmem>>, vector<1x32xf32>,
    %c11_47 = arith.constant 11 : index
    %68 = memref.load %arg1[%c11_47] : memref<32xi32, #tpu.memory_space<smem>>
    %c110_i32 = arith.constant 110 : i32
    %69 = arith.addi %c110_i32, %68 : i32
    %70 = arith.index_cast %69 : i32 to index
    %c0_48 = arith.constant 0 : index
    %c0_49 = arith.constant 0 : index
    %71 = vector.load %arg2[%70, %c0_48, %c0_49] : memref<160x1x32xf32, #tpu.memory_space<vmem>>, vector<1x1x32xf32>
    %72 = vector.shape_cast %71 : vector<1x1x32xf32> to vector<1x32xf32>
    %c12 = arith.constant 12 : index
    %c0_50 = arith.constant 0 : index
    %73 = vector.load %arg18[%c12, %c0_50] : memref<34x32xf32, #tpu.memory_space<vmem>>, vector<1x32xf32>
    tpu.vector_store %arg18[%c12, %c0_50], %72 {strides = array<i32>} : memref<34x32xf32, #tpu.memory_space<vmem>>, vector<1x32xf32>,
    %c12_51 = arith.constant 12 : index
    %74 = memref.load %arg1[%c12_51] : memref<32xi32, #tpu.memory_space<smem>>
    %c120_i32 = arith.constant 120 : i32
    %75 = arith.addi %c120_i32, %74 : i32
    %76 = arith.index_cast %75 : i32 to index
    %c0_52 = arith.constant 0 : index
    %c0_53 = arith.constant 0 : index
    %77 = vector.load %arg2[%76, %c0_52, %c0_53] : memref<160x1x32xf32, #tpu.memory_space<vmem>>, vector<1x1x32xf32>
    %78 = vector.shape_cast %77 : vector<1x1x32xf32> to vector<1x32xf32>
    %c13 = arith.constant 13 : index
    %c0_54 = arith.constant 0 : index
    %79 = vector.load %arg18[%c13, %c0_54] : memref<34x32xf32, #tpu.memory_space<vmem>>, vector<1x32xf32>
    tpu.vector_store %arg18[%c13, %c0_54], %78 {strides = array<i32>} : memref<34x32xf32, #tpu.memory_space<vmem>>, vector<1x32xf32>,
    %c13_55 = arith.constant 13 : index
    %80 = memref.load %arg1[%c13_55] : memref<32xi32, #tpu.memory_space<smem>>
    %c130_i32 = arith.constant 130 : i32
    %81 = arith.addi %c130_i32, %80 : i32
    %82 = arith.index_cast %81 : i32 to index
    %c0_56 = arith.constant 0 : index
    %c0_57 = arith.constant 0 : index
    %83 = vector.load %arg2[%82, %c0_56, %c0_57] : memref<160x1x32xf32, #tpu.memory_space<vmem>>, vector<1x1x32xf32>
    %84 = vector.shape_cast %83 : vector<1x1x32xf32> to vector<1x32xf32>
    %c14 = arith.constant 14 : index
    %c0_58 = arith.constant 0 : index
    %85 = vector.load %arg18[%c14, %c0_58] : memref<34x32xf32, #tpu.memory_space<vmem>>, vector<1x32xf32>
    tpu.vector_store %arg18[%c14, %c0_58], %84 {strides = array<i32>} : memref<34x32xf32, #tpu.memory_space<vmem>>, vector<1x32xf32>,
    %c14_59 = arith.constant 14 : index
    %86 = memref.load %arg1[%c14_59] : memref<32xi32, #tpu.memory_space<smem>>
    %c140_i32 = arith.constant 140 : i32
    %87 = arith.addi %c140_i32, %86 : i32
    %88 = arith.index_cast %87 : i32 to index
    %c0_60 = arith.constant 0 : index
    %c0_61 = arith.constant 0 : index
    %89 = vector.load %arg2[%88, %c0_60, %c0_61] : memref<160x1x32xf32, #tpu.memory_space<vmem>>, vector<1x1x32xf32>
    %90 = vector.shape_cast %89 : vector<1x1x32xf32> to vector<1x32xf32>
    %c15 = arith.constant 15 : index
    %c0_62 = arith.constant 0 : index
    %91 = vector.load %arg18[%c15, %c0_62] : memref<34x32xf32, #tpu.memory_space<vmem>>, vector<1x32xf32>
    tpu.vector_store %arg18[%c15, %c0_62], %90 {strides = array<i32>} : memref<34x32xf32, #tpu.memory_space<vmem>>, vector<1x32xf32>,
    %c15_63 = arith.constant 15 : index
    %92 = memref.load %arg1[%c15_63] : memref<32xi32, #tpu.memory_space<smem>>
    %c150_i32 = arith.constant 150 : i32
    %93 = arith.addi %c150_i32, %92 : i32
    %94 = arith.index_cast %93 : i32 to index
    %c0_64 = arith.constant 0 : index
    %c0_65 = arith.constant 0 : index
    %95 = vector.load %arg2[%94, %c0_64, %c0_65] : memref<160x1x32xf32, #tpu.memory_space<vmem>>, vector<1x1x32xf32>
    %96 = vector.shape_cast %95 : vector<1x1x32xf32> to vector<1x32xf32>
    %c16 = arith.constant 16 : index
    %c0_66 = arith.constant 0 : index
    %97 = vector.load %arg18[%c16, %c0_66] : memref<34x32xf32, #tpu.memory_space<vmem>>, vector<1x32xf32>
    tpu.vector_store %arg18[%c16, %c0_66], %96 {strides = array<i32>} : memref<34x32xf32, #tpu.memory_space<vmem>>, vector<1x32xf32>,
    %c0_67 = arith.constant 0 : index
    %c0_68 = arith.constant 0 : index
    %98 = vector.load %arg3[%c0_67, %c0_68] : memref<1x32xf32, #tpu.memory_space<vmem>>, vector<1x32xf32>
    %c17 = arith.constant 17 : index
    %c0_69 = arith.constant 0 : index
    %99 = vector.load %arg18[%c17, %c0_69] : memref<34x32xf32, #tpu.memory_space<vmem>>, vector<1x32xf32>
    tpu.vector_store %arg18[%c17, %c0_69], %98 {strides = array<i32>} : memref<34x32xf32, #tpu.memory_space<vmem>>, vector<1x32xf32>,
    %c16_70 = arith.constant 16 : index
    %100 = memref.load %arg1[%c16_70] : memref<32xi32, #tpu.memory_space<smem>>
    %c0_i32_71 = arith.constant 0 : i32
    %101 = arith.addi %c0_i32_71, %100 : i32
    %102 = arith.index_cast %101 : i32 to index
    %c0_72 = arith.constant 0 : index
    %c0_73 = arith.constant 0 : index
    %103 = vector.load %arg2[%102, %c0_72, %c0_73] : memref<160x1x32xf32, #tpu.memory_space<vmem>>, vector<1x1x32xf32>
    %104 = vector.shape_cast %103 : vector<1x1x32xf32> to vector<1x32xf32>
    %c18 = arith.constant 18 : index
    %c0_74 = arith.constant 0 : index
    %105 = vector.load %arg18[%c18, %c0_74] : memref<34x32xf32, #tpu.memory_space<vmem>>, vector<1x32xf32>
    tpu.vector_store %arg18[%c18, %c0_74], %104 {strides = array<i32>} : memref<34x32xf32, #tpu.memory_space<vmem>>, vector<1x32xf32>,
    %c17_75 = arith.constant 17 : index
    %106 = memref.load %arg1[%c17_75] : memref<32xi32, #tpu.memory_space<smem>>
    %c10_i32_76 = arith.constant 10 : i32
    %107 = arith.addi %c10_i32_76, %106 : i32
    %108 = arith.index_cast %107 : i32 to index
    %c0_77 = arith.constant 0 : index
    %c0_78 = arith.constant 0 : index
    %109 = vector.load %arg2[%108, %c0_77, %c0_78] : memref<160x1x32xf32, #tpu.memory_space<vmem>>, vector<1x1x32xf32>
    %110 = vector.shape_cast %109 : vector<1x1x32xf32> to vector<1x32xf32>
    %c19 = arith.constant 19 : index
    %c0_79 = arith.constant 0 : index
    %111 = vector.load %arg18[%c19, %c0_79] : memref<34x32xf32, #tpu.memory_space<vmem>>, vector<1x32xf32>
    tpu.vector_store %arg18[%c19, %c0_79], %110 {strides = array<i32>} : memref<34x32xf32, #tpu.memory_space<vmem>>, vector<1x32xf32>,
    %c18_80 = arith.constant 18 : index
    %112 = memref.load %arg1[%c18_80] : memref<32xi32, #tpu.memory_space<smem>>
    %c20_i32_81 = arith.constant 20 : i32
    %113 = arith.addi %c20_i32_81, %112 : i32
    %114 = arith.index_cast %113 : i32 to index
    %c0_82 = arith.constant 0 : index
    %c0_83 = arith.constant 0 : index
    %115 = vector.load %arg2[%114, %c0_82, %c0_83] : memref<160x1x32xf32, #tpu.memory_space<vmem>>, vector<1x1x32xf32>
    %116 = vector.shape_cast %115 : vector<1x1x32xf32> to vector<1x32xf32>
    %c20 = arith.constant 20 : index
    %c0_84 = arith.constant 0 : index
    %117 = vector.load %arg18[%c20, %c0_84] : memref<34x32xf32, #tpu.memory_space<vmem>>, vector<1x32xf32>
    tpu.vector_store %arg18[%c20, %c0_84], %116 {strides = array<i32>} : memref<34x32xf32, #tpu.memory_space<vmem>>, vector<1x32xf32>,
    %c19_85 = arith.constant 19 : index
    %118 = memref.load %arg1[%c19_85] : memref<32xi32, #tpu.memory_space<smem>>
    %c30_i32_86 = arith.constant 30 : i32
    %119 = arith.addi %c30_i32_86, %118 : i32
    %120 = arith.index_cast %119 : i32 to index
    %c0_87 = arith.constant 0 : index
    %c0_88 = arith.constant 0 : index
    %121 = vector.load %arg2[%120, %c0_87, %c0_88] : memref<160x1x32xf32, #tpu.memory_space<vmem>>, vector<1x1x32xf32>
    %122 = vector.shape_cast %121 : vector<1x1x32xf32> to vector<1x32xf32>
    %c21 = arith.constant 21 : index
    %c0_89 = arith.constant 0 : index
    %123 = vector.load %arg18[%c21, %c0_89] : memref<34x32xf32, #tpu.memory_space<vmem>>, vector<1x32xf32>
    tpu.vector_store %arg18[%c21, %c0_89], %122 {strides = array<i32>} : memref<34x32xf32, #tpu.memory_space<vmem>>, vector<1x32xf32>,
    %c20_90 = arith.constant 20 : index
    %124 = memref.load %arg1[%c20_90] : memref<32xi32, #tpu.memory_space<smem>>
    %c40_i32_91 = arith.constant 40 : i32
    %125 = arith.addi %c40_i32_91, %124 : i32
    %126 = arith.index_cast %125 : i32 to index
    %c0_92 = arith.constant 0 : index
    %c0_93 = arith.constant 0 : index
    %127 = vector.load %arg2[%126, %c0_92, %c0_93] : memref<160x1x32xf32, #tpu.memory_space<vmem>>, vector<1x1x32xf32>
    %128 = vector.shape_cast %127 : vector<1x1x32xf32> to vector<1x32xf32>
    %c22 = arith.constant 22 : index
    %c0_94 = arith.constant 0 : index
    %129 = vector.load %arg18[%c22, %c0_94] : memref<34x32xf32, #tpu.memory_space<vmem>>, vector<1x32xf32>
    tpu.vector_store %arg18[%c22, %c0_94], %128 {strides = array<i32>} : memref<34x32xf32, #tpu.memory_space<vmem>>, vector<1x32xf32>,
    %c21_95 = arith.constant 21 : index
    %130 = memref.load %arg1[%c21_95] : memref<32xi32, #tpu.memory_space<smem>>
    %c50_i32_96 = arith.constant 50 : i32
    %131 = arith.addi %c50_i32_96, %130 : i32
    %132 = arith.index_cast %131 : i32 to index
    %c0_97 = arith.constant 0 : index
    %c0_98 = arith.constant 0 : index
    %133 = vector.load %arg2[%132, %c0_97, %c0_98] : memref<160x1x32xf32, #tpu.memory_space<vmem>>, vector<1x1x32xf32>
    %134 = vector.shape_cast %133 : vector<1x1x32xf32> to vector<1x32xf32>
    %c23 = arith.constant 23 : index
    %c0_99 = arith.constant 0 : index
    %135 = vector.load %arg18[%c23, %c0_99] : memref<34x32xf32, #tpu.memory_space<vmem>>, vector<1x32xf32>
    tpu.vector_store %arg18[%c23, %c0_99], %134 {strides = array<i32>} : memref<34x32xf32, #tpu.memory_space<vmem>>, vector<1x32xf32>,
    %c22_100 = arith.constant 22 : index
    %136 = memref.load %arg1[%c22_100] : memref<32xi32, #tpu.memory_space<smem>>
    %c60_i32_101 = arith.constant 60 : i32
    %137 = arith.addi %c60_i32_101, %136 : i32
    %138 = arith.index_cast %137 : i32 to index
    %c0_102 = arith.constant 0 : index
    %c0_103 = arith.constant 0 : index
    %139 = vector.load %arg2[%138, %c0_102, %c0_103] : memref<160x1x32xf32, #tpu.memory_space<vmem>>, vector<1x1x32xf32>
    %140 = vector.shape_cast %139 : vector<1x1x32xf32> to vector<1x32xf32>
    %c24 = arith.constant 24 : index
    %c0_104 = arith.constant 0 : index
    %141 = vector.load %arg18[%c24, %c0_104] : memref<34x32xf32, #tpu.memory_space<vmem>>, vector<1x32xf32>
    tpu.vector_store %arg18[%c24, %c0_104], %140 {strides = array<i32>} : memref<34x32xf32, #tpu.memory_space<vmem>>, vector<1x32xf32>,
    %c23_105 = arith.constant 23 : index
    %142 = memref.load %arg1[%c23_105] : memref<32xi32, #tpu.memory_space<smem>>
    %c70_i32_106 = arith.constant 70 : i32
    %143 = arith.addi %c70_i32_106, %142 : i32
    %144 = arith.index_cast %143 : i32 to index
    %c0_107 = arith.constant 0 : index
    %c0_108 = arith.constant 0 : index
    %145 = vector.load %arg2[%144, %c0_107, %c0_108] : memref<160x1x32xf32, #tpu.memory_space<vmem>>, vector<1x1x32xf32>
    %146 = vector.shape_cast %145 : vector<1x1x32xf32> to vector<1x32xf32>
    %c25 = arith.constant 25 : index
    %c0_109 = arith.constant 0 : index
    %147 = vector.load %arg18[%c25, %c0_109] : memref<34x32xf32, #tpu.memory_space<vmem>>, vector<1x32xf32>
    tpu.vector_store %arg18[%c25, %c0_109], %146 {strides = array<i32>} : memref<34x32xf32, #tpu.memory_space<vmem>>, vector<1x32xf32>,
    %c24_110 = arith.constant 24 : index
    %148 = memref.load %arg1[%c24_110] : memref<32xi32, #tpu.memory_space<smem>>
    %c80_i32_111 = arith.constant 80 : i32
    %149 = arith.addi %c80_i32_111, %148 : i32
    %150 = arith.index_cast %149 : i32 to index
    %c0_112 = arith.constant 0 : index
    %c0_113 = arith.constant 0 : index
    %151 = vector.load %arg2[%150, %c0_112, %c0_113] : memref<160x1x32xf32, #tpu.memory_space<vmem>>, vector<1x1x32xf32>
    %152 = vector.shape_cast %151 : vector<1x1x32xf32> to vector<1x32xf32>
    %c26 = arith.constant 26 : index
    %c0_114 = arith.constant 0 : index
    %153 = vector.load %arg18[%c26, %c0_114] : memref<34x32xf32, #tpu.memory_space<vmem>>, vector<1x32xf32>
    tpu.vector_store %arg18[%c26, %c0_114], %152 {strides = array<i32>} : memref<34x32xf32, #tpu.memory_space<vmem>>, vector<1x32xf32>,
    %c25_115 = arith.constant 25 : index
    %154 = memref.load %arg1[%c25_115] : memref<32xi32, #tpu.memory_space<smem>>
    %c90_i32_116 = arith.constant 90 : i32
    %155 = arith.addi %c90_i32_116, %154 : i32
    %156 = arith.index_cast %155 : i32 to index
    %c0_117 = arith.constant 0 : index
    %c0_118 = arith.constant 0 : index
    %157 = vector.load %arg2[%156, %c0_117, %c0_118] : memref<160x1x32xf32, #tpu.memory_space<vmem>>, vector<1x1x32xf32>
    %158 = vector.shape_cast %157 : vector<1x1x32xf32> to vector<1x32xf32>
    %c27 = arith.constant 27 : index
    %c0_119 = arith.constant 0 : index
    %159 = vector.load %arg18[%c27, %c0_119] : memref<34x32xf32, #tpu.memory_space<vmem>>, vector<1x32xf32>
    tpu.vector_store %arg18[%c27, %c0_119], %158 {strides = array<i32>} : memref<34x32xf32, #tpu.memory_space<vmem>>, vector<1x32xf32>,
    %c26_120 = arith.constant 26 : index
    %160 = memref.load %arg1[%c26_120] : memref<32xi32, #tpu.memory_space<smem>>
    %c100_i32_121 = arith.constant 100 : i32
    %161 = arith.addi %c100_i32_121, %160 : i32
    %162 = arith.index_cast %161 : i32 to index
    %c0_122 = arith.constant 0 : index
    %c0_123 = arith.constant 0 : index
    %163 = vector.load %arg2[%162, %c0_122, %c0_123] : memref<160x1x32xf32, #tpu.memory_space<vmem>>, vector<1x1x32xf32>
    %164 = vector.shape_cast %163 : vector<1x1x32xf32> to vector<1x32xf32>
    %c28 = arith.constant 28 : index
    %c0_124 = arith.constant 0 : index
    %165 = vector.load %arg18[%c28, %c0_124] : memref<34x32xf32, #tpu.memory_space<vmem>>, vector<1x32xf32>
    tpu.vector_store %arg18[%c28, %c0_124], %164 {strides = array<i32>} : memref<34x32xf32, #tpu.memory_space<vmem>>, vector<1x32xf32>,
    %c27_125 = arith.constant 27 : index
    %166 = memref.load %arg1[%c27_125] : memref<32xi32, #tpu.memory_space<smem>>
    %c110_i32_126 = arith.constant 110 : i32
    %167 = arith.addi %c110_i32_126, %166 : i32
    %168 = arith.index_cast %167 : i32 to index
    %c0_127 = arith.constant 0 : index
    %c0_128 = arith.constant 0 : index
    %169 = vector.load %arg2[%168, %c0_127, %c0_128] : memref<160x1x32xf32, #tpu.memory_space<vmem>>, vector<1x1x32xf32>
    %170 = vector.shape_cast %169 : vector<1x1x32xf32> to vector<1x32xf32>
    %c29 = arith.constant 29 : index
    %c0_129 = arith.constant 0 : index
    %171 = vector.load %arg18[%c29, %c0_129] : memref<34x32xf32, #tpu.memory_space<vmem>>, vector<1x32xf32>
    tpu.vector_store %arg18[%c29, %c0_129], %170 {strides = array<i32>} : memref<34x32xf32, #tpu.memory_space<vmem>>, vector<1x32xf32>,
    %c28_130 = arith.constant 28 : index
    %172 = memref.load %arg1[%c28_130] : memref<32xi32, #tpu.memory_space<smem>>
    %c120_i32_131 = arith.constant 120 : i32
    %173 = arith.addi %c120_i32_131, %172 : i32
    %174 = arith.index_cast %173 : i32 to index
    %c0_132 = arith.constant 0 : index
    %c0_133 = arith.constant 0 : index
    %175 = vector.load %arg2[%174, %c0_132, %c0_133] : memref<160x1x32xf32, #tpu.memory_space<vmem>>, vector<1x1x32xf32>
    %176 = vector.shape_cast %175 : vector<1x1x32xf32> to vector<1x32xf32>
    %c30 = arith.constant 30 : index
    %c0_134 = arith.constant 0 : index
    %177 = vector.load %arg18[%c30, %c0_134] : memref<34x32xf32, #tpu.memory_space<vmem>>, vector<1x32xf32>
    tpu.vector_store %arg18[%c30, %c0_134], %176 {strides = array<i32>} : memref<34x32xf32, #tpu.memory_space<vmem>>, vector<1x32xf32>,
    %c29_135 = arith.constant 29 : index
    %178 = memref.load %arg1[%c29_135] : memref<32xi32, #tpu.memory_space<smem>>
    %c130_i32_136 = arith.constant 130 : i32
    %179 = arith.addi %c130_i32_136, %178 : i32
    %180 = arith.index_cast %179 : i32 to index
    %c0_137 = arith.constant 0 : index
    %c0_138 = arith.constant 0 : index
    %181 = vector.load %arg2[%180, %c0_137, %c0_138] : memref<160x1x32xf32, #tpu.memory_space<vmem>>, vector<1x1x32xf32>
    %182 = vector.shape_cast %181 : vector<1x1x32xf32> to vector<1x32xf32>
    %c31 = arith.constant 31 : index
    %c0_139 = arith.constant 0 : index
    %183 = vector.load %arg18[%c31, %c0_139] : memref<34x32xf32, #tpu.memory_space<vmem>>, vector<1x32xf32>
    tpu.vector_store %arg18[%c31, %c0_139], %182 {strides = array<i32>} : memref<34x32xf32, #tpu.memory_space<vmem>>, vector<1x32xf32>,
    %c30_140 = arith.constant 30 : index
    %184 = memref.load %arg1[%c30_140] : memref<32xi32, #tpu.memory_space<smem>>
    %c140_i32_141 = arith.constant 140 : i32
    %185 = arith.addi %c140_i32_141, %184 : i32
    %186 = arith.index_cast %185 : i32 to index
    %c0_142 = arith.constant 0 : index
    %c0_143 = arith.constant 0 : index
    %187 = vector.load %arg2[%186, %c0_142, %c0_143] : memref<160x1x32xf32, #tpu.memory_space<vmem>>, vector<1x1x32xf32>
    %188 = vector.shape_cast %187 : vector<1x1x32xf32> to vector<1x32xf32>
    %c32 = arith.constant 32 : index
    %c0_144 = arith.constant 0 : index
    %189 = vector.load %arg18[%c32, %c0_144] : memref<34x32xf32, #tpu.memory_space<vmem>>, vector<1x32xf32>
    tpu.vector_store %arg18[%c32, %c0_144], %188 {strides = array<i32>} : memref<34x32xf32, #tpu.memory_space<vmem>>, vector<1x32xf32>,
    %c31_145 = arith.constant 31 : index
    %190 = memref.load %arg1[%c31_145] : memref<32xi32, #tpu.memory_space<smem>>
    %c150_i32_146 = arith.constant 150 : i32
    %191 = arith.addi %c150_i32_146, %190 : i32
    %192 = arith.index_cast %191 : i32 to index
    %c0_147 = arith.constant 0 : index
    %c0_148 = arith.constant 0 : index
    %193 = vector.load %arg2[%192, %c0_147, %c0_148] : memref<160x1x32xf32, #tpu.memory_space<vmem>>, vector<1x1x32xf32>
    %194 = vector.shape_cast %193 : vector<1x1x32xf32> to vector<1x32xf32>
    %c33 = arith.constant 33 : index
    %c0_149 = arith.constant 0 : index
    %195 = vector.load %arg18[%c33, %c0_149] : memref<34x32xf32, #tpu.memory_space<vmem>>, vector<1x32xf32>
    tpu.vector_store %arg18[%c33, %c0_149], %194 {strides = array<i32>} : memref<34x32xf32, #tpu.memory_space<vmem>>, vector<1x32xf32>,
    %c0_150 = arith.constant 0 : index
    %c0_151 = arith.constant 0 : index
    %196 = vector.load %arg18[%c0_150, %c0_151] : memref<34x32xf32, #tpu.memory_space<vmem>>, vector<34x32xf32>
    %197 = tpu.iota {dimensions = array<i32: 0>} : vector<34x34xi32>
    %198 = tpu.iota {dimensions = array<i32: 1>} : vector<34x34xi32>
    %c0_i32_152 = arith.constant 0 : i32
    %199 = vector.broadcast %c0_i32_152 : i32 to vector<34x34xi32>
    %200 = arith.cmpi sge, %197, %199 : vector<34x34xi32>
    %c17_i32 = arith.constant 17 : i32
    %201 = vector.broadcast %c17_i32 : i32 to vector<34x34xi32>
    %202 = arith.cmpi slt, %197, %201 : vector<34x34xi32>
    %203 = arith.andi %200, %202 : vector<34x34xi1>
    %c0_i32_153 = arith.constant 0 : i32
    %204 = vector.broadcast %c0_i32_153 : i32 to vector<34x34xi32>
    %205 = arith.cmpi sge, %198, %204 : vector<34x34xi32>
    %206 = arith.andi %203, %205 : vector<34x34xi1>
    %c17_i32_154 = arith.constant 17 : i32
    %207 = vector.broadcast %c17_i32_154 : i32 to vector<34x34xi32>
    %208 = arith.cmpi slt, %198, %207 : vector<34x34xi32>
    %209 = arith.andi %206, %208 : vector<34x34xi1>
    %c17_i32_155 = arith.constant 17 : i32
    %210 = vector.broadcast %c17_i32_155 : i32 to vector<34x34xi32>
    %211 = arith.cmpi sge, %197, %210 : vector<34x34xi32>
    %c34_i32 = arith.constant 34 : i32
    %212 = vector.broadcast %c34_i32 : i32 to vector<34x34xi32>
    %213 = arith.cmpi slt, %197, %212 : vector<34x34xi32>
    %214 = arith.andi %211, %213 : vector<34x34xi1>
    %c17_i32_156 = arith.constant 17 : i32
    %215 = vector.broadcast %c17_i32_156 : i32 to vector<34x34xi32>
    %216 = arith.cmpi sge, %198, %215 : vector<34x34xi32>
    %217 = arith.andi %214, %216 : vector<34x34xi1>
    %c34_i32_157 = arith.constant 34 : i32
    %218 = vector.broadcast %c34_i32_157 : i32 to vector<34x34xi32>
    %219 = arith.cmpi slt, %198, %218 : vector<34x34xi32>
    %220 = arith.andi %217, %219 : vector<34x34xi1>
    %221 = arith.ori %209, %220 : vector<34x34xi1>
    %cst = arith.constant 0.000000e+00 : f32
    %cst_158 = arith.constant -1.000000e+30 : f32
    %222 = vector.broadcast %cst : f32 to vector<34x34xf32>
    %223 = vector.broadcast %cst_158 : f32 to vector<34x34xf32>
    %224 = arith.select %221, %222, %223 : vector<34x34xi1>, vector<34x34xf32>
    %225 = arith.truncf %196 : vector<34x32xf32> to vector<34x32xbf16>
    %c0_159 = arith.constant 0 : index
    %c0_160 = arith.constant 0 : index
    %c0_161 = arith.constant 0 : index
    %226 = vector.load %arg4[%c0_159, %c0_160, %c0_161] : memref<2x32x128xbf16, #tpu.memory_space<vmem>>, vector<1x32x128xbf16>
    %227 = vector.shape_cast %226 : vector<1x32x128xbf16> to vector<32x128xbf16>
    %cst_162 = arith.constant dense<0.000000e+00> : vector<34x128xf32>
    %228 = tpu.matmul %225, %227, %cst_162 {dimension_numbers = #tpu.dot_dimension_numbers<[1], [0], [0], [1], [0, 0, 1, 1], [], []>} : vector<34x32xbf16>, vector<32x128xbf16>, vector<34x128xf32> -> vector<34x128xf32>
    %c0_163 = arith.constant 0 : index
    %c0_164 = arith.constant 0 : index
    %c0_165 = arith.constant 0 : index
    %229 = vector.load %arg5[%c0_163, %c0_164, %c0_165] : memref<2x32x128xbf16, #tpu.memory_space<vmem>>, vector<1x32x128xbf16>
    %230 = vector.shape_cast %229 : vector<1x32x128xbf16> to vector<32x128xbf16>
    %cst_166 = arith.constant dense<0.000000e+00> : vector<34x128xf32>
    %231 = tpu.matmul %225, %230, %cst_166 {dimension_numbers = #tpu.dot_dimension_numbers<[1], [0], [0], [1], [0, 0, 1, 1], [], []>} : vector<34x32xbf16>, vector<32x128xbf16>, vector<34x128xf32> -> vector<34x128xf32>
    %232 = arith.truncf %231 : vector<34x128xf32> to vector<34x128xbf16>
    %cst_167 = arith.constant 0.000000e+00 : f32
    %233 = vector.broadcast %cst_167 : f32 to vector<34x32xf32>
    %234 = vector.extract_strided_slice %228 {offsets = [0, 0], sizes = [34, 32], strides = [1, 1]} : vector<34x128xf32> to vector<34x32xf32>
    %235 = arith.truncf %234 : vector<34x32xf32> to vector<34x32xbf16>
    %cst_168 = arith.constant dense<0.000000e+00> : vector<34x34xf32>
    %236 = tpu.matmul %235, %225, %cst_168 {dimension_numbers = #tpu.dot_dimension_numbers<[1], [1], [0], [0], [0, 0, 1, 0], [], []>} : vector<34x32xbf16>, vector<34x32xbf16>, vector<34x34xf32> -> vector<34x34xf32>
    %cst_169 = arith.constant 0.176776692 : f32
    %237 = vector.broadcast %cst_169 : f32 to vector<34x34xf32>
    %238 = arith.mulf %236, %237 : vector<34x34xf32>
    %239 = arith.addf %238, %224 : vector<34x34xf32>
    %cst_170 = arith.constant dense<0xFF800000> : vector<34xf32>
    %240 = vector.multi_reduction <maximumf>, %239, %cst_170 [1] : vector<34x34xf32> to vector<34xf32>
    %241 = vector.shape_cast %240 : vector<34xf32> to vector<34x1xf32>
    %242 = vector.broadcast %241 : vector<34x1xf32> to vector<34x34xf32>
    %243 = arith.subf %239, %242 : vector<34x34xf32>
    %244 = math.exp %243 : vector<34x34xf32>
    %cst_171 = arith.constant dense<0.000000e+00> : vector<34xf32>
    %245 = vector.multi_reduction <add>, %244, %cst_171 [1] : vector<34x34xf32> to vector<34xf32>
    %246 = vector.shape_cast %245 : vector<34xf32> to vector<34x1xf32>
    %247 = tpu.reciprocal %246 {approx = true} : vector<34x1xf32> -> vector<34x1xf32>
    %248 = vector.broadcast %247 : vector<34x1xf32> to vector<34x34xf32>
    %249 = arith.mulf %244, %248 : vector<34x34xf32>
    %250 = vector.extract_strided_slice %232 {offsets = [0, 0], sizes = [34, 32], strides = [1, 1]} : vector<34x128xbf16> to vector<34x32xbf16>
    %251 = arith.truncf %249 : vector<34x34xf32> to vector<34x34xbf16>
    %cst_172 = arith.constant dense<0.000000e+00> : vector<34x32xf32>
    %252 = tpu.matmul %251, %250, %cst_172 {dimension_numbers = #tpu.dot_dimension_numbers<[1], [0], [0], [1], [0, 0, 1, 1], [], []>} : vector<34x34xbf16>, vector<34x32xbf16>, vector<34x32xf32> -> vector<34x32xf32>
    %253 = arith.addf %233, %252 : vector<34x32xf32>
    %254 = vector.extract_strided_slice %228 {offsets = [0, 32], sizes = [34, 32], strides = [1, 1]} : vector<34x128xf32> to vector<34x32xf32>
    %255 = arith.truncf %254 : vector<34x32xf32> to vector<34x32xbf16>
    %cst_173 = arith.constant dense<0.000000e+00> : vector<34x34xf32>
    %256 = tpu.matmul %255, %225, %cst_173 {dimension_numbers = #tpu.dot_dimension_numbers<[1], [1], [0], [0], [0, 0, 1, 0], [], []>} : vector<34x32xbf16>, vector<34x32xbf16>, vector<34x34xf32> -> vector<34x34xf32>
    %cst_174 = arith.constant 0.176776692 : f32
    %257 = vector.broadcast %cst_174 : f32 to vector<34x34xf32>
    %258 = arith.mulf %256, %257 : vector<34x34xf32>
    %259 = arith.addf %258, %224 : vector<34x34xf32>
    %cst_175 = arith.constant dense<0xFF800000> : vector<34xf32>
    %260 = vector.multi_reduction <maximumf>, %259, %cst_175 [1] : vector<34x34xf32> to vector<34xf32>
    %261 = vector.shape_cast %260 : vector<34xf32> to vector<34x1xf32>
    %262 = vector.broadcast %261 : vector<34x1xf32> to vector<34x34xf32>
    %263 = arith.subf %259, %262 : vector<34x34xf32>
    %264 = math.exp %263 : vector<34x34xf32>
    %cst_176 = arith.constant dense<0.000000e+00> : vector<34xf32>
    %265 = vector.multi_reduction <add>, %264, %cst_176 [1] : vector<34x34xf32> to vector<34xf32>
    %266 = vector.shape_cast %265 : vector<34xf32> to vector<34x1xf32>
    %267 = tpu.reciprocal %266 {approx = true} : vector<34x1xf32> -> vector<34x1xf32>
    %268 = vector.broadcast %267 : vector<34x1xf32> to vector<34x34xf32>
    %269 = arith.mulf %264, %268 : vector<34x34xf32>
    %270 = vector.extract_strided_slice %232 {offsets = [0, 32], sizes = [34, 32], strides = [1, 1]} : vector<34x128xbf16> to vector<34x32xbf16>
    %271 = arith.truncf %269 : vector<34x34xf32> to vector<34x34xbf16>
    %cst_177 = arith.constant dense<0.000000e+00> : vector<34x32xf32>
    %272 = tpu.matmul %271, %270, %cst_177 {dimension_numbers = #tpu.dot_dimension_numbers<[1], [0], [0], [1], [0, 0, 1, 1], [], []>} : vector<34x34xbf16>, vector<34x32xbf16>, vector<34x32xf32> -> vector<34x32xf32>
    %273 = arith.addf %253, %272 : vector<34x32xf32>
    %274 = vector.extract_strided_slice %228 {offsets = [0, 64], sizes = [34, 32], strides = [1, 1]} : vector<34x128xf32> to vector<34x32xf32>
    %275 = arith.truncf %274 : vector<34x32xf32> to vector<34x32xbf16>
    %cst_178 = arith.constant dense<0.000000e+00> : vector<34x34xf32>
    %276 = tpu.matmul %275, %225, %cst_178 {dimension_numbers = #tpu.dot_dimension_numbers<[1], [1], [0], [0], [0, 0, 1, 0], [], []>} : vector<34x32xbf16>, vector<34x32xbf16>, vector<34x34xf32> -> vector<34x34xf32>
    %cst_179 = arith.constant 0.176776692 : f32
    %277 = vector.broadcast %cst_179 : f32 to vector<34x34xf32>
    %278 = arith.mulf %276, %277 : vector<34x34xf32>
    %279 = arith.addf %278, %224 : vector<34x34xf32>
    %cst_180 = arith.constant dense<0xFF800000> : vector<34xf32>
    %280 = vector.multi_reduction <maximumf>, %279, %cst_180 [1] : vector<34x34xf32> to vector<34xf32>
    %281 = vector.shape_cast %280 : vector<34xf32> to vector<34x1xf32>
    %282 = vector.broadcast %281 : vector<34x1xf32> to vector<34x34xf32>
    %283 = arith.subf %279, %282 : vector<34x34xf32>
    %284 = math.exp %283 : vector<34x34xf32>
    %cst_181 = arith.constant dense<0.000000e+00> : vector<34xf32>
    %285 = vector.multi_reduction <add>, %284, %cst_181 [1] : vector<34x34xf32> to vector<34xf32>
    %286 = vector.shape_cast %285 : vector<34xf32> to vector<34x1xf32>
    %287 = tpu.reciprocal %286 {approx = true} : vector<34x1xf32> -> vector<34x1xf32>
    %288 = vector.broadcast %287 : vector<34x1xf32> to vector<34x34xf32>
    %289 = arith.mulf %284, %288 : vector<34x34xf32>
    %290 = vector.extract_strided_slice %232 {offsets = [0, 64], sizes = [34, 32], strides = [1, 1]} : vector<34x128xbf16> to vector<34x32xbf16>
    %291 = arith.truncf %289 : vector<34x34xf32> to vector<34x34xbf16>
    %cst_182 = arith.constant dense<0.000000e+00> : vector<34x32xf32>
    %292 = tpu.matmul %291, %290, %cst_182 {dimension_numbers = #tpu.dot_dimension_numbers<[1], [0], [0], [1], [0, 0, 1, 1], [], []>} : vector<34x34xbf16>, vector<34x32xbf16>, vector<34x32xf32> -> vector<34x32xf32>
    %293 = arith.addf %273, %292 : vector<34x32xf32>
    %294 = vector.extract_strided_slice %228 {offsets = [0, 96], sizes = [34, 32], strides = [1, 1]} : vector<34x128xf32> to vector<34x32xf32>
    %295 = arith.truncf %294 : vector<34x32xf32> to vector<34x32xbf16>
    %cst_183 = arith.constant dense<0.000000e+00> : vector<34x34xf32>
    %296 = tpu.matmul %295, %225, %cst_183 {dimension_numbers = #tpu.dot_dimension_numbers<[1], [1], [0], [0], [0, 0, 1, 0], [], []>} : vector<34x32xbf16>, vector<34x32xbf16>, vector<34x34xf32> -> vector<34x34xf32>
    %cst_184 = arith.constant 0.176776692 : f32
    %297 = vector.broadcast %cst_184 : f32 to vector<34x34xf32>
    %298 = arith.mulf %296, %297 : vector<34x34xf32>
    %299 = arith.addf %298, %224 : vector<34x34xf32>
    %cst_185 = arith.constant dense<0xFF800000> : vector<34xf32>
    %300 = vector.multi_reduction <maximumf>, %299, %cst_185 [1] : vector<34x34xf32> to vector<34xf32>
    %301 = vector.shape_cast %300 : vector<34xf32> to vector<34x1xf32>
    %302 = vector.broadcast %301 : vector<34x1xf32> to vector<34x34xf32>
    %303 = arith.subf %299, %302 : vector<34x34xf32>
    %304 = math.exp %303 : vector<34x34xf32>
    %cst_186 = arith.constant dense<0.000000e+00> : vector<34xf32>
    %305 = vector.multi_reduction <add>, %304, %cst_186 [1] : vector<34x34xf32> to vector<34xf32>
    %306 = vector.shape_cast %305 : vector<34xf32> to vector<34x1xf32>
    %307 = tpu.reciprocal %306 {approx = true} : vector<34x1xf32> -> vector<34x1xf32>
    %308 = vector.broadcast %307 : vector<34x1xf32> to vector<34x34xf32>
    %309 = arith.mulf %304, %308 : vector<34x34xf32>
    %310 = vector.extract_strided_slice %232 {offsets = [0, 96], sizes = [34, 32], strides = [1, 1]} : vector<34x128xbf16> to vector<34x32xbf16>
    %311 = arith.truncf %309 : vector<34x34xf32> to vector<34x34xbf16>
    %cst_187 = arith.constant dense<0.000000e+00> : vector<34x32xf32>
    %312 = tpu.matmul %311, %310, %cst_187 {dimension_numbers = #tpu.dot_dimension_numbers<[1], [0], [0], [1], [0, 0, 1, 1], [], []>} : vector<34x34xbf16>, vector<34x32xbf16>, vector<34x32xf32> -> vector<34x32xf32>
    %313 = arith.addf %293, %312 : vector<34x32xf32>
    %c0_188 = arith.constant 0 : index
    %c0_189 = arith.constant 0 : index
    %c0_190 = arith.constant 0 : index
    %314 = vector.load %arg6[%c0_188, %c0_189, %c0_190] : memref<2x1x32xf32, #tpu.memory_space<vmem>>, vector<1x1x32xf32>
    %315 = vector.shape_cast %314 : vector<1x1x32xf32> to vector<1x32xf32>
    %316 = vector.broadcast %315 : vector<1x32xf32> to vector<34x32xf32>
    %317 = arith.addf %313, %316 : vector<34x32xf32>
    %318 = arith.addf %196, %317 : vector<34x32xf32>
    %c0_191 = arith.constant 0 : index
    %c0_192 = arith.constant 0 : index
    %c0_193 = arith.constant 0 : index
    %319 = vector.load %arg7[%c0_191, %c0_192, %c0_193] : memref<2x1x32xf32, #tpu.memory_space<vmem>>, vector<1x1x32xf32>
    %320 = vector.shape_cast %319 : vector<1x1x32xf32> to vector<1x32xf32>
    %c0_194 = arith.constant 0 : index
    %c0_195 = arith.constant 0 : index
    %c0_196 = arith.constant 0 : index
    %321 = vector.load %arg8[%c0_194, %c0_195, %c0_196] : memref<2x1x32xf32, #tpu.memory_space<vmem>>, vector<1x1x32xf32>
    %322 = vector.shape_cast %321 : vector<1x1x32xf32> to vector<1x32xf32>
    %cst_197 = arith.constant dense<0.000000e+00> : vector<34xf32>
    %323 = vector.multi_reduction <add>, %318, %cst_197 [1] : vector<34x32xf32> to vector<34xf32>
    %324 = vector.shape_cast %323 : vector<34xf32> to vector<34x1xf32>
    %cst_198 = arith.constant 3.200000e+01 : f32
    %325 = vector.broadcast %cst_198 : f32 to vector<34x1xf32>
    %326 = arith.divf %324, %325 : vector<34x1xf32>
    %327 = vector.broadcast %326 : vector<34x1xf32> to vector<34x32xf32>
    %328 = arith.subf %318, %327 : vector<34x32xf32>
    %329 = arith.mulf %328, %328 : vector<34x32xf32>
    %cst_199 = arith.constant dense<0.000000e+00> : vector<34xf32>
    %330 = vector.multi_reduction <add>, %329, %cst_199 [1] : vector<34x32xf32> to vector<34xf32>
    %331 = vector.shape_cast %330 : vector<34xf32> to vector<34x1xf32>
    %cst_200 = arith.constant 3.200000e+01 : f32
    %332 = vector.broadcast %cst_200 : f32 to vector<34x1xf32>
    %333 = arith.divf %331, %332 : vector<34x1xf32>
    %334 = vector.broadcast %326 : vector<34x1xf32> to vector<34x32xf32>
    %335 = arith.subf %318, %334 : vector<34x32xf32>
    %cst_201 = arith.constant 9.99999974E-6 : f32
    %336 = vector.broadcast %cst_201 : f32 to vector<34x1xf32>
    %337 = arith.addf %333, %336 : vector<34x1xf32>
    %338 = math.rsqrt %337 : vector<34x1xf32>
    %339 = vector.broadcast %338 : vector<34x1xf32> to vector<34x32xf32>
    %340 = arith.mulf %335, %339 : vector<34x32xf32>
    %341 = vector.broadcast %320 : vector<1x32xf32> to vector<34x32xf32>
    %342 = arith.mulf %340, %341 : vector<34x32xf32>
    %343 = vector.broadcast %322 : vector<1x32xf32> to vector<34x32xf32>
    %344 = arith.addf %342, %343 : vector<34x32xf32>
    %345 = arith.truncf %344 : vector<34x32xf32> to vector<34x32xbf16>
    %c0_202 = arith.constant 0 : index
    %c0_203 = arith.constant 0 : index
    %c0_204 = arith.constant 0 : index
    %346 = vector.load %arg9[%c0_202, %c0_203, %c0_204] : memref<2x32x64xbf16, #tpu.memory_space<vmem>>, vector<1x32x64xbf16>
    %347 = vector.shape_cast %346 : vector<1x32x64xbf16> to vector<32x64xbf16>
    %cst_205 = arith.constant dense<0.000000e+00> : vector<34x64xf32>
    %348 = tpu.matmul %345, %347, %cst_205 {dimension_numbers = #tpu.dot_dimension_numbers<[1], [0], [0], [1], [0, 0, 1, 1], [], []>} : vector<34x32xbf16>, vector<32x64xbf16>, vector<34x64xf32> -> vector<34x64xf32>
    %c0_206 = arith.constant 0 : index
    %c0_207 = arith.constant 0 : index
    %c0_208 = arith.constant 0 : index
    %349 = vector.load %arg10[%c0_206, %c0_207, %c0_208] : memref<2x1x64xf32, #tpu.memory_space<vmem>>, vector<1x1x64xf32>
    %350 = vector.shape_cast %349 : vector<1x1x64xf32> to vector<1x64xf32>
    %351 = vector.broadcast %350 : vector<1x64xf32> to vector<34x64xf32>
    %352 = arith.addf %348, %351 : vector<34x64xf32>
    %cst_209 = arith.constant 0.000000e+00 : f32
    %353 = vector.broadcast %cst_209 : f32 to vector<34x64xf32>
    %354 = arith.maximumf %352, %353 : vector<34x64xf32>
    %355 = arith.truncf %354 : vector<34x64xf32> to vector<34x64xbf16>
    %c0_210 = arith.constant 0 : index
    %c0_211 = arith.constant 0 : index
    %c0_212 = arith.constant 0 : index
    %356 = vector.load %arg11[%c0_210, %c0_211, %c0_212] : memref<2x64x32xbf16, #tpu.memory_space<vmem>>, vector<1x64x32xbf16>
    %357 = vector.shape_cast %356 : vector<1x64x32xbf16> to vector<64x32xbf16>
    %cst_213 = arith.constant dense<0.000000e+00> : vector<34x32xf32>
    %358 = tpu.matmul %355, %357, %cst_213 {dimension_numbers = #tpu.dot_dimension_numbers<[1], [0], [0], [1], [0, 0, 1, 1], [], []>} : vector<34x64xbf16>, vector<64x32xbf16>, vector<34x32xf32> -> vector<34x32xf32>
    %c0_214 = arith.constant 0 : index
    %c0_215 = arith.constant 0 : index
    %c0_216 = arith.constant 0 : index
    %359 = vector.load %arg12[%c0_214, %c0_215, %c0_216] : memref<2x1x32xf32, #tpu.memory_space<vmem>>, vector<1x1x32xf32>
    %360 = vector.shape_cast %359 : vector<1x1x32xf32> to vector<1x32xf32>
    %361 = vector.broadcast %360 : vector<1x32xf32> to vector<34x32xf32>
    %362 = arith.addf %358, %361 : vector<34x32xf32>
    %363 = arith.addf %344, %362 : vector<34x32xf32>
    %c0_217 = arith.constant 0 : index
    %c0_218 = arith.constant 0 : index
    %c0_219 = arith.constant 0 : index
    %364 = vector.load %arg13[%c0_217, %c0_218, %c0_219] : memref<2x1x32xf32, #tpu.memory_space<vmem>>, vector<1x1x32xf32>
    %365 = vector.shape_cast %364 : vector<1x1x32xf32> to vector<1x32xf32>
    %c0_220 = arith.constant 0 : index
    %c0_221 = arith.constant 0 : index
    %c0_222 = arith.constant 0 : index
    %366 = vector.load %arg14[%c0_220, %c0_221, %c0_222] : memref<2x1x32xf32, #tpu.memory_space<vmem>>, vector<1x1x32xf32>
    %367 = vector.shape_cast %366 : vector<1x1x32xf32> to vector<1x32xf32>
    %cst_223 = arith.constant dense<0.000000e+00> : vector<34xf32>
    %368 = vector.multi_reduction <add>, %363, %cst_223 [1] : vector<34x32xf32> to vector<34xf32>
    %369 = vector.shape_cast %368 : vector<34xf32> to vector<34x1xf32>
    %cst_224 = arith.constant 3.200000e+01 : f32
    %370 = vector.broadcast %cst_224 : f32 to vector<34x1xf32>
    %371 = arith.divf %369, %370 : vector<34x1xf32>
    %372 = vector.broadcast %371 : vector<34x1xf32> to vector<34x32xf32>
    %373 = arith.subf %363, %372 : vector<34x32xf32>
    %374 = arith.mulf %373, %373 : vector<34x32xf32>
    %cst_225 = arith.constant dense<0.000000e+00> : vector<34xf32>
    %375 = vector.multi_reduction <add>, %374, %cst_225 [1] : vector<34x32xf32> to vector<34xf32>
    %376 = vector.shape_cast %375 : vector<34xf32> to vector<34x1xf32>
    %cst_226 = arith.constant 3.200000e+01 : f32
    %377 = vector.broadcast %cst_226 : f32 to vector<34x1xf32>
    %378 = arith.divf %376, %377 : vector<34x1xf32>
    %379 = vector.broadcast %371 : vector<34x1xf32> to vector<34x32xf32>
    %380 = arith.subf %363, %379 : vector<34x32xf32>
    %cst_227 = arith.constant 9.99999974E-6 : f32
    %381 = vector.broadcast %cst_227 : f32 to vector<34x1xf32>
    %382 = arith.addf %378, %381 : vector<34x1xf32>
    %383 = math.rsqrt %382 : vector<34x1xf32>
    %384 = vector.broadcast %383 : vector<34x1xf32> to vector<34x32xf32>
    %385 = arith.mulf %380, %384 : vector<34x32xf32>
    %386 = vector.broadcast %365 : vector<1x32xf32> to vector<34x32xf32>
    %387 = arith.mulf %385, %386 : vector<34x32xf32>
    %388 = vector.broadcast %367 : vector<1x32xf32> to vector<34x32xf32>
    %389 = arith.addf %387, %388 : vector<34x32xf32>
    %390 = arith.truncf %389 : vector<34x32xf32> to vector<34x32xbf16>
    %c1_228 = arith.constant 1 : index
    %c0_229 = arith.constant 0 : index
    %c0_230 = arith.constant 0 : index
    %391 = vector.load %arg4[%c1_228, %c0_229, %c0_230] : memref<2x32x128xbf16, #tpu.memory_space<vmem>>, vector<1x32x128xbf16>
    %392 = vector.shape_cast %391 : vector<1x32x128xbf16> to vector<32x128xbf16>
    %cst_231 = arith.constant dense<0.000000e+00> : vector<34x128xf32>
    %393 = tpu.matmul %390, %392, %cst_231 {dimension_numbers = #tpu.dot_dimension_numbers<[1], [0], [0], [1], [0, 0, 1, 1], [], []>} : vector<34x32xbf16>, vector<32x128xbf16>, vector<34x128xf32> -> vector<34x128xf32>
    %c1_232 = arith.constant 1 : index
    %c0_233 = arith.constant 0 : index
    %c0_234 = arith.constant 0 : index
    %394 = vector.load %arg5[%c1_232, %c0_233, %c0_234] : memref<2x32x128xbf16, #tpu.memory_space<vmem>>, vector<1x32x128xbf16>
    %395 = vector.shape_cast %394 : vector<1x32x128xbf16> to vector<32x128xbf16>
    %cst_235 = arith.constant dense<0.000000e+00> : vector<34x128xf32>
    %396 = tpu.matmul %390, %395, %cst_235 {dimension_numbers = #tpu.dot_dimension_numbers<[1], [0], [0], [1], [0, 0, 1, 1], [], []>} : vector<34x32xbf16>, vector<32x128xbf16>, vector<34x128xf32> -> vector<34x128xf32>
    %397 = arith.truncf %396 : vector<34x128xf32> to vector<34x128xbf16>
    %cst_236 = arith.constant 0.000000e+00 : f32
    %398 = vector.broadcast %cst_236 : f32 to vector<34x32xf32>
    %399 = vector.extract_strided_slice %393 {offsets = [0, 0], sizes = [34, 32], strides = [1, 1]} : vector<34x128xf32> to vector<34x32xf32>
    %400 = arith.truncf %399 : vector<34x32xf32> to vector<34x32xbf16>
    %cst_237 = arith.constant dense<0.000000e+00> : vector<34x34xf32>
    %401 = tpu.matmul %400, %390, %cst_237 {dimension_numbers = #tpu.dot_dimension_numbers<[1], [1], [0], [0], [0, 0, 1, 0], [], []>} : vector<34x32xbf16>, vector<34x32xbf16>, vector<34x34xf32> -> vector<34x34xf32>
    %cst_238 = arith.constant 0.176776692 : f32
    %402 = vector.broadcast %cst_238 : f32 to vector<34x34xf32>
    %403 = arith.mulf %401, %402 : vector<34x34xf32>
    %404 = arith.addf %403, %224 : vector<34x34xf32>
    %cst_239 = arith.constant dense<0xFF800000> : vector<34xf32>
    %405 = vector.multi_reduction <maximumf>, %404, %cst_239 [1] : vector<34x34xf32> to vector<34xf32>
    %406 = vector.shape_cast %405 : vector<34xf32> to vector<34x1xf32>
    %407 = vector.broadcast %406 : vector<34x1xf32> to vector<34x34xf32>
    %408 = arith.subf %404, %407 : vector<34x34xf32>
    %409 = math.exp %408 : vector<34x34xf32>
    %cst_240 = arith.constant dense<0.000000e+00> : vector<34xf32>
    %410 = vector.multi_reduction <add>, %409, %cst_240 [1] : vector<34x34xf32> to vector<34xf32>
    %411 = vector.shape_cast %410 : vector<34xf32> to vector<34x1xf32>
    %412 = tpu.reciprocal %411 {approx = true} : vector<34x1xf32> -> vector<34x1xf32>
    %413 = vector.broadcast %412 : vector<34x1xf32> to vector<34x34xf32>
    %414 = arith.mulf %409, %413 : vector<34x34xf32>
    %415 = vector.extract_strided_slice %397 {offsets = [0, 0], sizes = [34, 32], strides = [1, 1]} : vector<34x128xbf16> to vector<34x32xbf16>
    %416 = arith.truncf %414 : vector<34x34xf32> to vector<34x34xbf16>
    %cst_241 = arith.constant dense<0.000000e+00> : vector<34x32xf32>
    %417 = tpu.matmul %416, %415, %cst_241 {dimension_numbers = #tpu.dot_dimension_numbers<[1], [0], [0], [1], [0, 0, 1, 1], [], []>} : vector<34x34xbf16>, vector<34x32xbf16>, vector<34x32xf32> -> vector<34x32xf32>
    %418 = arith.addf %398, %417 : vector<34x32xf32>
    %419 = vector.extract_strided_slice %393 {offsets = [0, 32], sizes = [34, 32], strides = [1, 1]} : vector<34x128xf32> to vector<34x32xf32>
    %420 = arith.truncf %419 : vector<34x32xf32> to vector<34x32xbf16>
    %cst_242 = arith.constant dense<0.000000e+00> : vector<34x34xf32>
    %421 = tpu.matmul %420, %390, %cst_242 {dimension_numbers = #tpu.dot_dimension_numbers<[1], [1], [0], [0], [0, 0, 1, 0], [], []>} : vector<34x32xbf16>, vector<34x32xbf16>, vector<34x34xf32> -> vector<34x34xf32>
    %cst_243 = arith.constant 0.176776692 : f32
    %422 = vector.broadcast %cst_243 : f32 to vector<34x34xf32>
    %423 = arith.mulf %421, %422 : vector<34x34xf32>
    %424 = arith.addf %423, %224 : vector<34x34xf32>
    %cst_244 = arith.constant dense<0xFF800000> : vector<34xf32>
    %425 = vector.multi_reduction <maximumf>, %424, %cst_244 [1] : vector<34x34xf32> to vector<34xf32>
    %426 = vector.shape_cast %425 : vector<34xf32> to vector<34x1xf32>
    %427 = vector.broadcast %426 : vector<34x1xf32> to vector<34x34xf32>
    %428 = arith.subf %424, %427 : vector<34x34xf32>
    %429 = math.exp %428 : vector<34x34xf32>
    %cst_245 = arith.constant dense<0.000000e+00> : vector<34xf32>
    %430 = vector.multi_reduction <add>, %429, %cst_245 [1] : vector<34x34xf32> to vector<34xf32>
    %431 = vector.shape_cast %430 : vector<34xf32> to vector<34x1xf32>
    %432 = tpu.reciprocal %431 {approx = true} : vector<34x1xf32> -> vector<34x1xf32>
    %433 = vector.broadcast %432 : vector<34x1xf32> to vector<34x34xf32>
    %434 = arith.mulf %429, %433 : vector<34x34xf32>
    %435 = vector.extract_strided_slice %397 {offsets = [0, 32], sizes = [34, 32], strides = [1, 1]} : vector<34x128xbf16> to vector<34x32xbf16>
    %436 = arith.truncf %434 : vector<34x34xf32> to vector<34x34xbf16>
    %cst_246 = arith.constant dense<0.000000e+00> : vector<34x32xf32>
    %437 = tpu.matmul %436, %435, %cst_246 {dimension_numbers = #tpu.dot_dimension_numbers<[1], [0], [0], [1], [0, 0, 1, 1], [], []>} : vector<34x34xbf16>, vector<34x32xbf16>, vector<34x32xf32> -> vector<34x32xf32>
    %438 = arith.addf %418, %437 : vector<34x32xf32>
    %439 = vector.extract_strided_slice %393 {offsets = [0, 64], sizes = [34, 32], strides = [1, 1]} : vector<34x128xf32> to vector<34x32xf32>
    %440 = arith.truncf %439 : vector<34x32xf32> to vector<34x32xbf16>
    %cst_247 = arith.constant dense<0.000000e+00> : vector<34x34xf32>
    %441 = tpu.matmul %440, %390, %cst_247 {dimension_numbers = #tpu.dot_dimension_numbers<[1], [1], [0], [0], [0, 0, 1, 0], [], []>} : vector<34x32xbf16>, vector<34x32xbf16>, vector<34x34xf32> -> vector<34x34xf32>
    %cst_248 = arith.constant 0.176776692 : f32
    %442 = vector.broadcast %cst_248 : f32 to vector<34x34xf32>
    %443 = arith.mulf %441, %442 : vector<34x34xf32>
    %444 = arith.addf %443, %224 : vector<34x34xf32>
    %cst_249 = arith.constant dense<0xFF800000> : vector<34xf32>
    %445 = vector.multi_reduction <maximumf>, %444, %cst_249 [1] : vector<34x34xf32> to vector<34xf32>
    %446 = vector.shape_cast %445 : vector<34xf32> to vector<34x1xf32>
    %447 = vector.broadcast %446 : vector<34x1xf32> to vector<34x34xf32>
    %448 = arith.subf %444, %447 : vector<34x34xf32>
    %449 = math.exp %448 : vector<34x34xf32>
    %cst_250 = arith.constant dense<0.000000e+00> : vector<34xf32>
    %450 = vector.multi_reduction <add>, %449, %cst_250 [1] : vector<34x34xf32> to vector<34xf32>
    %451 = vector.shape_cast %450 : vector<34xf32> to vector<34x1xf32>
    %452 = tpu.reciprocal %451 {approx = true} : vector<34x1xf32> -> vector<34x1xf32>
    %453 = vector.broadcast %452 : vector<34x1xf32> to vector<34x34xf32>
    %454 = arith.mulf %449, %453 : vector<34x34xf32>
    %455 = vector.extract_strided_slice %397 {offsets = [0, 64], sizes = [34, 32], strides = [1, 1]} : vector<34x128xbf16> to vector<34x32xbf16>
    %456 = arith.truncf %454 : vector<34x34xf32> to vector<34x34xbf16>
    %cst_251 = arith.constant dense<0.000000e+00> : vector<34x32xf32>
    %457 = tpu.matmul %456, %455, %cst_251 {dimension_numbers = #tpu.dot_dimension_numbers<[1], [0], [0], [1], [0, 0, 1, 1], [], []>} : vector<34x34xbf16>, vector<34x32xbf16>, vector<34x32xf32> -> vector<34x32xf32>
    %458 = arith.addf %438, %457 : vector<34x32xf32>
    %459 = vector.extract_strided_slice %393 {offsets = [0, 96], sizes = [34, 32], strides = [1, 1]} : vector<34x128xf32> to vector<34x32xf32>
    %460 = arith.truncf %459 : vector<34x32xf32> to vector<34x32xbf16>
    %cst_252 = arith.constant dense<0.000000e+00> : vector<34x34xf32>
    %461 = tpu.matmul %460, %390, %cst_252 {dimension_numbers = #tpu.dot_dimension_numbers<[1], [1], [0], [0], [0, 0, 1, 0], [], []>} : vector<34x32xbf16>, vector<34x32xbf16>, vector<34x34xf32> -> vector<34x34xf32>
    %cst_253 = arith.constant 0.176776692 : f32
    %462 = vector.broadcast %cst_253 : f32 to vector<34x34xf32>
    %463 = arith.mulf %461, %462 : vector<34x34xf32>
    %464 = arith.addf %463, %224 : vector<34x34xf32>
    %cst_254 = arith.constant dense<0xFF800000> : vector<34xf32>
    %465 = vector.multi_reduction <maximumf>, %464, %cst_254 [1] : vector<34x34xf32> to vector<34xf32>
    %466 = vector.shape_cast %465 : vector<34xf32> to vector<34x1xf32>
    %467 = vector.broadcast %466 : vector<34x1xf32> to vector<34x34xf32>
    %468 = arith.subf %464, %467 : vector<34x34xf32>
    %469 = math.exp %468 : vector<34x34xf32>
    %cst_255 = arith.constant dense<0.000000e+00> : vector<34xf32>
    %470 = vector.multi_reduction <add>, %469, %cst_255 [1] : vector<34x34xf32> to vector<34xf32>
    %471 = vector.shape_cast %470 : vector<34xf32> to vector<34x1xf32>
    %472 = tpu.reciprocal %471 {approx = true} : vector<34x1xf32> -> vector<34x1xf32>
    %473 = vector.broadcast %472 : vector<34x1xf32> to vector<34x34xf32>
    %474 = arith.mulf %469, %473 : vector<34x34xf32>
    %475 = vector.extract_strided_slice %397 {offsets = [0, 96], sizes = [34, 32], strides = [1, 1]} : vector<34x128xbf16> to vector<34x32xbf16>
    %476 = arith.truncf %474 : vector<34x34xf32> to vector<34x34xbf16>
    %cst_256 = arith.constant dense<0.000000e+00> : vector<34x32xf32>
    %477 = tpu.matmul %476, %475, %cst_256 {dimension_numbers = #tpu.dot_dimension_numbers<[1], [0], [0], [1], [0, 0, 1, 1], [], []>} : vector<34x34xbf16>, vector<34x32xbf16>, vector<34x32xf32> -> vector<34x32xf32>
    %478 = arith.addf %458, %477 : vector<34x32xf32>
    %c1_257 = arith.constant 1 : index
    %c0_258 = arith.constant 0 : index
    %c0_259 = arith.constant 0 : index
    %479 = vector.load %arg6[%c1_257, %c0_258, %c0_259] : memref<2x1x32xf32, #tpu.memory_space<vmem>>, vector<1x1x32xf32>
    %480 = vector.shape_cast %479 : vector<1x1x32xf32> to vector<1x32xf32>
    %481 = vector.broadcast %480 : vector<1x32xf32> to vector<34x32xf32>
    %482 = arith.addf %478, %481 : vector<34x32xf32>
    %483 = arith.addf %389, %482 : vector<34x32xf32>
    %c1_260 = arith.constant 1 : index
    %c0_261 = arith.constant 0 : index
    %c0_262 = arith.constant 0 : index
    %484 = vector.load %arg7[%c1_260, %c0_261, %c0_262] : memref<2x1x32xf32, #tpu.memory_space<vmem>>, vector<1x1x32xf32>
    %485 = vector.shape_cast %484 : vector<1x1x32xf32> to vector<1x32xf32>
    %c1_263 = arith.constant 1 : index
    %c0_264 = arith.constant 0 : index
    %c0_265 = arith.constant 0 : index
    %486 = vector.load %arg8[%c1_263, %c0_264, %c0_265] : memref<2x1x32xf32, #tpu.memory_space<vmem>>, vector<1x1x32xf32>
    %487 = vector.shape_cast %486 : vector<1x1x32xf32> to vector<1x32xf32>
    %cst_266 = arith.constant dense<0.000000e+00> : vector<34xf32>
    %488 = vector.multi_reduction <add>, %483, %cst_266 [1] : vector<34x32xf32> to vector<34xf32>
    %489 = vector.shape_cast %488 : vector<34xf32> to vector<34x1xf32>
    %cst_267 = arith.constant 3.200000e+01 : f32
    %490 = vector.broadcast %cst_267 : f32 to vector<34x1xf32>
    %491 = arith.divf %489, %490 : vector<34x1xf32>
    %492 = vector.broadcast %491 : vector<34x1xf32> to vector<34x32xf32>
    %493 = arith.subf %483, %492 : vector<34x32xf32>
    %494 = arith.mulf %493, %493 : vector<34x32xf32>
    %cst_268 = arith.constant dense<0.000000e+00> : vector<34xf32>
    %495 = vector.multi_reduction <add>, %494, %cst_268 [1] : vector<34x32xf32> to vector<34xf32>
    %496 = vector.shape_cast %495 : vector<34xf32> to vector<34x1xf32>
    %cst_269 = arith.constant 3.200000e+01 : f32
    %497 = vector.broadcast %cst_269 : f32 to vector<34x1xf32>
    %498 = arith.divf %496, %497 : vector<34x1xf32>
    %499 = vector.broadcast %491 : vector<34x1xf32> to vector<34x32xf32>
    %500 = arith.subf %483, %499 : vector<34x32xf32>
    %cst_270 = arith.constant 9.99999974E-6 : f32
    %501 = vector.broadcast %cst_270 : f32 to vector<34x1xf32>
    %502 = arith.addf %498, %501 : vector<34x1xf32>
    %503 = math.rsqrt %502 : vector<34x1xf32>
    %504 = vector.broadcast %503 : vector<34x1xf32> to vector<34x32xf32>
    %505 = arith.mulf %500, %504 : vector<34x32xf32>
    %506 = vector.broadcast %485 : vector<1x32xf32> to vector<34x32xf32>
    %507 = arith.mulf %505, %506 : vector<34x32xf32>
    %508 = vector.broadcast %487 : vector<1x32xf32> to vector<34x32xf32>
    %509 = arith.addf %507, %508 : vector<34x32xf32>
    %510 = arith.truncf %509 : vector<34x32xf32> to vector<34x32xbf16>
    %c1_271 = arith.constant 1 : index
    %c0_272 = arith.constant 0 : index
    %c0_273 = arith.constant 0 : index
    %511 = vector.load %arg9[%c1_271, %c0_272, %c0_273] : memref<2x32x64xbf16, #tpu.memory_space<vmem>>, vector<1x32x64xbf16>
    %512 = vector.shape_cast %511 : vector<1x32x64xbf16> to vector<32x64xbf16>
    %cst_274 = arith.constant dense<0.000000e+00> : vector<34x64xf32>
    %513 = tpu.matmul %510, %512, %cst_274 {dimension_numbers = #tpu.dot_dimension_numbers<[1], [0], [0], [1], [0, 0, 1, 1], [], []>} : vector<34x32xbf16>, vector<32x64xbf16>, vector<34x64xf32> -> vector<34x64xf32>
    %c1_275 = arith.constant 1 : index
    %c0_276 = arith.constant 0 : index
    %c0_277 = arith.constant 0 : index
    %514 = vector.load %arg10[%c1_275, %c0_276, %c0_277] : memref<2x1x64xf32, #tpu.memory_space<vmem>>, vector<1x1x64xf32>
    %515 = vector.shape_cast %514 : vector<1x1x64xf32> to vector<1x64xf32>
    %516 = vector.broadcast %515 : vector<1x64xf32> to vector<34x64xf32>
    %517 = arith.addf %513, %516 : vector<34x64xf32>
    %cst_278 = arith.constant 0.000000e+00 : f32
    %518 = vector.broadcast %cst_278 : f32 to vector<34x64xf32>
    %519 = arith.maximumf %517, %518 : vector<34x64xf32>
    %520 = arith.truncf %519 : vector<34x64xf32> to vector<34x64xbf16>
    %c1_279 = arith.constant 1 : index
    %c0_280 = arith.constant 0 : index
    %c0_281 = arith.constant 0 : index
    %521 = vector.load %arg11[%c1_279, %c0_280, %c0_281] : memref<2x64x32xbf16, #tpu.memory_space<vmem>>, vector<1x64x32xbf16>
    %522 = vector.shape_cast %521 : vector<1x64x32xbf16> to vector<64x32xbf16>
    %cst_282 = arith.constant dense<0.000000e+00> : vector<34x32xf32>
    %523 = tpu.matmul %520, %522, %cst_282 {dimension_numbers = #tpu.dot_dimension_numbers<[1], [0], [0], [1], [0, 0, 1, 1], [], []>} : vector<34x64xbf16>, vector<64x32xbf16>, vector<34x32xf32> -> vector<34x32xf32>
    %c1_283 = arith.constant 1 : index
    %c0_284 = arith.constant 0 : index
    %c0_285 = arith.constant 0 : index
    %524 = vector.load %arg12[%c1_283, %c0_284, %c0_285] : memref<2x1x32xf32, #tpu.memory_space<vmem>>, vector<1x1x32xf32>
    %525 = vector.shape_cast %524 : vector<1x1x32xf32> to vector<1x32xf32>
    %526 = vector.broadcast %525 : vector<1x32xf32> to vector<34x32xf32>
    %527 = arith.addf %523, %526 : vector<34x32xf32>
    %528 = arith.addf %509, %527 : vector<34x32xf32>
    %c1_286 = arith.constant 1 : index
    %c0_287 = arith.constant 0 : index
    %c0_288 = arith.constant 0 : index
    %529 = vector.load %arg13[%c1_286, %c0_287, %c0_288] : memref<2x1x32xf32, #tpu.memory_space<vmem>>, vector<1x1x32xf32>
    %530 = vector.shape_cast %529 : vector<1x1x32xf32> to vector<1x32xf32>
    %c1_289 = arith.constant 1 : index
    %c0_290 = arith.constant 0 : index
    %c0_291 = arith.constant 0 : index
    %531 = vector.load %arg14[%c1_289, %c0_290, %c0_291] : memref<2x1x32xf32, #tpu.memory_space<vmem>>, vector<1x1x32xf32>
    %532 = vector.shape_cast %531 : vector<1x1x32xf32> to vector<1x32xf32>
    %cst_292 = arith.constant dense<0.000000e+00> : vector<34xf32>
    %533 = vector.multi_reduction <add>, %528, %cst_292 [1] : vector<34x32xf32> to vector<34xf32>
    %534 = vector.shape_cast %533 : vector<34xf32> to vector<34x1xf32>
    %cst_293 = arith.constant 3.200000e+01 : f32
    %535 = vector.broadcast %cst_293 : f32 to vector<34x1xf32>
    %536 = arith.divf %534, %535 : vector<34x1xf32>
    %537 = vector.broadcast %536 : vector<34x1xf32> to vector<34x32xf32>
    %538 = arith.subf %528, %537 : vector<34x32xf32>
    %539 = arith.mulf %538, %538 : vector<34x32xf32>
    %cst_294 = arith.constant dense<0.000000e+00> : vector<34xf32>
    %540 = vector.multi_reduction <add>, %539, %cst_294 [1] : vector<34x32xf32> to vector<34xf32>
    %541 = vector.shape_cast %540 : vector<34xf32> to vector<34x1xf32>
    %cst_295 = arith.constant 3.200000e+01 : f32
    %542 = vector.broadcast %cst_295 : f32 to vector<34x1xf32>
    %543 = arith.divf %541, %542 : vector<34x1xf32>
    %544 = vector.broadcast %536 : vector<34x1xf32> to vector<34x32xf32>
    %545 = arith.subf %528, %544 : vector<34x32xf32>
    %cst_296 = arith.constant 9.99999974E-6 : f32
    %546 = vector.broadcast %cst_296 : f32 to vector<34x1xf32>
    %547 = arith.addf %543, %546 : vector<34x1xf32>
    %548 = math.rsqrt %547 : vector<34x1xf32>
    %549 = vector.broadcast %548 : vector<34x1xf32> to vector<34x32xf32>
    %550 = arith.mulf %545, %549 : vector<34x32xf32>
    %551 = vector.broadcast %530 : vector<1x32xf32> to vector<34x32xf32>
    %552 = arith.mulf %550, %551 : vector<34x32xf32>
    %553 = vector.broadcast %532 : vector<1x32xf32> to vector<34x32xf32>
    %554 = arith.addf %552, %553 : vector<34x32xf32>
    %555 = arith.truncf %554 : vector<34x32xf32> to vector<34x32xbf16>
    %c0_297 = arith.constant 0 : index
    %c0_298 = arith.constant 0 : index
    %556 = vector.load %arg15[%c0_297, %c0_298] : memref<32x128xbf16, #tpu.memory_space<vmem>>, vector<32x128xbf16>
    %cst_299 = arith.constant dense<0.000000e+00> : vector<34x128xf32>
    %557 = tpu.matmul %555, %556, %cst_299 {dimension_numbers = #tpu.dot_dimension_numbers<[1], [0], [0], [1], [0, 0, 1, 1], [], []>} : vector<34x32xbf16>, vector<32x128xbf16>, vector<34x128xf32> -> vector<34x128xf32>
    %c0_300 = arith.constant 0 : index
    %c0_301 = arith.constant 0 : index
    %558 = vector.load %arg16[%c0_300, %c0_301] : memref<1x128xf32, #tpu.memory_space<vmem>>, vector<1x128xf32>
    %559 = vector.broadcast %558 : vector<1x128xf32> to vector<34x128xf32>
    %560 = arith.addf %557, %559 : vector<34x128xf32>
    %561 = arith.negf %560 : vector<34x128xf32>
    %562 = math.exp %561 : vector<34x128xf32>
    %cst_302 = arith.constant 1.000000e+00 : f32
    %563 = vector.broadcast %cst_302 : f32 to vector<34x128xf32>
    %564 = arith.addf %563, %562 : vector<34x128xf32>
    %565 = arith.divf %563, %564 : vector<34x128xf32>
    %c0_303 = arith.constant 0 : index
    %c0_304 = arith.constant 0 : index
    %566 = vector.load %arg17[%c0_303, %c0_304] : memref<34x128xf32, #tpu.memory_space<vmem>>, vector<34x128xf32>
    tpu.vector_store %arg17[%c0_303, %c0_304], %565 {strides = array<i32>} : memref<34x128xf32, #tpu.memory_space<vmem>>, vector<34x128xf32>,
    return
  }
  func.func @transform_0(%arg0: i32, %arg1: memref<32xi32, #tpu.memory_space<smem>>) -> (i32, i32, i32) {
    %c0_i32 = arith.constant 0 : i32
    %c0_i32_0 = arith.constant 0 : i32
    %c0_i32_1 = arith.constant 0 : i32
    %c0_i32_2 = arith.constant 0 : i32
    return %c0_i32, %c0_i32_0, %c0_i32_1 : i32, i32, i32
  }
  func.func @transform_1(%arg0: i32, %arg1: memref<32xi32, #tpu.memory_space<smem>>) -> (i32, i32) {
    %c0_i32 = arith.constant 0 : i32
    %c0_i32_0 = arith.constant 0 : i32
    %c0_i32_1 = arith.constant 0 : i32
    return %c0_i32, %c0_i32_0 : i32, i32
  }
  func.func @transform_2(%arg0: i32, %arg1: memref<32xi32, #tpu.memory_space<smem>>) -> (i32, i32, i32) {
    %c0_i32 = arith.constant 0 : i32
    %c0_i32_0 = arith.constant 0 : i32
    %c0_i32_1 = arith.constant 0 : i32
    %c0_i32_2 = arith.constant 0 : i32
    return %c0_i32, %c0_i32_0, %c0_i32_1 : i32, i32, i32
  }
  func.func @transform_3(%arg0: i32, %arg1: memref<32xi32, #tpu.memory_space<smem>>) -> (i32, i32, i32) {
    %c0_i32 = arith.constant 0 : i32
    %c0_i32_0 = arith.constant 0 : i32
    %c0_i32_1 = arith.constant 0 : i32
    %c0_i32_2 = arith.constant 0 : i32
    return %c0_i32, %c0_i32_0, %c0_i32_1 : i32, i32, i32
  }
  func.func @transform_4(%arg0: i32, %arg1: memref<32xi32, #tpu.memory_space<smem>>) -> (i32, i32, i32) {
    %c0_i32 = arith.constant 0 : i32
    %c0_i32_0 = arith.constant 0 : i32
    %c0_i32_1 = arith.constant 0 : i32
    %c0_i32_2 = arith.constant 0 : i32
    return %c0_i32, %c0_i32_0, %c0_i32_1 : i32, i32, i32
  }
  func.func @transform_5(%arg0: i32, %arg1: memref<32xi32, #tpu.memory_space<smem>>) -> (i32, i32, i32) {
    %c0_i32 = arith.constant 0 : i32
    %c0_i32_0 = arith.constant 0 : i32
    %c0_i32_1 = arith.constant 0 : i32
    %c0_i32_2 = arith.constant 0 : i32
    return %c0_i32, %c0_i32_0, %c0_i32_1 : i32, i32, i32
  }
  func.func @transform_6(%arg0: i32, %arg1: memref<32xi32, #tpu.memory_space<smem>>) -> (i32, i32, i32) {
    %c0_i32 = arith.constant 0 : i32
    %c0_i32_0 = arith.constant 0 : i32
    %c0_i32_1 = arith.constant 0 : i32
    %c0_i32_2 = arith.constant 0 : i32
    return %c0_i32, %c0_i32_0, %c0_i32_1 : i32, i32, i32
  }
  func.func @transform_7(%arg0: i32, %arg1: memref<32xi32, #tpu.memory_space<smem>>) -> (i32, i32, i32) {
    %c0_i32 = arith.constant 0 : i32
    %c0_i32_0 = arith.constant 0 : i32
    %c0_i32_1 = arith.constant 0 : i32
    %c0_i32_2 = arith.constant 0 : i32
    return %c0_i32, %c0_i32_0, %c0_i32_1 : i32, i32, i32
  }
  func.func @transform_8(%arg0: i32, %arg1: memref<32xi32, #tpu.memory_space<smem>>) -> (i32, i32, i32) {
    %c0_i32 = arith.constant 0 : i32
    %c0_i32_0 = arith.constant 0 : i32
    %c0_i32_1 = arith.constant 0 : i32
    %c0_i32_2 = arith.constant 0 : i32
    return %c0_i32, %c0_i32_0, %c0_i32_1 : i32, i32, i32
  }
  func.func @transform_9(%arg0: i32, %arg1: memref<32xi32, #tpu.memory_space<smem>>) -> (i32, i32, i32) {
    %c0_i32 = arith.constant 0 : i32
    %c0_i32_0 = arith.constant 0 : i32
    %c0_i32_1 = arith.constant 0 : i32
    %c0_i32_2 = arith.constant 0 : i32
    return %c0_i32, %c0_i32_0, %c0_i32_1 : i32, i32, i32
  }
  func.func @transform_10(%arg0: i32, %arg1: memref<32xi32, #tpu.memory_space<smem>>) -> (i32, i32, i32) {
    %c0_i32 = arith.constant 0 : i32
    %c0_i32_0 = arith.constant 0 : i32
    %c0_i32_1 = arith.constant 0 : i32
    %c0_i32_2 = arith.constant 0 : i32
    return %c0_i32, %c0_i32_0, %c0_i32_1 : i32, i32, i32
  }
  func.func @transform_11(%arg0: i32, %arg1: memref<32xi32, #tpu.memory_space<smem>>) -> (i32, i32, i32) {
    %c0_i32 = arith.constant 0 : i32
    %c0_i32_0 = arith.constant 0 : i32
    %c0_i32_1 = arith.constant 0 : i32
    %c0_i32_2 = arith.constant 0 : i32
    return %c0_i32, %c0_i32_0, %c0_i32_1 : i32, i32, i32
  }
  func.func @transform_12(%arg0: i32, %arg1: memref<32xi32, #tpu.memory_space<smem>>) -> (i32, i32, i32) {
    %c0_i32 = arith.constant 0 : i32
    %c0_i32_0 = arith.constant 0 : i32
    %c0_i32_1 = arith.constant 0 : i32
    %c0_i32_2 = arith.constant 0 : i32
    return %c0_i32, %c0_i32_0, %c0_i32_1 : i32, i32, i32
  }
  func.func @transform_13(%arg0: i32, %arg1: memref<32xi32, #tpu.memory_space<smem>>) -> (i32, i32) {
    %c0_i32 = arith.constant 0 : i32
    %c0_i32_0 = arith.constant 0 : i32
    %c0_i32_1 = arith.constant 0 : i32
    return %c0_i32, %c0_i32_0 : i32, i32
  }
  func.func @transform_14(%arg0: i32, %arg1: memref<32xi32, #tpu.memory_space<smem>>) -> (i32, i32) {
    %c0_i32 = arith.constant 0 : i32
    %c0_i32_0 = arith.constant 0 : i32
    %c0_i32_1 = arith.constant 0 : i32
    return %c0_i32, %c0_i32_0 : i32, i32
  }
  func.func @transform_15(%arg0: i32, %arg1: memref<32xi32, #tpu.memory_space<smem>>) -> (i32, i32) {
    %c0_i32 = arith.constant 0 : i32
    %c0_i32_0 = arith.constant 0 : i32
    %c0_i32_1 = arith.constant 0 : i32
    return %c0_i32, %c0_i32_0 : i32, i32
  }
}

</mosaic_0001>

<bundles_post_ra>
// kernel: classifier_forward.1
= control target key start
LH: loop header
LB: loop body
LE: loop exit
PB: predicated region body
PF: predicated region fallthrough
CT: control target
= control target key end

     0   :  { %s5788_s0 = inlined_call_operand.vmem [shape: s32[32], index: 0, kind: input, shape index: {}]   ;;  %s5789_s1 = inlined_call_operand.vmem [shape: f32[160,1,32], index: 1, kind: input, shape index: {}]   ;;  %s5790_s2 = inlined_call_operand.vmem [shape: f32[1,32], index: 2, kind: input, shape index: {}]   ;;  %s5791_s3 = inlined_call_operand.vmem [shape: bf16[2,32,128], index: 3, kind: input, shape index: {}]   ;;  %s5792_s4 = inlined_call_operand.vmem [shape: bf16[2,32,128], index: 4, kind: input, shape index: {}]   ;;  %s5793_s5 = inlined_call_operand.vmem [shape: f32[2,1,32], index: 5, kind: input, shape index: {}]   ;;  %s5794_s6 = inlined_call_operand.vmem [shape: f32[2,1,32], index: 6, kind: input, shape index: {}]   ;;  %s5795_s7 = inlined_call_operand.vmem [shape: f32[2,1,32], index: 7, kind: input, shape index: {}]   ;;  %s5796_s8 = inlined_call_operand.vmem [shape: bf16[2,32,64], index: 8, kind: input, shape index: {}]   ;;  %s5797_s9 = inlined_call_operand.vmem [shape: f32[2,1,64], index: 9, kind: input, shape index: {}]   ;;  %s5798_s10 = inlined_call_operand.vmem [shape: bf16[2,64,32], index: 10, kind: input, shape index: {}]   ;;  %s5799_s11 = inlined_call_operand.vmem [shape: f32[2,1,32], index: 11, kind: input, shape index: {}]   ;;  %s5800_s12 = inlined_call_operand.vmem [shape: f32[2,1,32], index: 12, kind: input, shape index: {}]   ;;  %s5801_s13 = inlined_call_operand.vmem [shape: f32[2,1,32], index: 13, kind: input, shape index: {}]   ;;  %s5802_s14 = inlined_call_operand.vmem [shape: bf16[32,128], index: 14, kind: input, shape index: {}]   ;;  %s5803_s15 = inlined_call_operand.vmem [shape: f32[1,128], index: 15, kind: input, shape index: {}]   ;;  %s5804_s16 = inlined_call_operand.vmem [shape: f32[34,128], index: 16, kind: output, shape index: {}]  }
   0x1   :  { %5812 = sst [smem:[#allocation6_spill]] %s5788_s0 }
   0x2   :  { %5813 = sst [smem:[#allocation7_spill]] %s5791_s3  ;;  %s5820_s23 = sld [smem:[#allocation6_spill]] }
   0x3   :  { %5814 = sst [smem:[#allocation8_spill]] %s5797_s9 }
   0x4   :  { %5815 = sst [smem:[#allocation9_spill]] %s5800_s12 }
   0x5   :  { %5816 = sst [smem:[#allocation10_spill]] %s5801_s13 }
   0x6   :  { %5817 = sst [smem:[#allocation11_spill]] %s5802_s14 }
   0x7   :  { %5818 = sst [smem:[#allocation12_spill]] %s5803_s15 }
   0x8   :  { %5819 = sst [smem:[#allocation13_spill]] %s5804_s16  ;;  %s21_s9 = sshll.u32 %s5820_s23, 4  ;;  %s22_s9 = int_to_ptr.vmem [resolvable:$true] %s21_s9 }
   0x9   :  { %s4412_s24 = scalar_lea.vmem %s22_s9, 16  ;;  %p4417_p1 = scmp.lt.s32.totalorder %s22_s9, %s22_s9 }
   0xa   :  { %p4413_p0 = scmp.ne.s32.totalorder %s22_s9, %s4412_s24  ;;  %p4418_p2 = scmp.lt.s32.totalorder %s4412_s24, %s4412_s24 }
   0xc   :  { %p4419_p3 = por %p4418_p2, %p4417_p1 }
   0xe   :  { %p4420_p4 = pnand %p4419_p3, %p4413_p0 }
  0x10   :  { %4423 = shalt.err (!%p4420_p4)  }
  0x11   :  { %s4426_s25 = smov [#allocation4]  }
  0x12   :  { %24 = dma.vmem_to_smem %s22_s9, 16, %s4426_s25, [#allocation3] }
  0x13   :  { %4424 = dma.done.wait [#allocation3], 16 }
  0x14   :  { %4425 = vsyncadd [#allocation3], 4294967280 }
  0x15   :  { %26 = sfence }
  0x16   :  { %v4165_v0 = vld [vmem:[%s5791_s3] sm:$0xff]   ;;  %v4427_v1 = vmov 0.0   ;;  %v4166_v2 = vld [vmem:[%s5791_s3 + $0x8] sm:$0xff]   ;;  %vm4428_vm0 = vmmov 0   ;;  %vm59_vm1 = vcmask 253952   ;;  %s61_s0 = sld [smem:[#allocation4]] }
  0x17   :  { %3712 = vmatprep.subr.bf16.mxu0 %v4427_v1  ;;  %3728 = vmatprep.subr.bf16.mxu1 %v4427_v1  ;;  %v58_v3 = vld [vmem:[%s5790_s2] sm:$0x1]  ;;  %s3362_s17 = sld [smem:[#allocation4 + $0x1]]  ;;  %s3364_s18 = sld [smem:[#allocation4 + $0x2]]  ;;  %vm317_vm2 = vcmask 261120   ;;  %v4168_v49 = vld [vmem:[%s5792_s4 + $0x8] sm:$0xff]  }
  0x18   :  { %3713 = vmatpush3.bf16.msra.mxu0 %v4165_v0  ;;  %3716 = vmatprep.mubr.msk.bf16.mxu0 %vm4428_vm0, %v4427_v1  ;;  %60 = vst.msk [vmem:[#allocation2] sm:$0x1] %vm59_vm1, %v58_v3  ;;  %v140_v4 = vld [vmem:[%s5790_s2] sm:$0x1]  ;;  %s3366_s21 = sld [smem:[#allocation4 + $0x3]]  ;;  %s3368_s22 = sld [smem:[#allocation4 + $0x4]] }
  0x19   :  { %3714 = vmatprep.subr.bf16.mxu0 %v4427_v1  ;;  %3732 = vmatprep.mubr.msk.bf16.mxu1 %vm4428_vm0, %v4427_v1  ;;  %141 = vst.msk [vmem:[#allocation2 + $0x11] sm:$0x1] %vm59_vm1, %v140_v4  ;;  %s3370_s23 = sld [smem:[#allocation4 + $0x5]]  ;;  %s3372_s24 = sld [smem:[#allocation4 + $0x6]]  ;;  %v4167_v48 = vld [vmem:[%s5792_s4] sm:$0xff]   ;;  %vm758_vm3 = vcmask 1040384  }
  0x1a   :  { %s4542_s25 = sld [smem:[#allocation4 + $0x7]]  ;;  %s4544_s26 = sld [smem:[#allocation4 + $0x8]]  ;;  %3729 = vmatpush3.bf16.msra.mxu1 %v4167_v48  ;;  %vm536_vm5 = vcmask 277504  }
  0x1b   :  { %s4546_s27 = sld [smem:[#allocation4 + $0x9]]  ;;  %s4548_s28 = sld [smem:[#allocation4 + $0xa]]  ;;  %3730 = vmatprep.subr.bf16.mxu1 %v4427_v1 }
  0x1c   :  { %3715 = vmatpush3.bf16.msra.mxu0 %v4166_v2  ;;  %s62_s9 = scalar_lea.vmem %s5789_s1, %s61_s0  ;;  %s4554_s30 = sld [smem:[#allocation4 + $0xb]] }
  0x1d   :  { %3744 = vmatprep.subr.bf16.mxu0 %v4427_v1  ;;  %v63_v5 = vld [vmem:[%s62_s9] sm:$0x1]  ;;  %s3301_s16 = scalar_lea.vmem %s5789_s1, %s3362_s17  ;;  %s3303_s13 = scalar_lea.vmem %s5789_s1, %s3364_s18 }
  0x1e   :  { %64 = vst.msk [vmem:[#allocation2 + $0x1] sm:$0x1] %vm59_vm1, %v63_v5  ;;  %v3363_v6 = vld [vmem:[%s3301_s16 + $0xa] sm:$0x1]  ;;  %v3365_v7 = vld [vmem:[%s3303_s13 + $0x14] sm:$0x1]  ;;  %s3305_s0 = scalar_lea.vmem %s5789_s1, %s3366_s21  ;;  %s3307_s3 = scalar_lea.vmem %s5789_s1, %s3368_s22  ;;  %3731 = vmatpush3.bf16.msra.mxu1 %v4168_v49 }
  0x1f   :  { %69 = vst.msk [vmem:[#allocation2 + $0x2] sm:$0x1] %vm59_vm1, %v3363_v6  ;;  %74 = vst.msk [vmem:[#allocation2 + $0x3] sm:$0x1] %vm59_vm1, %v3365_v7  ;;  %v3367_v8 = vld [vmem:[%s3305_s0 + $0x1e] sm:$0x1]  ;;  %s3309_s13 = scalar_lea.vmem %s5789_s1, %s3370_s23  ;;  %s3311_s12 = scalar_lea.vmem %s5789_s1, %s3372_s24  ;;  %3762 = vmatprep.subr.bf16.mxu1 %v4427_v1 }
  0x20   :  { %v3369_v9 = vld [vmem:[%s3307_s3 + $0x28] sm:$0x1]  ;;  %79 = vst.msk [vmem:[#allocation2 + $0x4] sm:$0x1] %vm59_vm1, %v3367_v8  ;;  %v3371_v10 = vld [vmem:[%s3309_s13 + $0x32] sm:$0x1]  ;;  %s3313_s22 = scalar_lea.vmem %s5789_s1, %s4542_s25  ;;  %s3315_s20 = scalar_lea.vmem %s5789_s1, %s4544_s26 }
  0x21   :  { %84 = vst.msk [vmem:[#allocation2 + $0x5] sm:$0x1] %vm59_vm1, %v3369_v9  ;;  %v3373_v11 = vld [vmem:[%s3311_s12 + $0x3c] sm:$0x1]  ;;  %89 = vst.msk [vmem:[#allocation2 + $0x6] sm:$0x1] %vm59_vm1, %v3371_v10  ;;  %s3317_s2 = scalar_lea.vmem %s5789_s1, %s4546_s27  ;;  %s3319_s9 = scalar_lea.vmem %s5789_s1, %s4548_s28 }
  0x22   :  { %94 = vst.msk [vmem:[#allocation2 + $0x7] sm:$0x1] %vm59_vm1, %v3373_v11  ;;  %v3375_v12 = vld [vmem:[%s3313_s22 + $0x46] sm:$0x1]  ;;  %v3377_v13 = vld [vmem:[%s3315_s20 + $0x50] sm:$0x1]  ;;  %s3321_s14 = scalar_lea.vmem %s5789_s1, %s4554_s30 }
  0x23   :  { %99 = vst.msk [vmem:[#allocation2 + $0x8] sm:$0x1] %vm59_vm1, %v3375_v12  ;;  %104 = vst.msk [vmem:[#allocation2 + $0x9] sm:$0x1] %vm59_vm1, %v3377_v13  ;;  %v3379_v14 = vld [vmem:[%s3317_s2 + $0x5a] sm:$0x1] }
  0x24   :  { %v3381_v15 = vld [vmem:[%s3319_s9 + $0x64] sm:$0x1]  ;;  %s3384_s15 = sld [smem:[#allocation4 + $0xc]]  ;;  %109 = vst.msk [vmem:[#allocation2 + $0xa] sm:$0x1] %vm59_vm1, %v3379_v14  ;;  %s3386_s27 = sld [smem:[#allocation4 + $0xd]] }
  0x25   :  { %114 = vst.msk [vmem:[#allocation2 + $0xb] sm:$0x1] %vm59_vm1, %v3381_v15  ;;  %v3383_v16 = vld [vmem:[%s3321_s14 + $0x6e] sm:$0x1]  ;;  %s3388_s13 = sld [smem:[#allocation4 + $0xe]]  ;;  %s3390_s28 = sld [smem:[#allocation4 + $0xf]] }
  0x26   :  { %119 = vst.msk [vmem:[#allocation2 + $0xc] sm:$0x1] %vm59_vm1, %v3383_v16  ;;  %s3392_s16 = sld [smem:[#allocation4 + $0x10]]  ;;  %s3393_s17 = sld [smem:[#allocation4 + $0x11]] }
  0x27   :  { %s3395_s12 = sld [smem:[#allocation4 + $0x12]]  ;;  %s3397_s18 = sld [smem:[#allocation4 + $0x13]] }
  0x28   :  { %s3399_s21 = sld [smem:[#allocation4 + $0x14]]  ;;  %s4606_s22 = sld [smem:[#allocation4 + $0x15]] }
  0x29   :  { %s4608_s3 = sld [smem:[#allocation4 + $0x16]]  ;;  %s4613_s23 = sld [smem:[#allocation4 + $0x17]]  ;;  %v221_v26 = vld [vmem:[#allocation2] sm:$0xff] }
  0x2a   :  { %s3323_s20 = scalar_lea.vmem %s5789_s1, %s3384_s15  ;;  %s3325_s0 = scalar_lea.vmem %s5789_s1, %s3386_s27 }
  0x2b   :  { %v3385_v17 = vld [vmem:[%s3323_s20 + $0x78] sm:$0x1]  ;;  %s3327_s25 = scalar_lea.vmem %s5789_s1, %s3388_s13  ;;  %v3387_v18 = vld [vmem:[%s3325_s0 + $0x82] sm:$0x1]  ;;  %s3329_s30 = scalar_lea.vmem %s5789_s1, %s3390_s28 }
  0x2c   :  { %124 = vst.msk [vmem:[#allocation2 + $0xd] sm:$0x1] %vm59_vm1, %v3385_v17  ;;  %v3389_v19 = vld [vmem:[%s3327_s25 + $0x8c] sm:$0x1]  ;;  %s143_s20 = scalar_lea.vmem %s5789_s1, %s3392_s16  ;;  %129 = vst.msk [vmem:[#allocation2 + $0xe] sm:$0x1] %vm59_vm1, %v3387_v18  ;;  %s3332_s24 = scalar_lea.vmem %s5789_s1, %s3393_s17 }
  0x2d   :  { %134 = vst.msk [vmem:[#allocation2 + $0xf] sm:$0x1] %vm59_vm1, %v3389_v19  ;;  %v3391_v20 = vld [vmem:[%s3329_s30 + $0x96] sm:$0x1]  ;;  %v144_v21 = vld [vmem:[%s143_s20] sm:$0x1]  ;;  %s3334_s28 = scalar_lea.vmem %s5789_s1, %s3395_s12  ;;  %s3336_s9 = scalar_lea.vmem %s5789_s1, %s3397_s18 }
  0x2e   :  { %139 = vst.msk [vmem:[#allocation2 + $0x10] sm:$0x1] %vm59_vm1, %v3391_v20  ;;  %145 = vst.msk [vmem:[#allocation2 + $0x12] sm:$0x1] %vm59_vm1, %v144_v21  ;;  %v3394_v22 = vld [vmem:[%s3332_s24 + $0xa] sm:$0x1]  ;;  %s3338_s14 = scalar_lea.vmem %s5789_s1, %s3399_s21  ;;  %s3340_s30 = scalar_lea.vmem %s5789_s1, %s4606_s22 }
  0x2f   :  { %v3396_v23 = vld [vmem:[%s3334_s28 + $0x14] sm:$0x1]  ;;  %150 = vst.msk [vmem:[#allocation2 + $0x13] sm:$0x1] %vm59_vm1, %v3394_v22  ;;  %v3398_v24 = vld [vmem:[%s3336_s9 + $0x1e] sm:$0x1]  ;;  %s3342_s20 = scalar_lea.vmem %s5789_s1, %s4608_s3  ;;  %s3344_s27 = scalar_lea.vmem %s5789_s1, %s4613_s23 }
  0x30   :  { %155 = vst.msk [vmem:[#allocation2 + $0x14] sm:$0x1] %vm59_vm1, %v3396_v23  ;;  %v3400_v25 = vld [vmem:[%s3338_s14 + $0x28] sm:$0x1]  ;;  %160 = vst.msk [vmem:[#allocation2 + $0x15] sm:$0x1] %vm59_vm1, %v3398_v24 }
  0x31   :  { %165 = vst.msk [vmem:[#allocation2 + $0x16] sm:$0x1] %vm59_vm1, %v3400_v25  ;;  %v3402_v27 = vld [vmem:[%s3340_s30 + $0x32] sm:$0x1]  ;;  %v3404_v28 = vld [vmem:[%s3342_s20 + $0x3c] sm:$0x1] }
  0x32   :  { %s3407_s13 = sld [smem:[#allocation4 + $0x18]]  ;;  %170 = vst.msk [vmem:[#allocation2 + $0x17] sm:$0x1] %vm59_vm1, %v3402_v27  ;;  %175 = vst.msk [vmem:[#allocation2 + $0x18] sm:$0x1] %vm59_vm1, %v3404_v28  ;;  %s3409_s22 = sld [smem:[#allocation4 + $0x19]] }
  0x33   :  { %v3406_v29 = vld [vmem:[%s3344_s27 + $0x46] sm:$0x1]  ;;  %s3411_s24 = sld [smem:[#allocation4 + $0x1a]]  ;;  %s3413_s3 = sld [smem:[#allocation4 + $0x1b]] }
  0x34   :  { %180 = vst.msk [vmem:[#allocation2 + $0x19] sm:$0x1] %vm59_vm1, %v3406_v29  ;;  %s3415_s2 = sld [smem:[#allocation4 + $0x1c]]  ;;  %s3417_s0 = sld [smem:[#allocation4 + $0x1d]]  ;;  %v222_v30 = vld [vmem:[#allocation2 + $0x8] sm:$0xff] }
  0x35   :  { %s3419_s28 = sld [smem:[#allocation4 + $0x1e]]  ;;  %s4663_s16 = sld [smem:[#allocation4 + $0x1f]]  ;;  %v298_v31 = vpack.c.bf16 %v222_v30, %v221_v26 }
  0x36   :  { %s4429_s26 = smov 96   ;;  %s4432_s17 = smov 32  }
  0x37   :  { %3717 = vmatmul.mubr.msk.bf16.vlgmr.msra.gmra.mrb[0].mxu0 %vm317_vm2, %v298_v31  ;;  %v4676_v33 = vsel %vm317_vm2, %v298_v31, 0  ;;  %3733 = vmatmul.mubr.msk.bf16.vlgmr.msra.gmra.mrb[0].mxu1 %vm317_vm2, %v298_v31  ;;  %s5823_s29 = sld [smem:[#allocation9_spill]] }
  0x38   :  { %s3346_s9 = scalar_lea.vmem %s5789_s1, %s3407_s13  ;;  %s3348_s14 = scalar_lea.vmem %s5789_s1, %s3409_s22  ;;  %3720 = vmatprep.mubr.msk.bf16.mxu0 %vm4428_vm0, %v4427_v1  ;;  %3745 = vmatpush3.bf16.xpose.msra.mxu0 %v4676_v33 }
  0x39   :  { %v3408_v32 = vld [vmem:[%s3346_s9 + $0x50] sm:$0x1]  ;;  %s3350_s30 = scalar_lea.vmem %s5789_s1, %s3411_s24  ;;  %v3410_v34 = vld [vmem:[%s3348_s14 + $0x5a] sm:$0x1]  ;;  %s3352_s20 = scalar_lea.vmem %s5789_s1, %s3413_s3  ;;  %3746 = vmatprep.subr.bf16.mxu0 %v4427_v1  ;;  %3736 = vmatprep.mubr.msk.bf16.mxu1 %vm4428_vm0, %v4427_v1 }
  0x3a   :  { %185 = vst.msk [vmem:[#allocation2 + $0x1a] sm:$0x1] %vm59_vm1, %v3408_v32  ;;  %v3412_v35 = vld [vmem:[%s3350_s30 + $0x64] sm:$0x1]  ;;  %s3354_s27 = scalar_lea.vmem %s5789_s1, %s3415_s2  ;;  %190 = vst.msk [vmem:[#allocation2 + $0x1b] sm:$0x1] %vm59_vm1, %v3410_v34  ;;  %s3356_s24 = scalar_lea.vmem %s5789_s1, %s3417_s0  ;;  %3763 = vmatpush3.bf16.xpose.msra.mxu1 %v4676_v33  ;;  %v226_v34 = vlaneseq }
  0x3b   :  { %195 = vst.msk [vmem:[#allocation2 + $0x1c] sm:$0x1] %vm59_vm1, %v3412_v35  ;;  %v3414_v36 = vld [vmem:[%s3352_s20 + $0x6e] sm:$0x1]  ;;  %v3416_v37 = vld [vmem:[%s3354_s27 + $0x78] sm:$0x1]  ;;  %s3358_s3 = scalar_lea.vmem %s5789_s1, %s3419_s28  ;;  %s3360_s25 = scalar_lea.vmem %s5789_s1, %s4663_s16  ;;  %3764 = vmatprep.subr.bf16.mxu1 %v4427_v1 }
  0x3c   :  { %200 = vst.msk [vmem:[#allocation2 + $0x1d] sm:$0x1] %vm59_vm1, %v3414_v36  ;;  %205 = vst.msk [vmem:[#allocation2 + $0x1e] sm:$0x1] %vm59_vm1, %v3416_v37  ;;  %v3418_v38 = vld [vmem:[%s3356_s24 + $0x82] sm:$0x1] }
  0x3d   :  { %v3420_v39 = vld [vmem:[%s3358_s3 + $0x8c] sm:$0x1]  ;;  %210 = vst.msk [vmem:[#allocation2 + $0x1f] sm:$0x1] %vm59_vm1, %v3418_v38  ;;  %v3422_v40 = vld [vmem:[%s3360_s25 + $0x96] sm:$0x1] }
  0x3e   :  { %215 = vst.msk [vmem:[#allocation2 + $0x20] sm:$0x1] %vm59_vm1, %v3420_v39  ;;  %220 = vst.msk [vmem:[#allocation2 + $0x21] sm:$0x1] %vm59_vm1, %v3422_v40  ;;  %v223_v41 = vld [vmem:[#allocation2 + $0x10] sm:$0xff]  ;;  %v233_v35 = vand.u32 127, %v226_v34 }
  0x3f   :  { %v227_v36 = vshrl.u32 %v226_v34, 7  ;;  %s4431_s14 = smov 64   ;;  %s5821_s16 = sld [smem:[#allocation8_spill]] }
  0x40   :  { %vm255_vm4 = vcmp.lt.s32.totalorder %v233_v35, 17  ;;  %vm276_vm7 = vcmp.ge.s32.totalorder %v233_v35, 17  ;;  %vm282_vm10 = vcmp.lt.s32.totalorder %v233_v35, 34  ;;  %s5822_s20 = sld [smem:[#allocation7_spill]]  ;;  %s5824_s9 = sld [smem:[#allocation10_spill]] }
  0x41   :  { %v229_v38 = vadd.s32 16, %v227_v36  ;;  %vm286_vm14 = vmand %vm276_vm7, %vm282_vm10  ;;  %s5825_s24 = sld [smem:[#allocation11_spill]]  ;;  %s5827_s1 = sld [smem:[#allocation13_spill]] }
  0x43   :  { %vm263_vm6 = vcmp.ge.s32.totalorder %v229_v38, 17  ;;  %vm241_vm8 = vcmp.lt.s32.totalorder %v229_v38, 17 }
  0x44   :  { %v224_v42 = vld [vmem:[#allocation2 + $0x18] sm:$0xff]  ;;  %vm279_vm9 = vmand %vm263_vm6, %vm276_vm7  ;;  %vm549_vm6 = vcmask 271360  }
  0x45   :  { %v299_v43 = vpack.c.bf16 %v224_v42, %v223_v41  ;;  %v225_v45 = vld [vmem:[#allocation2 + $0x20] sm:$0x3]  ;;  %v4430_v42 = vmov -1e+30   ;;  %vm258_vm11 = vmand %vm241_vm8, %vm255_vm4  ;;  %vm1572_vm8 = vcmask 523264  }
  0x46   :  { %v300_v46 = vpack.c.bf16 %v225_v45, %v225_v45  ;;  %vm285_vm12 = vmand %vm279_vm9, %vm282_vm10 }
  0x47   :  { %3721 = vmatmul.mubr.msk.bf16.gmra.mrb[4].mxu0 %vm317_vm2, %v299_v43  ;;  %v4708_v44 = vsel %vm317_vm2, %v299_v43, 0  ;;  %3737 = vmatmul.mubr.msk.bf16.gmra.mrb[4].mxu1 %vm317_vm2, %v299_v43  ;;  %v4802_v43 = vsel %vm255_vm4, 0.0, %v4430_v42  ;;  %vm290_vm13 = vmor %vm258_vm11, %vm285_vm12 }
  0x48   :  { %3724 = vmatprep.mubr.msk.bf16.mxu0 %vm4428_vm0, %v4427_v1  ;;  %3747 = vmatpush3.bf16.xpose.msra.mxu0 %v4708_v44  ;;  %v4715_v47 = vsel %vm317_vm2, %v300_v46, 0 }
  0x49   :  { %3748 = vmatprep.subr.bf16.mxu0 %v4427_v1  ;;  %3740 = vmatprep.mubr.msk.bf16.mxu1 %vm4428_vm0, %v4427_v1 }
  0x4a   :  { %3765 = vmatpush3.bf16.xpose.msra.mxu1 %v4708_v44 }
  0x4b   :  { %3766 = vmatprep.subr.bf16.mxu1 %v4427_v1 }
  0x4f   :  { %3725 = vmatmul.mubr.msk.bf16.gmra.mrb[8].mxu0 %vm317_vm2, %v300_v46  ;;  %3741 = vmatmul.mubr.msk.bf16.gmra.mrb[8].mxu1 %vm317_vm2, %v300_v46 }
  0x50   :  { %3749 = vmatpush3.bf16.xpose.msra.mxu0 %v4715_v47  ;;  %3750 = vmatprep.mubr.msk.bf16.mxu0 %vm4428_vm0, %v4427_v1 }
  0x51   :  { %3780 = vmatprep.subr.bf16.mxu0 %v4427_v1  ;;  %3768 = vmatprep.mubr.msk.bf16.mxu1 %vm4428_vm0, %v4427_v1 }
  0x52   :  { %3767 = vmatpush3.bf16.xpose.msra.mxu1 %v4715_v47 }
  0x53   :  { %3798 = vmatprep.subr.bf16.mxu1 %v4427_v1 }
 0x10a   :  { %v361_v50 = vpop.f32.mrb[0].mxu0  ;;  %v433_v3 = vpop.f32.mrb[0].mxu1 }
 0x10b   :  { %v3718_v51 = vpop.f32.mrb[1].mxu0  ;;  %v3734_v4 = vpop.f32.mrb[1].mxu1 }
 0x10c   :  { %v364_v52 = vpop.f32.mrb[2].mxu0  ;;  %v436_v5 = vpop.f32.mrb[2].mxu1 }
 0x10d   :  { %v4745_v53 = vpack.c.bf16 %v364_v52, %v361_v50  ;;  %v3719_v54 = vpop.f32.mrb[3].mxu0  ;;  %v4772_v6 = vpack.c.bf16 %v436_v5, %v433_v3  ;;  %v3735_v7 = vpop.f32.mrb[3].mxu1  ;;  %v231_v52 = vadd.s32 32, %v227_v36 }
 0x10f   :  { %599 = vrot.lane.b32.xlu0 %v4745_v53, %s4429_s26  ;;  %3751 = vmatmul.mubr.msk.bf16.vlgmr.msra.gmra.mrb[12].mxu0 %vm317_vm2, %v4745_v53  ;;  %vm270_vm15 = vcmp.lt.s32.totalorder %v231_v52, 34 }
 0x110   :  { %3754 = vmatprep.mubr.msk.bf16.mxu0 %vm4428_vm0, %v4427_v1  ;;  %vm281_vm1 = vmand %vm270_vm15, %vm276_vm7  ;;  %vm1357_vm7 = vcmask 254976  }
 0x111   :  { %vm287_vm4 = vmand %vm281_vm1, %vm282_vm10 }
 0x11a   :  { %v369_v55 = vpop.f32.mrb[4].mxu0  ;;  %v441_v8 = vpop.f32.mrb[4].mxu1 }
 0x11b   :  { %v3722_v56 = vpop.f32.mrb[5].mxu0  ;;  %v3738_v9 = vpop.f32.mrb[5].mxu1 }
 0x11c   :  { %v372_v57 = vpop.f32.mrb[6].mxu0  ;;  %v444_v10 = vpop.f32.mrb[6].mxu1 }
 0x11d   :  { %v4753_v58 = vpack.c.bf16 %v372_v57, %v369_v55  ;;  %v3723_v59 = vpop.f32.mrb[7].mxu0  ;;  %v4776_v11 = vpack.c.bf16 %v444_v10, %v441_v8  ;;  %v3739_v12 = vpop.f32.mrb[7].mxu1  ;;  %v4823_v10 = vsel %vm287_vm4, 0.0, %v4430_v42 }
 0x11e   :  { %v4813_v59 = vsel %vm290_vm13, 0.0, %v4430_v42 }
 0x11f   :  { %601 = vrot.lane.b32.xlu0 %v4753_v58, %s4429_s26  ;;  %3755 = vmatmul.mubr.msk.bf16.gmra.mrb[16].mxu0 %vm317_vm2, %v4753_v58 }
 0x120   :  { %3758 = vmatprep.mubr.msk.bf16.mxu0 %vm4428_vm0, %v4427_v1 }
 0x122   :  { %v377_v60 = vpop.f32.mrb[8].mxu0  ;;  %v449_v14 = vpop.f32.mrb[8].mxu1 }
 0x123   :  { %v4761_v61 = vpack.c.bf16 %v377_v60, %v377_v60  ;;  %v3726_v62 = vpop.f32.mrb[9].mxu0  ;;  %v4783_v15 = vpack.c.bf16 %v449_v14, %v449_v14  ;;  %v3742_v16 = vpop.f32.mrb[9].mxu1 }
 0x124   :  { %v380_v63 = vpop.f32.mrb[10].mxu0  ;;  %v452_v17 = vpop.f32.mrb[10].mxu1 }
 0x125   :  { %v3727_v0 = vpop.f32.mrb[11].mxu0  ;;  %603 = vrot.lane.b32.xlu1 %v4761_v61, %s4429_s26  ;;  %v3743_v18 = vpop.f32.mrb[11].mxu1  ;;  %v828_v19 = vsel %vm758_vm3, %v4783_v15, 0 }
 0x126   :  { %v4816_v0 = vsel %vm286_vm14, 0.0, %v4430_v42 }
 0x127   :  { %3759 = vmatmul.mubr.msk.bf16.gmra.mrb[20].mxu0 %vm317_vm2, %v4761_v61 }
 0x128   :  { %3786 = vmatprep.mubr.msk.bf16.mxu0 %vm4428_vm0, %v4427_v1 }
 0x181   :  { %v600_v2 = vpop.permute.xlu0 %599 }
 0x182   :  { %3769 = vmatmul.mubr.msk.bf16.vlgmr.msra.gmra.mrb[12].mxu1 %vm317_vm2, %v600_v2 }
 0x183   :  { %3772 = vmatprep.mubr.msk.bf16.mxu1 %vm4428_vm0, %v4427_v1  ;;  %3799 = vmatpush3.bf16.msra.mxu1 %v4772_v6 }
 0x184   :  { %3800 = vmatprep.subr.bf16.mxu1 %v4427_v1 }
 0x187   :  { %3801 = vmatpush3.bf16.msra.mxu1 %v4776_v11 }
 0x188   :  { %3802 = vmatprep.subr.bf16.mxu1 %v4427_v1 }
 0x18b   :  { %3803 = vmatpush3.bf16.msra.mxu1 %v828_v19 }
 0x18c   :  { %3834 = vmatprep.subr.bf16.mxu1 %v4427_v1 }
 0x191   :  { %v602_v13 = vpop.permute.xlu0 %601 }
 0x192   :  { %3773 = vmatmul.mubr.msk.bf16.gmra.mrb[16].mxu1 %vm317_vm2, %v602_v13 }
 0x193   :  { %3776 = vmatprep.mubr.msk.bf16.mxu1 %vm4428_vm0, %v4427_v1 }
 0x197   :  { %v604_v20 = vpop.permute.xlu1 %603 }
 0x19a   :  { %3777 = vmatmul.mubr.msk.bf16.gmra.mrb[20].mxu1 %vm317_vm2, %v604_v20 }
 0x19b   :  { %3804 = vmatprep.mubr.msk.bf16.mxu1 %vm4428_vm0, %v4427_v1 }
 0x1e2   :  { %v4791_v21 = vpop.f32.mrb[12].mxu0 }
 0x1e3   :  { %v3752_v22 = vpop.f32.mrb[13].mxu0 }
 0x1e4   :  { %v4793_v23 = vpop.f32.mrb[14].mxu0 }
 0x1e5   :  { %v3753_v24 = vpop.f32.mrb[15].mxu0  ;;  %v527_v52 = vmul.f32 0.17677669, %v4793_v23 }
 0x1f2   :  { %v4795_v25 = vpop.f32.mrb[16].mxu0 }
 0x1f3   :  { %v3756_v26 = vpop.f32.mrb[17].mxu0 }
 0x1f4   :  { %v4797_v27 = vpop.f32.mrb[18].mxu0 }
 0x1f5   :  { %v3757_v28 = vpop.f32.mrb[19].mxu0 }
 0x1fa   :  { %v4799_v29 = vpop.f32.mrb[20].mxu0 }
 0x1fb   :  { %v3760_v30 = vpop.f32.mrb[21].mxu0 }
 0x1fc   :  { %v523_v31 = vpop.f32.mrb[22].mxu0 }
 0x1fd   :  { %v3761_v32 = vpop.f32.mrb[23].mxu0 }
 0x255   :  { %v648_v37 = vpop.f32.mrb[12].mxu1 }
 0x256   :  { %v670_v39 = vmul.f32 0.17677669, %v648_v37  ;;  %v3770_v40 = vpop.f32.mrb[13].mxu1 }
 0x257   :  { %v651_v41 = vpop.f32.mrb[14].mxu1 }
 0x258   :  { %v671_v45 = vmul.f32 0.17677669, %v651_v41  ;;  %v3771_v46 = vpop.f32.mrb[15].mxu1  ;;  %v675_v48 = vadd.f32 %v670_v39, %v4802_v43 }
 0x25a   :  { %v680_v49 = vsel %vm536_vm5, %v675_v48, -inf  ;;  %v676_v50 = vadd.f32 %v671_v45, %v4802_v43 }
 0x25b   :  { %681 = vmax.xlane.f32.xlu1 %v680_v49 }
 0x25c   :  { %v683_v51 = vsel %vm536_vm5, %v676_v50, -inf }
 0x25d   :  { %684 = vmax.xlane.f32.xlu0 %v683_v51  ;;  %v526_v51 = vmul.f32 0.17677669, %v4791_v21  ;;  %v530_v21 = vmul.f32 0.17677669, %v4799_v29 }
 0x265   :  { %v656_v54 = vpop.f32.mrb[16].mxu1 }
 0x266   :  { %v672_v55 = vmul.f32 0.17677669, %v656_v54  ;;  %v3774_v56 = vpop.f32.mrb[17].mxu1  ;;  %v529_v54 = vmul.f32 0.17677669, %v4797_v27 }
 0x267   :  { %v659_v57 = vpop.f32.mrb[18].mxu1  ;;  %v528_v56 = vmul.f32 0.17677669, %v4795_v25 }
 0x268   :  { %v673_v60 = vmul.f32 0.17677669, %v659_v57  ;;  %v3775_v62 = vpop.f32.mrb[19].mxu1  ;;  %v677_v63 = vadd.f32 %v672_v55, %v4813_v59  ;;  %v4858_v55 = vadd.f32 %v526_v51, %v4802_v43 }
 0x269   :  { %v4867_v62 = vadd.f32 %v529_v54, %v4816_v0  ;;  %v4875_v25 = vadd.f32 %v528_v56, %v4813_v59 }
 0x26a   :  { %v686_v2 = vsel %vm536_vm5, %v677_v63, -inf  ;;  %v678_v3 = vadd.f32 %v673_v60, %v4816_v0  ;;  %v537_v57 = vsel %vm536_vm5, %v4858_v55, -inf  ;;  %v4864_v60 = vadd.f32 %v527_v52, %v4802_v43 }
 0x26b   :  { %687 = vmax.xlane.f32.xlu0 %v686_v2  ;;  %v546_v27 = vsel %vm536_vm5, %v4867_v62, -inf  ;;  %v4880_v2 = vadd.f32 %v530_v21, %v4823_v10 }
 0x26c   :  { %v689_v4 = vsel %vm536_vm5, %v678_v3, -inf  ;;  %v540_v23 = vsel %vm536_vm5, %v4864_v60, -inf }
 0x26d   :  { %690 = vmax.xlane.f32.xlu1 %v689_v4  ;;  %v664_v5 = vpop.f32.mrb[20].mxu1  ;;  %v550_v29 = vsel %vm549_vm6, %v4880_v2, -inf }
 0x26e   :  { %v674_v7 = vmul.f32 0.17677669, %v664_v5  ;;  %v3778_v8 = vpop.f32.mrb[21].mxu1 }
 0x26f   :  { %v667_v9 = vpop.f32.mrb[22].mxu1 }
 0x270   :  { %v3779_v12 = vpop.f32.mrb[23].mxu1  ;;  %v679_v13 = vadd.f32 %v674_v7, %v4823_v10 }
 0x272   :  { %v692_v14 = vsel %vm549_vm6, %v679_v13, -inf }
 0x273   :  { %693 = vmax.xlane.f32.xlu0 %v692_v14 }
 0x27e   :  { %741 = vrot.lane.b32.xlu1 %v4772_v6, %s4429_s26 }
 0x2e8   :  { %v682_v16 = vpop.xlane.xlu1 %681 }
 0x2e9   :  { %v695_v17 = vsub.f32 %v675_v48, %v682_v16 }
 0x2ea   :  { %v685_v18 = vpop.xlane.xlu0 %684 }
 0x2eb   :  { %v700_v19 = vmul.f32 1.442695, %v695_v17  ;;  %v696_v20 = vsub.f32 %v676_v50, %v685_v18 }
 0x2ed   :  { %4187 = vpow2.f32 %v700_v19  ;;  %v702_v22 = vmul.f32 1.442695, %v696_v20 }
 0x2ef   :  { %4189 = vpow2.f32 %v702_v22 }
 0x2f7   :  { %v4829_v26 = vpop.eup %4187 }
 0x2f8   :  { %v688_v24 = vpop.xlane.xlu0 %687  ;;  %v710_v31 = vsel %vm536_vm5, %v4829_v26, 0.0 }
 0x2f9   :  { %v697_v28 = vsub.f32 %v677_v63, %v688_v24  ;;  %v4833_v32 = vpop.eup %4189  ;;  %711 = vadd.xlane.f32.xlu1 %v710_v31  ;;  %v543_v63 = vsel %vm536_vm5, %v4875_v25, -inf }
 0x2fa   :  { %v691_v30 = vpop.xlane.xlu1 %690  ;;  %v713_v36 = vsel %vm536_vm5, %v4833_v32, 0.0 }
 0x2fb   :  { %v704_v34 = vmul.f32 1.442695, %v697_v28  ;;  %v698_v35 = vsub.f32 %v678_v3, %v691_v30  ;;  %714 = vadd.xlane.f32.xlu0 %v713_v36 }
 0x2fd   :  { %4191 = vpow2.f32 %v704_v34  ;;  %v706_v37 = vmul.f32 1.442695, %v698_v35 }
 0x2fe   :  { %v742_v38 = vpop.permute.xlu1 %741 }
 0x2ff   :  { %4193 = vpow2.f32 %v706_v37  ;;  %3781 = vmatpush3.bf16.msra.mxu0 %v742_v38 }
 0x300   :  { %v694_v39 = vpop.xlane.xlu0 %693  ;;  %3782 = vmatprep.subr.bf16.mxu0 %v4427_v1 }
 0x301   :  { %v699_v40 = vsub.f32 %v679_v13, %v694_v39 }
 0x303   :  { %v708_v41 = vmul.f32 1.442695, %v699_v40 }
 0x305   :  { %4195 = vpow2.f32 %v708_v41 }
 0x307   :  { %v4192_v42 = vpop.eup %4191 }
 0x308   :  { %v716_v45 = vsel %vm536_vm5, %v4192_v42, 0.0 }
 0x309   :  { %v4194_v46 = vpop.eup %4193  ;;  %717 = vadd.xlane.f32.xlu1 %v716_v45 }
 0x30a   :  { %v719_v48 = vsel %vm536_vm5, %v4194_v46, 0.0 }
 0x30b   :  { %720 = vadd.xlane.f32.xlu0 %v719_v48 }
 0x30f   :  { %v4840_v49 = vpop.eup %4195 }
 0x310   :  { %v722_v50 = vsel %vm549_vm6, %v4840_v49, 0.0 }
 0x311   :  { %723 = vadd.xlane.f32.xlu0 %v722_v50 }
 0x31a   :  { %745 = vrot.lane.b32.xlu1 %v4783_v15, %s4429_s26 }
 0x31e   :  { %886 = vrot.lane.b32.xlu1 %v4745_v53, %s4431_s14 }
 0x322   :  { %888 = vrot.lane.b32.xlu1 %v4753_v58, %s4431_s14 }
 0x327   :  { %743 = vrot.lane.b32.xlu0 %v4776_v11, %s4429_s26 }
 0x32b   :  { %890 = vrot.lane.b32.xlu0 %v4761_v61, %s4431_s14 }
 0x346   :  { %538 = vmax.xlane.f32.xlu1 %v537_v57 }
 0x34a   :  { %541 = vmax.xlane.f32.xlu0 %v540_v23  ;;  %547 = vmax.xlane.f32.xlu1 %v546_v27 }
 0x34e   :  { %544 = vmax.xlane.f32.xlu0 %v543_v63 }
 0x352   :  { %551 = vmax.xlane.f32.xlu0 %v550_v29 }
 0x386   :  { %v712_v4 = vpop.xlane.xlu1 %711 }
 0x388   :  { %v715_v3 = vpop.xlane.xlu0 %714 }
 0x389   :  { %4197 = vrcp.f32 %v715_v3 }
 0x38a   :  { %4199 = vrcp.f32 %v712_v4 }
 0x393   :  { %v4198_v9 = vpop.eup %4197 }
 0x394   :  { %v4200_v13 = vpop.eup %4199  ;;  %v731_v16 = vmul.f32 %v4198_v9, %v4833_v32 }
 0x395   :  { %v730_v17 = vmul.f32 %v4200_v13, %v4829_v26 }
 0x396   :  { %v718_v7 = vpop.xlane.xlu1 %717 }
 0x397   :  { %v735_v19 = vpack.c.bf16 %v731_v16, %v730_v17 }
 0x398   :  { %v721_v5 = vpop.xlane.xlu0 %720 }
 0x399   :  { %4201 = vrcp.f32 %v721_v5 }
 0x39a   :  { %4203 = vrcp.f32 %v718_v7  ;;  %v746_v14 = vpop.permute.xlu1 %745 }
 0x39b   :  { %v760_v18 = vsel %vm758_vm3, %v746_v14, 0 }
 0x39e   :  { %v724_v8 = vpop.xlane.xlu0 %723  ;;  %v887_v34 = vpop.permute.xlu1 %886 }
 0x39f   :  { %4205 = vrcp.f32 %v724_v8 }
 0x3a2   :  { %v744_v12 = vpop.permute.xlu0 %743  ;;  %v889_v35 = vpop.permute.xlu1 %888 }
 0x3a3   :  { %3783 = vmatpush3.bf16.msra.mxu0 %v744_v12  ;;  %v4202_v20 = vpop.eup %4201 }
 0x3a4   :  { %3784 = vmatprep.subr.bf16.mxu0 %v4427_v1  ;;  %v4204_v22 = vpop.eup %4203  ;;  %v733_v24 = vmul.f32 %v4202_v20, %v4194_v46 }
 0x3a5   :  { %v732_v28 = vmul.f32 %v4204_v22, %v4192_v42 }
 0x3a6   :  { %v891_v36 = vpop.permute.xlu0 %890 }
 0x3a7   :  { %3785 = vmatpush3.bf16.msra.mxu0 %v760_v18  ;;  %v736_v30 = vpack.c.bf16 %v733_v24, %v732_v28 }
 0x3a8   :  { %3816 = vmatprep.subr.bf16.mxu0 %v4427_v1 }
 0x3a9   :  { %v4206_v26 = vpop.eup %4205 }
 0x3aa   :  { %3787 = vmatmul.mubr.msk.bf16.vlgmr.msra.gmra.mrb[24].mxu0 %vm536_vm5, %v735_v19  ;;  %v734_v31 = vmul.f32 %v4206_v26, %v4840_v49 }
 0x3ab   :  { %3790 = vmatprep.mubr.msk.bf16.mxu0 %vm4428_vm0, %v4427_v1 }
 0x3ac   :  { %v737_v32 = vpack.c.bf16 %v734_v31, %v734_v31 }
 0x3b0   :  { %3817 = vmatpush3.bf16.xpose.msra.mxu0 %v4676_v33 }
 0x3b1   :  { %3818 = vmatprep.subr.bf16.mxu0 %v4427_v1 }
 0x3b2   :  { %3791 = vmatmul.mubr.msk.bf16.gmra.mrb[28].mxu0 %vm536_vm5, %v736_v30 }
 0x3b3   :  { %3794 = vmatprep.mubr.msk.bf16.mxu0 %vm4428_vm0, %v4427_v1 }
 0x3b8   :  { %3819 = vmatpush3.bf16.xpose.msra.mxu0 %v4708_v44 }
 0x3b9   :  { %3820 = vmatprep.subr.bf16.mxu0 %v4427_v1 }
 0x3ba   :  { %3795 = vmatmul.mubr.msk.bf16.gmra.mrb[32].mxu0 %vm536_vm5, %v737_v32 }
 0x3bb   :  { %3822 = vmatprep.mubr.msk.bf16.mxu0 %vm4428_vm0, %v4427_v1 }
 0x3c0   :  { %3821 = vmatpush3.bf16.xpose.msra.mxu0 %v4715_v47 }
 0x3c1   :  { %3852 = vmatprep.subr.bf16.mxu0 %v4427_v1 }
 0x3c7   :  { %3823 = vmatmul.mubr.msk.bf16.vlgmr.msra.gmra.mrb[36].mxu0 %vm317_vm2, %v887_v34 }
 0x3c8   :  { %3826 = vmatprep.mubr.msk.bf16.mxu0 %vm4428_vm0, %v4427_v1  ;;  %3853 = vmatpush3.bf16.xpose.msra.mxu0 %v4676_v33 }
 0x3c9   :  { %3854 = vmatprep.subr.bf16.mxu0 %v4427_v1 }
 0x3cf   :  { %3827 = vmatmul.mubr.msk.bf16.gmra.mrb[40].mxu0 %vm317_vm2, %v889_v35 }
 0x3d0   :  { %3830 = vmatprep.mubr.msk.bf16.mxu0 %vm4428_vm0, %v4427_v1  ;;  %3855 = vmatpush3.bf16.xpose.msra.mxu0 %v4708_v44 }
 0x3d1   :  { %3856 = vmatprep.subr.bf16.mxu0 %v4427_v1 }
 0x3d3   :  { %v539_v52 = vpop.xlane.xlu1 %538 }
 0x3d4   :  { %v553_v23 = vsub.f32 %v4858_v55, %v539_v52 }
 0x3d6   :  { %v558_v5 = vmul.f32 1.442695, %v553_v23 }
 0x3d7   :  { %3831 = vmatmul.mubr.msk.bf16.gmra.mrb[44].mxu0 %vm317_vm2, %v891_v36  ;;  %v542_v54 = vpop.xlane.xlu0 %541  ;;  %v548_v57 = vpop.xlane.xlu1 %547 }
 0x3d8   :  { %3857 = vmatpush3.bf16.xpose.msra.mxu0 %v4715_v47  ;;  %3858 = vmatprep.mubr.msk.bf16.mxu0 %vm4428_vm0, %v4427_v1  ;;  %v554_v56 = vsub.f32 %v4864_v60, %v542_v54  ;;  %v556_v63 = vsub.f32 %v4867_v62, %v548_v57 }
 0x3d9   :  { %3888 = vmatprep.subr.bf16.mxu0 %v4427_v1 }
 0x3da   :  { %v560_v27 = vmul.f32 1.442695, %v554_v56  ;;  %v564_v60 = vmul.f32 1.442695, %v556_v63 }
 0x3db   :  { %v545_v21 = vpop.xlane.xlu0 %544 }
 0x3dc   :  { %v555_v7 = vsub.f32 %v4875_v25, %v545_v21  ;;  %4207 = vpow2.f32 %v560_v27 }
 0x3dd   :  { %4209 = vpow2.f32 %v558_v5 }
 0x3de   :  { %v562_v62 = vmul.f32 1.442695, %v555_v7  ;;  %4211 = vpow2.f32 %v564_v60 }
 0x3df   :  { %v552_v9 = vpop.xlane.xlu0 %551 }
 0x3e0   :  { %v557_v17 = vsub.f32 %v4880_v2, %v552_v9  ;;  %4213 = vpow2.f32 %v562_v62 }
 0x3e2   :  { %v566_v22 = vmul.f32 1.442695, %v557_v17 }
 0x3e4   :  { %4215 = vpow2.f32 %v566_v22 }
 0x3e6   :  { %v4942_v2 = vpop.eup %4207 }
 0x3e7   :  { %v4945_v35 = vpop.eup %4209 }
 0x47d   :  { %v4920_v37 = vpop.f32.mrb[24].mxu0 }
 0x47e   :  { %v3788_v38 = vpop.f32.mrb[25].mxu0 }
 0x47f   :  { %v4922_v39 = vpop.f32.mrb[26].mxu0 }
 0x480   :  { %v3789_v40 = vpop.f32.mrb[27].mxu0 }
 0x485   :  { %v4924_v41 = vpop.f32.mrb[28].mxu0 }
 0x486   :  { %v3792_v42 = vpop.f32.mrb[29].mxu0 }
 0x487   :  { %v4926_v45 = vpop.f32.mrb[30].mxu0  ;;  %v571_v42 = vsel %vm536_vm5, %v4942_v2, 0.0 }
 0x488   :  { %v3793_v46 = vpop.f32.mrb[31].mxu0 }
 0x489   :  { %v4949_v46 = vpop.eup %4211 }
 0x48a   :  { %v4953_v52 = vpop.eup %4213  ;;  %v577_v54 = vsel %vm536_vm5, %v4949_v46, 0.0 }
 0x48b   :  { %v574_v57 = vsel %vm536_vm5, %v4953_v52, 0.0  ;;  %v4960_v21 = vpop.eup %4215 }
 0x48c   :  { %v580_v27 = vsel %vm549_vm6, %v4960_v21, 0.0 }
 0x48d   :  { %v4928_v48 = vpop.f32.mrb[32].mxu0 }
 0x48e   :  { %v3796_v49 = vpop.f32.mrb[33].mxu0 }
 0x48f   :  { %v815_v50 = vpop.f32.mrb[34].mxu0 }
 0x490   :  { %v3797_v51 = vpop.f32.mrb[35].mxu0 }
 0x491   :  { %v568_v51 = vsel %vm536_vm5, %v4945_v35, 0.0 }
 0x49a   :  { %v935_v29 = vpop.f32.mrb[36].mxu0 }
 0x49b   :  { %v957_v3 = vmul.f32 0.17677669, %v935_v29  ;;  %v3824_v4 = vpop.f32.mrb[37].mxu0 }
 0x49c   :  { %v938_v8 = vpop.f32.mrb[38].mxu0 }
 0x49d   :  { %v958_v12 = vmul.f32 0.17677669, %v938_v8  ;;  %v3825_v13 = vpop.f32.mrb[39].mxu0  ;;  %v962_v14 = vadd.f32 %v957_v3, %v4802_v43 }
 0x49f   :  { %v967_v16 = vsel %vm536_vm5, %v962_v14, -inf  ;;  %v963_v55 = vadd.f32 %v958_v12, %v4802_v43 }
 0x4a0   :  { %968 = vmax.xlane.f32.xlu1 %v967_v16 }
 0x4a1   :  { %v970_v18 = vsel %vm536_vm5, %v963_v55, -inf }
 0x4a2   :  { %971 = vmax.xlane.f32.xlu0 %v970_v18  ;;  %v943_v25 = vpop.f32.mrb[40].mxu0 }
 0x4a3   :  { %v959_v19 = vmul.f32 0.17677669, %v943_v25  ;;  %v3828_v20 = vpop.f32.mrb[41].mxu0 }
 0x4a4   :  { %v946_v24 = vpop.f32.mrb[42].mxu0 }
 0x4a5   :  { %v960_v28 = vmul.f32 0.17677669, %v946_v24  ;;  %v3829_v30 = vpop.f32.mrb[43].mxu0  ;;  %v964_v26 = vadd.f32 %v959_v19, %v4813_v59 }
 0x4a7   :  { %v973_v31 = vsel %vm536_vm5, %v964_v26, -inf  ;;  %v965_v32 = vadd.f32 %v960_v28, %v4816_v0 }
 0x4a8   :  { %974 = vmax.xlane.f32.xlu1 %v973_v31 }
 0x4a9   :  { %v976_v34 = vsel %vm536_vm5, %v965_v32, -inf }
 0x4aa   :  { %977 = vmax.xlane.f32.xlu0 %v976_v34  ;;  %v951_v36 = vpop.f32.mrb[44].mxu0 }
 0x4ab   :  { %v961_v38 = vmul.f32 0.17677669, %v951_v36  ;;  %v3832_v40 = vpop.f32.mrb[45].mxu0 }
 0x4ac   :  { %572 = vadd.xlane.f32.xlu1 %v571_v42  ;;  %v954_v49 = vpop.f32.mrb[46].mxu0 }
 0x4ad   :  { %v3833_v50 = vpop.f32.mrb[47].mxu0  ;;  %v966_v56 = vadd.f32 %v961_v38, %v4823_v10 }
 0x4ae   :  { %569 = vadd.xlane.f32.xlu0 %v568_v51 }
 0x4af   :  { %v979_v23 = vsel %vm549_vm6, %v966_v56, -inf }
 0x4b0   :  { %578 = vadd.xlane.f32.xlu1 %v577_v54 }
 0x4b2   :  { %575 = vadd.xlane.f32.xlu0 %v574_v57 }
 0x4b4   :  { %980 = vmax.xlane.f32.xlu1 %v979_v23 }
 0x4b6   :  { %581 = vadd.xlane.f32.xlu0 %v580_v27 }
 0x4c5   :  { %1025 = vrot.lane.b32.xlu1 %v4772_v6, %s4431_s14 }
 0x52d   :  { %v969_v63 = vpop.xlane.xlu1 %968 }
 0x52e   :  { %v982_v29 = vsub.f32 %v962_v14, %v969_v63 }
 0x52f   :  { %v972_v3 = vpop.xlane.xlu0 %971 }
 0x530   :  { %v987_v4 = vmul.f32 1.442695, %v982_v29  ;;  %v983_v5 = vsub.f32 %v963_v55, %v972_v3 }
 0x532   :  { %4217 = vpow2.f32 %v987_v4  ;;  %v989_v7 = vmul.f32 1.442695, %v983_v5 }
 0x534   :  { %4219 = vpow2.f32 %v989_v7 }
 0x535   :  { %v975_v8 = vpop.xlane.xlu1 %974 }
 0x536   :  { %v984_v9 = vsub.f32 %v964_v26, %v975_v8 }
 0x537   :  { %v978_v12 = vpop.xlane.xlu0 %977 }
 0x538   :  { %v991_v13 = vmul.f32 1.442695, %v984_v9  ;;  %v985_v60 = vsub.f32 %v965_v32, %v978_v12 }
 0x539   :  { %v573_v16 = vpop.xlane.xlu1 %572 }
 0x53a   :  { %4221 = vpow2.f32 %v991_v13  ;;  %v993_v62 = vmul.f32 1.442695, %v985_v60 }
 0x53b   :  { %4223 = vrcp.f32 %v573_v16  ;;  %v570_v17 = vpop.xlane.xlu0 %569 }
 0x53c   :  { %v4967_v18 = vpop.eup %4217  ;;  %4225 = vpow2.f32 %v993_v62 }
 0x53d   :  { %4227 = vrcp.f32 %v570_v17  ;;  %v579_v14 = vpop.xlane.xlu1 %578  ;;  %v997_v55 = vsel %vm536_vm5, %v4967_v18, 0.0 }
 0x53e   :  { %v4971_v25 = vpop.eup %4219  ;;  %998 = vadd.xlane.f32.xlu1 %v997_v55 }
 0x53f   :  { %v576_v19 = vpop.xlane.xlu0 %575  ;;  %v1000_v20 = vsel %vm536_vm5, %v4971_v25, 0.0 }
 0x540   :  { %1001 = vadd.xlane.f32.xlu0 %v1000_v20  ;;  %4229 = vrcp.f32 %v576_v19 }
 0x541   :  { %v981_v22 = vpop.xlane.xlu1 %980  ;;  %4231 = vrcp.f32 %v579_v14 }
 0x542   :  { %v986_v24 = vsub.f32 %v966_v56, %v981_v22 }
 0x543   :  { %v582_v34 = vpop.xlane.xlu0 %581 }
 0x544   :  { %v4975_v28 = vpop.eup %4221  ;;  %v995_v30 = vmul.f32 1.442695, %v986_v24 }
 0x545   :  { %v4224_v26 = vpop.eup %4223  ;;  %v1003_v31 = vsel %vm536_vm5, %v4975_v28, 0.0  ;;  %v1026_v51 = vpop.permute.xlu1 %1025 }
 0x546   :  { %v4979_v32 = vpop.eup %4225  ;;  %4233 = vpow2.f32 %v995_v30  ;;  %1004 = vadd.xlane.f32.xlu1 %v1003_v31  ;;  %v589_v40 = vmul.f32 %v4224_v26, %v4942_v2 }
 0x547   :  { %v4228_v36 = vpop.eup %4227  ;;  %v1006_v38 = vsel %vm536_vm5, %v4979_v32, 0.0  ;;  %4235 = vrcp.f32 %v582_v34 }
 0x548   :  { %v588_v42 = vmul.f32 %v4228_v36, %v4945_v35  ;;  %1007 = vadd.xlane.f32.xlu0 %v1006_v38 }
 0x54a   :  { %v593_v49 = vpack.c.bf16 %v589_v40, %v588_v42  ;;  %v4230_v50 = vpop.eup %4229 }
 0x54b   :  { %v4232_v54 = vpop.eup %4231  ;;  %v590_v56 = vmul.f32 %v4230_v50, %v4953_v52 }
 0x54c   :  { %3805 = vmatmul.mubr.msk.bf16.vlgmr.msra.gmra.mrb[24].mxu1 %vm536_vm5, %v593_v49  ;;  %v591_v2 = vmul.f32 %v4232_v54, %v4949_v46 }
 0x54d   :  { %3835 = vmatpush3.bf16.msra.mxu1 %v1026_v51  ;;  %3808 = vmatprep.mubr.msk.bf16.mxu1 %vm4428_vm0, %v4427_v1 }
 0x54e   :  { %3836 = vmatprep.subr.bf16.mxu1 %v4427_v1  ;;  %v594_v23 = vpack.c.bf16 %v591_v2, %v590_v56 }
 0x550   :  { %v4234_v57 = vpop.eup %4233 }
 0x551   :  { %v1009_v35 = vsel %vm549_vm6, %v4234_v57, 0.0  ;;  %v4236_v27 = vpop.eup %4235 }
 0x552   :  { %1010 = vadd.xlane.f32.xlu0 %v1009_v35  ;;  %v592_v63 = vmul.f32 %v4236_v27, %v4960_v21 }
 0x554   :  { %3809 = vmatmul.mubr.msk.bf16.gmra.mrb[28].mxu1 %vm536_vm5, %v594_v23  ;;  %v595_v52 = vpack.c.bf16 %v592_v63, %v592_v63 }
 0x555   :  { %3812 = vmatprep.mubr.msk.bf16.mxu1 %vm4428_vm0, %v4427_v1 }
 0x557   :  { %1029 = vrot.lane.b32.xlu1 %v4783_v15, %s4431_s14 }
 0x55b   :  { %1106 = vrot.lane.b32.xlu1 %v4745_v53, %s4432_s17 }
 0x55c   :  { %3813 = vmatmul.mubr.msk.bf16.gmra.mrb[32].mxu1 %vm536_vm5, %v595_v52 }
 0x55d   :  { %3840 = vmatprep.mubr.msk.bf16.mxu1 %vm4428_vm0, %v4427_v1 }
 0x55f   :  { %1108 = vrot.lane.b32.xlu1 %v4753_v58, %s4432_s17 }
 0x568   :  { %1027 = vrot.lane.b32.xlu0 %v4776_v11, %s4431_s14 }
 0x56c   :  { %1110 = vrot.lane.b32.xlu0 %v4761_v61, %s4432_s17 }
 0x5cb   :  { %v999_v46 = vpop.xlane.xlu1 %998 }
 0x5cd   :  { %v1002_v29 = vpop.xlane.xlu0 %1001 }
 0x5ce   :  { %4237 = vrcp.f32 %v1002_v29 }
 0x5cf   :  { %4239 = vrcp.f32 %v999_v46 }
 0x5d3   :  { %v1005_v21 = vpop.xlane.xlu1 %1004 }
 0x5d5   :  { %v1008_v53 = vpop.xlane.xlu0 %1007 }
 0x5d6   :  { %4241 = vrcp.f32 %v1008_v53 }
 0x5d7   :  { %v1030_v3 = vpop.permute.xlu1 %1029  ;;  %4243 = vrcp.f32 %v1005_v21 }
 0x5d8   :  { %v4238_v5 = vpop.eup %4237  ;;  %v1043_v12 = vsel %vm758_vm3, %v1030_v3, 0 }
 0x5d9   :  { %v4240_v8 = vpop.eup %4239  ;;  %v1018_v61 = vmul.f32 %v4238_v5, %v4971_v25 }
 0x5da   :  { %v1017_v9 = vmul.f32 %v4240_v8, %v4967_v18 }
 0x5db   :  { %v1107_v4 = vpop.permute.xlu1 %1106 }
 0x5dc   :  { %3859 = vmatmul.mubr.msk.bf16.vlgmr.msra.gmra.mrb[48].mxu0 %vm317_vm2, %v1107_v4  ;;  %v1022_v13 = vpack.c.bf16 %v1018_v61, %v1017_v9 }
 0x5dd   :  { %3892 = vmatprep.mubr.msk.bf16.mxu0 %vm4428_vm0, %v4427_v1 }
 0x5df   :  { %v1011_v58 = vpop.xlane.xlu0 %1010 }
 0x5e0   :  { %4245 = vrcp.f32 %v1011_v58  ;;  %v4242_v60 = vpop.eup %4241 }
 0x5e1   :  { %v4244_v16 = vpop.eup %4243  ;;  %v1020_v62 = vmul.f32 %v4242_v60, %v4979_v32 }
 0x5e2   :  { %v1019_v17 = vmul.f32 %v4244_v16, %v4975_v28 }
 0x5e3   :  { %v1028_v7 = vpop.permute.xlu0 %1027 }
 0x5e4   :  { %3837 = vmatpush3.bf16.msra.mxu1 %v1028_v7  ;;  %v1023_v18 = vpack.c.bf16 %v1020_v62, %v1019_v17 }
 0x5e5   :  { %3838 = vmatprep.subr.bf16.mxu1 %v4427_v1 }
 0x5e7   :  { %v1111_v19 = vpop.permute.xlu0 %1110 }
 0x5e8   :  { %3839 = vmatpush3.bf16.msra.mxu1 %v1043_v12 }
 0x5e9   :  { %4152 = vmatprep.subr.bf16.mxu1 %v4427_v1 }
 0x5ea   :  { %v4246_v14 = vpop.eup %4245 }
 0x5eb   :  { %3841 = vmatmul.mubr.msk.bf16.vlgmr.msra.gmra.mrb[36].mxu1 %vm536_vm5, %v1022_v13  ;;  %v1021_v55 = vmul.f32 %v4246_v14, %v4234_v57 }
 0x5ec   :  { %3844 = vmatprep.mubr.msk.bf16.mxu1 %vm4428_vm0, %v4427_v1 }
 0x5ed   :  { %v1024_v25 = vpack.c.bf16 %v1021_v55, %v1021_v55 }
 0x5f1   :  { %4155 = vmatpush3.bf16.xpose.msra.mxu1 %v4676_v33  ;;  %v1109_v33 = vpop.permute.xlu1 %1108 }
 0x5f2   :  { %4153 = vmatprep.subr.bf16.mxu1 %v4427_v1 }
 0x5f3   :  { %3845 = vmatmul.mubr.msk.bf16.gmra.mrb[40].mxu1 %vm536_vm5, %v1023_v18 }
 0x5f4   :  { %3848 = vmatprep.mubr.msk.bf16.mxu1 %vm4428_vm0, %v4427_v1 }
 0x5f9   :  { %4156 = vmatpush3.bf16.xpose.msra.mxu1 %v4708_v44 }
 0x5fa   :  { %4154 = vmatprep.subr.bf16.mxu1 %v4427_v1 }
 0x5fb   :  { %3849 = vmatmul.mubr.msk.bf16.gmra.mrb[44].mxu1 %vm536_vm5, %v1024_v25 }
 0x5fc   :  { %3862 = vmatprep.mubr.msk.bf16.mxu1 %vm4428_vm0, %v4427_v1 }
 0x601   :  { %4157 = vmatpush3.bf16.xpose.msra.mxu1 %v4715_v47 }
 0x602   :  { %3870 = vmatprep.subr.bf16.mxu1 %v4427_v1 }
 0x608   :  { %3863 = vmatmul.mubr.msk.bf16.vlgmr.msra.gmra.mrb[48].mxu1 %vm317_vm2, %v1109_v33 }
 0x609   :  { %3866 = vmatprep.mubr.msk.bf16.mxu1 %vm4428_vm0, %v4427_v1 }
 0x610   :  { %3867 = vmatmul.mubr.msk.bf16.gmra.mrb[52].mxu1 %vm317_vm2, %v1111_v19 }
 0x611   :  { %3876 = vmatprep.mubr.msk.bf16.mxu1 %vm4428_vm0, %v4427_v1 }
 0x61f   :  { %v864_v44 = vpop.f32.mrb[24].mxu1 }
 0x620   :  { %v865_v20 = vadd.f32 %v864_v44, %v4920_v37  ;;  %v3806_v22 = vpop.f32.mrb[25].mxu1 }
 0x621   :  { %v867_v24 = vpop.f32.mrb[26].mxu1 }
 0x622   :  { %v868_v47 = vadd.f32 %v867_v24, %v4922_v39  ;;  %v3807_v28 = vpop.f32.mrb[27].mxu1 }
 0x627   :  { %v872_v30 = vpop.f32.mrb[28].mxu1 }
 0x628   :  { %v873_v26 = vadd.f32 %v872_v30, %v4924_v41  ;;  %v3810_v31 = vpop.f32.mrb[29].mxu1 }
 0x629   :  { %v875_v32 = vpop.f32.mrb[30].mxu1 }
 0x62a   :  { %v876_v34 = vadd.f32 %v875_v32, %v4926_v45  ;;  %v3811_v36 = vpop.f32.mrb[31].mxu1 }
 0x62f   :  { %v880_v38 = vpop.f32.mrb[32].mxu1 }
 0x630   :  { %v881_v40 = vadd.f32 %v880_v38, %v4928_v48  ;;  %v3814_v42 = vpop.f32.mrb[33].mxu1 }
 0x631   :  { %v883_v49 = vpop.f32.mrb[34].mxu1 }
 0x632   :  { %v3815_v50 = vpop.f32.mrb[35].mxu1 }
 0x6af   :  { %v1155_v37 = vpop.f32.mrb[48].mxu0 }
 0x6b0   :  { %v1177_v51 = vmul.f32 0.17677669, %v1155_v37  ;;  %v3860_v54 = vpop.f32.mrb[49].mxu0 }
 0x6b1   :  { %v1158_v56 = vpop.f32.mrb[50].mxu0 }
 0x6b2   :  { %v1178_v39 = vmul.f32 0.17677669, %v1158_v56  ;;  %v3861_v57 = vpop.f32.mrb[51].mxu0  ;;  %v1182_v2 = vadd.f32 %v1177_v51, %v4802_v43 }
 0x6b4   :  { %v1187_v41 = vsel %vm536_vm5, %v1182_v2, -inf  ;;  %v1183_v35 = vadd.f32 %v1178_v39, %v4802_v43 }
 0x6b5   :  { %1188 = vmax.xlane.f32.xlu1 %v1187_v41 }
 0x6b6   :  { %v1190_v45 = vsel %vm536_vm5, %v1183_v35, -inf }
 0x6b7   :  { %1191 = vmax.xlane.f32.xlu0 %v1190_v45 }
 0x6be   :  { %v1079_v48 = vpop.f32.mrb[36].mxu1 }
 0x6bf   :  { %v5049_v23 = vadd.f32 %v1079_v48, %v865_v20  ;;  %v3842_v27 = vpop.f32.mrb[37].mxu1 }
 0x6c0   :  { %v1082_v63 = vpop.f32.mrb[38].mxu1 }
 0x6c1   :  { %v5051_v52 = vadd.f32 %v1082_v63, %v868_v47  ;;  %v3843_v46 = vpop.f32.mrb[39].mxu1 }
 0x6c6   :  { %v1087_v21 = vpop.f32.mrb[40].mxu1 }
 0x6c7   :  { %v5053_v29 = vadd.f32 %v1087_v21, %v873_v26  ;;  %v3846_v3 = vpop.f32.mrb[41].mxu1 }
 0x6c8   :  { %v1090_v53 = vpop.f32.mrb[42].mxu1 }
 0x6c9   :  { %v5055_v4 = vadd.f32 %v1090_v53, %v876_v34  ;;  %v3847_v58 = vpop.f32.mrb[43].mxu1 }
 0x6ce   :  { %v1095_v5 = vpop.f32.mrb[44].mxu1 }
 0x6cf   :  { %v5057_v7 = vadd.f32 %v1095_v5, %v881_v40  ;;  %v3850_v8 = vpop.f32.mrb[45].mxu1 }
 0x6d0   :  { %v1098_v61 = vpop.f32.mrb[46].mxu1 }
 0x6d1   :  { %v3851_v9 = vpop.f32.mrb[47].mxu1 }
 0x6db   :  { %v1163_v12 = vpop.f32.mrb[48].mxu1 }
 0x6dc   :  { %v1179_v13 = vmul.f32 0.17677669, %v1163_v12  ;;  %v3864_v60 = vpop.f32.mrb[49].mxu1 }
 0x6dd   :  { %v1166_v16 = vpop.f32.mrb[50].mxu1 }
 0x6de   :  { %v1180_v62 = vmul.f32 0.17677669, %v1166_v16  ;;  %v3865_v17 = vpop.f32.mrb[51].mxu1  ;;  %v1184_v18 = vadd.f32 %v1179_v13, %v4813_v59 }
 0x6e0   :  { %v1193_v14 = vsel %vm536_vm5, %v1184_v18, -inf  ;;  %v1185_v55 = vadd.f32 %v1180_v62, %v4816_v0 }
 0x6e1   :  { %1194 = vmax.xlane.f32.xlu0 %v1193_v14 }
 0x6e2   :  { %v1196_v25 = vsel %vm536_vm5, %v1185_v55, -inf }
 0x6e3   :  { %v1171_v33 = vpop.f32.mrb[52].mxu1  ;;  %1197 = vmax.xlane.f32.xlu1 %v1196_v25 }
 0x6e4   :  { %v1181_v19 = vmul.f32 0.17677669, %v1171_v33  ;;  %v3868_v44 = vpop.f32.mrb[53].mxu1 }
 0x6e5   :  { %v1174_v20 = vpop.f32.mrb[54].mxu1 }
 0x6e6   :  { %v3869_v22 = vpop.f32.mrb[55].mxu1  ;;  %v1186_v24 = vadd.f32 %v1181_v19, %v4823_v10  ;;  %v3457_v19 = vld [vmem:[%s5793_s5] ss:$0 sm:$0xff] }
 0x6e8   :  { %v1199_v47 = vsel %vm549_vm6, %v1186_v24, -inf }
 0x6e9   :  { %1200 = vmax.xlane.f32.xlu0 %v1199_v47 }
 0x742   :  { %v1189_v28 = vpop.xlane.xlu1 %1188 }
 0x743   :  { %v1202_v30 = vsub.f32 %v1182_v2, %v1189_v28 }
 0x744   :  { %v1192_v26 = vpop.xlane.xlu0 %1191 }
 0x745   :  { %v1207_v31 = vmul.f32 1.442695, %v1202_v30  ;;  %v1203_v32 = vsub.f32 %v1183_v35, %v1192_v26  ;;  %v4407_v26 = vld [vmem:[#allocation2] sm:$0xff] }
 0x747   :  { %4247 = vpow2.f32 %v1207_v31  ;;  %v1209_v34 = vmul.f32 1.442695, %v1203_v32 }
 0x749   :  { %4249 = vpow2.f32 %v1209_v34  ;;  %v4408_v34 = vld [vmem:[#allocation2 + $0x8] sm:$0xff] }
 0x751   :  { %v4248_v36 = vpop.eup %4247 }
 0x752   :  { %v1217_v38 = vsel %vm536_vm5, %v4248_v36, 0.0 }
 0x753   :  { %v4250_v40 = vpop.eup %4249  ;;  %1218 = vadd.xlane.f32.xlu1 %v1217_v38 }
 0x754   :  { %v1220_v42 = vsel %vm536_vm5, %v4250_v40, 0.0 }
 0x755   :  { %1221 = vadd.xlane.f32.xlu0 %v1220_v42 }
 0x764   :  { %1245 = vrot.lane.b32.xlu1 %v4772_v6, %s4432_s17 }
 0x76e   :  { %v1195_v49 = vpop.xlane.xlu0 %1194 }
 0x76f   :  { %v1204_v51 = vsub.f32 %v1184_v18, %v1195_v49 }
 0x770   :  { %v1198_v50 = vpop.xlane.xlu1 %1197 }
 0x771   :  { %v1205_v37 = vsub.f32 %v1185_v55, %v1198_v50  ;;  %v1211_v56 = vmul.f32 1.442695, %v1204_v51 }
 0x773   :  { %v1213_v54 = vmul.f32 1.442695, %v1205_v37 }
 0x775   :  { %4251 = vpow2.f32 %v1213_v54  ;;  %v4409_v54 = vld [vmem:[#allocation2 + $0x10] sm:$0xff] }
 0x776   :  { %4253 = vpow2.f32 %v1211_v56  ;;  %v1201_v6 = vpop.xlane.xlu0 %1200 }
 0x777   :  { %v1206_v35 = vsub.f32 %v1186_v24, %v1201_v6 }
 0x779   :  { %v1215_v45 = vmul.f32 1.442695, %v1206_v35 }
 0x77b   :  { %4255 = vpow2.f32 %v1215_v45 }
 0x77f   :  { %v4252_v39 = vpop.eup %4251 }
 0x780   :  { %v1226_v57 = vsel %vm536_vm5, %v4252_v39, 0.0  ;;  %v4254_v2 = vpop.eup %4253 }
 0x781   :  { %1227 = vadd.xlane.f32.xlu0 %v1226_v57  ;;  %v1223_v41 = vsel %vm536_vm5, %v4254_v2, 0.0  ;;  %v4410_v57 = vld [vmem:[#allocation2 + $0x18] sm:$0xff] }
 0x785   :  { %v4256_v48 = vpop.eup %4255 }
 0x786   :  { %v1229_v27 = vsel %vm549_vm6, %v4256_v48, 0.0 }
 0x788   :  { %1224 = vadd.xlane.f32.xlu1 %v1223_v41 }
 0x797   :  { %1247 = vrot.lane.b32.xlu0 %v4776_v11, %s4432_s17 }
 0x799   :  { %1249 = vrot.lane.b32.xlu1 %v4783_v15, %s4432_s17 }
 0x7bd   :  { %1230 = vadd.xlane.f32.xlu1 %v1229_v27  ;;  %v4411_v27 = vld [vmem:[#allocation2 + $0x20] sm:$0x3] }
 0x7e0   :  { %v1219_v63 = vpop.xlane.xlu1 %1218 }
 0x7e2   :  { %v1222_v21 = vpop.xlane.xlu0 %1221 }
 0x7e3   :  { %4257 = vrcp.f32 %v1222_v21 }
 0x7e4   :  { %v1246_v46 = vpop.permute.xlu1 %1245  ;;  %4259 = vrcp.f32 %v1219_v63 }
 0x7e5   :  { %3871 = vmatpush3.bf16.msra.mxu1 %v1246_v46 }
 0x7e6   :  { %3872 = vmatprep.subr.bf16.mxu1 %v4427_v1 }
 0x7ed   :  { %v4258_v15 = vpop.eup %4257 }
 0x7ee   :  { %v4260_v58 = vpop.eup %4259  ;;  %v1238_v5 = vmul.f32 %v4258_v15, %v4250_v40 }
 0x7ef   :  { %v1237_v61 = vmul.f32 %v4260_v58, %v4248_v36 }
 0x7f1   :  { %v1242_v12 = vpack.c.bf16 %v1238_v5, %v1237_v61 }
 0x80e   :  { %v1228_v11 = vpop.xlane.xlu0 %1227 }
 0x80f   :  { %4261 = vrcp.f32 %v1228_v11 }
 0x812   :  { %v1248_v3 = vpop.permute.xlu0 %1247 }
 0x813   :  { %3873 = vmatpush3.bf16.msra.mxu1 %v1248_v3 }
 0x814   :  { %3874 = vmatprep.subr.bf16.mxu1 %v4427_v1 }
 0x815   :  { %v1225_v53 = vpop.xlane.xlu1 %1224 }
 0x816   :  { %4263 = vrcp.f32 %v1225_v53 }
 0x819   :  { %v1250_v8 = vpop.permute.xlu1 %1249  ;;  %v4262_v13 = vpop.eup %4261 }
 0x81a   :  { %v1263_v9 = vsel %vm758_vm3, %v1250_v8, 0  ;;  %v1240_v62 = vmul.f32 %v4262_v13, %v4252_v39 }
 0x81b   :  { %3875 = vmatpush3.bf16.msra.mxu1 %v1263_v9 }
 0x81c   :  { %3904 = vmatprep.subr.bf16.mxu1 %v4427_v1 }
 0x81e   :  { %3877 = vmatmul.mubr.msk.bf16.vlgmr.msra.gmra.mrb[56].mxu1 %vm536_vm5, %v1242_v12 }
 0x81f   :  { %3880 = vmatprep.mubr.msk.bf16.mxu1 %vm4428_vm0, %v4427_v1 }
 0x820   :  { %v4264_v60 = vpop.eup %4263 }
 0x821   :  { %v1239_v16 = vmul.f32 %v4264_v60, %v4254_v2 }
 0x823   :  { %v1243_v17 = vpack.c.bf16 %v1240_v62, %v1239_v16 }
 0x826   :  { %3881 = vmatmul.mubr.msk.bf16.gmra.mrb[60].mxu1 %vm536_vm5, %v1243_v17 }
 0x827   :  { %3884 = vmatprep.mubr.msk.bf16.mxu1 %vm4428_vm0, %v4427_v1 }
 0x84a   :  { %v1231_v18 = vpop.xlane.xlu1 %1230 }
 0x84b   :  { %4265 = vrcp.f32 %v1231_v18 }
 0x855   :  { %v4266_v14 = vpop.eup %4265 }
 0x856   :  { %v1241_v55 = vmul.f32 %v4266_v14, %v4256_v48 }
 0x858   :  { %v1244_v25 = vpack.c.bf16 %v1241_v55, %v1241_v55 }
 0x85a   :  { %3885 = vmatmul.mubr.msk.bf16.gmra.mrb[64].mxu1 %vm536_vm5, %v1244_v25  ;;  %v4169_v25 = vld [vmem:[%s5796_s8] sm:$0xff]  }
 0x85b   :  { %3912 = vmatprep.mubr.msk.bf16.mxu1 %vm4428_vm0, %v4427_v1  ;;  %3889 = vmatpush3.bf16.msra.mxu0 %v4169_v25 }
 0x85c   :  { %3890 = vmatprep.subr.bf16.mxu0 %v4427_v1 }
 0x8f1   :  { %v1299_v33 = vpop.f32.mrb[56].mxu1 }
 0x8f2   :  { %v1321_v44 = vadd.f32 %v1299_v33, %v5049_v23  ;;  %v3878_v20 = vpop.f32.mrb[57].mxu1  ;;  %v4170_v33 = vld [vmem:[%s5796_s8 + $0x8] sm:$0xff]  }
 0x8f3   :  { %v1302_v22 = vpop.f32.mrb[58].mxu1  ;;  %3891 = vmatpush3.bf16.msra.mxu0 %v4170_v33 }
 0x8f4   :  { %v1333_v24 = vadd.f32 %v3457_v19, %v1321_v44  ;;  %v1322_v47 = vadd.f32 %v1302_v22, %v5051_v52  ;;  %v3879_v28 = vpop.f32.mrb[59].mxu1  ;;  %3924 = vmatprep.subr.bf16.mxu0 %v4427_v1 }
 0x8f5   :  { %v4172_v28 = vld [vmem:[%s5798_s10 + $0x8] sm:$0xff]  }
 0x8f6   :  { %v1334_v30 = vadd.f32 %v3457_v19, %v1322_v47  ;;  %v1338_v31 = vadd.f32 %v4407_v26, %v1333_v24  ;;  %v4171_v47 = vld [vmem:[%s5798_s10] sm:$0xff]  }
 0x8f7   :  { %3905 = vmatpush3.bf16.msra.mxu1 %v4171_v47 }
 0x8f8   :  { %v1345_v32 = vsel %vm317_vm2, %v1338_v31, 0.0  ;;  %v1339_v36 = vadd.f32 %v4408_v34, %v1334_v30  ;;  %3906 = vmatprep.subr.bf16.mxu1 %v4427_v1 }
 0x8f9   :  { %1346 = vadd.xlane.f32.xlu0 %v1345_v32  ;;  %v1307_v38 = vpop.f32.mrb[60].mxu1 }
 0x8fa   :  { %v1323_v40 = vadd.f32 %v1307_v38, %v5053_v29  ;;  %v3882_v42 = vpop.f32.mrb[61].mxu1  ;;  %v1348_v52 = vsel %vm317_vm2, %v1339_v36, 0.0 }
 0x8fb   :  { %v1310_v49 = vpop.f32.mrb[62].mxu1  ;;  %3907 = vmatpush3.bf16.msra.mxu1 %v4172_v28 }
 0x8fc   :  { %v1335_v23 = vadd.f32 %v3457_v19, %v1323_v40  ;;  %v1324_v50 = vadd.f32 %v1310_v49, %v5055_v4  ;;  %v3883_v37 = vpop.f32.mrb[63].mxu1  ;;  %3908 = vmatprep.subr.bf16.mxu1 %v4427_v1 }
 0x8fd   :  { %1349 = vadd.xlane.f32.xlu0 %v1348_v52 }
 0x8fe   :  { %v1336_v51 = vadd.f32 %v3457_v19, %v1324_v50  ;;  %v1340_v56 = vadd.f32 %v4409_v54, %v1335_v23 }
 0x900   :  { %v1351_v39 = vsel %vm317_vm2, %v1340_v56, 0.0  ;;  %v1341_v2 = vadd.f32 %v4410_v57, %v1336_v51  ;;  %v3458_v51 = vld [vmem:[%s5794_s6] ss:$0 sm:$0xff] }
 0x901   :  { %1352 = vadd.xlane.f32.xlu1 %v1351_v39  ;;  %v3459_v57 = vld [vmem:[%s5795_s7] ss:$0 sm:$0xff] }
 0x902   :  { %v1354_v41 = vsel %vm317_vm2, %v1341_v2, 0.0 }
 0x903   :  { %1355 = vadd.xlane.f32.xlu0 %v1354_v41 }
 0x92d   :  { %v1315_v29 = vpop.f32.mrb[64].mxu1 }
 0x92e   :  { %v1325_v6 = vadd.f32 %v1315_v29, %v5057_v7  ;;  %v3886_v35 = vpop.f32.mrb[65].mxu1 }
 0x92f   :  { %v1318_v4 = vpop.f32.mrb[66].mxu1 }
 0x930   :  { %v1337_v45 = vadd.f32 %v3457_v19, %v1325_v6  ;;  %v3887_v48 = vpop.f32.mrb[67].mxu1 }
 0x932   :  { %v1342_v63 = vadd.f32 %v4411_v27, %v1337_v45 }
 0x934   :  { %v1358_v46 = vsel %vm1357_vm7, %v1342_v63, 0.0 }
 0x935   :  { %1359 = vadd.xlane.f32.xlu1 %v1358_v46 }
 0x986   :  { %v1347_v21 = vpop.xlane.xlu0 %1346 }
 0x987   :  { %v1362_v11 = vmul.f32 0.03125, %v1347_v21 }
 0x989   :  { %v1367_v3 = vsub.f32 %v1338_v31, %v1362_v11 }
 0x98a   :  { %v1350_v15 = vpop.xlane.xlu0 %1349 }
 0x98b   :  { %v1363_v53 = vmul.f32 0.03125, %v1350_v15  ;;  %v1372_v58 = vmul.f32 %v1367_v3, %v1367_v3 }
 0x98d   :  { %v1368_v5 = vsub.f32 %v1339_v36, %v1363_v53  ;;  %v1377_v8 = vsel %vm317_vm2, %v1372_v58, 0.0 }
 0x98e   :  { %v1353_v7 = vpop.xlane.xlu1 %1352  ;;  %1378 = vadd.xlane.f32.xlu0 %v1377_v8 }
 0x98f   :  { %v1364_v61 = vmul.f32 0.03125, %v1353_v7  ;;  %v1373_v9 = vmul.f32 %v1368_v5, %v1368_v5 }
 0x990   :  { %v1356_v12 = vpop.xlane.xlu0 %1355 }
 0x991   :  { %v1369_v13 = vsub.f32 %v1340_v56, %v1364_v61  ;;  %v1365_v60 = vmul.f32 0.03125, %v1356_v12  ;;  %v1380_v16 = vsel %vm317_vm2, %v1373_v9, 0.0  ;;  %v4173_v9 = vld [vmem:[%s5798_s10 + $0x10] sm:$0xff]   ;;  %v4174_v12 = vld [vmem:[%s5798_s10 + $0x18] sm:$0xff]  }
 0x992   :  { %1381 = vadd.xlane.f32.xlu1 %v1380_v16  ;;  %3909 = vmatpush3.bf16.msra.mxu1 %v4173_v9 }
 0x993   :  { %v1370_v62 = vsub.f32 %v1341_v2, %v1365_v60  ;;  %v1374_v17 = vmul.f32 %v1369_v13, %v1369_v13  ;;  %3910 = vmatprep.subr.bf16.mxu1 %v4427_v1 }
 0x995   :  { %v1383_v18 = vsel %vm317_vm2, %v1374_v17, 0.0  ;;  %v1375_v14 = vmul.f32 %v1370_v62, %v1370_v62 }
 0x996   :  { %1384 = vadd.xlane.f32.xlu0 %v1383_v18  ;;  %3911 = vmatpush3.bf16.msra.mxu1 %v4174_v12 }
 0x997   :  { %v1386_v55 = vsel %vm317_vm2, %v1375_v14, 0.0  ;;  %3940 = vmatprep.subr.bf16.mxu1 %v4427_v1 }
 0x998   :  { %1387 = vadd.xlane.f32.xlu1 %v1386_v55 }
 0x9c2   :  { %v1360_v19 = vpop.xlane.xlu1 %1359 }
 0x9c3   :  { %v1366_v44 = vmul.f32 0.03125, %v1360_v19 }
 0x9c5   :  { %v1371_v20 = vsub.f32 %v1342_v63, %v1366_v44 }
 0x9c7   :  { %v1376_v22 = vmul.f32 %v1371_v20, %v1371_v20 }
 0x9c9   :  { %v1389_v24 = vsel %vm1357_vm7, %v1376_v22, 0.0 }
 0x9ca   :  { %1390 = vadd.xlane.f32.xlu0 %v1389_v24 }
 0xa1b   :  { %v1379_v30 = vpop.xlane.xlu0 %1378 }
 0xa1c   :  { %v1392_v26 = vmul.f32 0.03125, %v1379_v30 }
 0xa1e   :  { %v1397_v31 = vadd.f32 1e-05, %v1392_v26 }
 0xa1f   :  { %v1382_v32 = vpop.xlane.xlu1 %1381 }
 0xa20   :  { %4267 = vrsqrt.f32 %v1397_v31  ;;  %v1393_v34 = vmul.f32 0.03125, %v1382_v32 }
 0xa22   :  { %v1398_v36 = vadd.f32 1e-05, %v1393_v34 }
 0xa23   :  { %v1385_v38 = vpop.xlane.xlu0 %1384 }
 0xa24   :  { %4269 = vrsqrt.f32 %v1398_v36  ;;  %v1394_v40 = vmul.f32 0.03125, %v1385_v38 }
 0xa25   :  { %v1388_v42 = vpop.xlane.xlu1 %1387 }
 0xa26   :  { %v1399_v49 = vadd.f32 1e-05, %v1394_v40  ;;  %v1395_v23 = vmul.f32 0.03125, %v1388_v42 }
 0xa28   :  { %4271 = vrsqrt.f32 %v1399_v49  ;;  %v1400_v50 = vadd.f32 1e-05, %v1395_v23  ;;  %v3466_v49 = vld [vmem:[%s5799_s11] ss:$0 sm:$0xff] }
 0xa2a   :  { %v4268_v37 = vpop.eup %4267  ;;  %4273 = vrsqrt.f32 %v1400_v50 }
 0xa2b   :  { %v1407_v52 = vmul.f32 %v4268_v37, %v1367_v3 }
 0xa2d   :  { %v1418_v56 = vmul.f32 %v3458_v51, %v1407_v52 }
 0xa2e   :  { %v4270_v54 = vpop.eup %4269 }
 0xa2f   :  { %v1408_v39 = vmul.f32 %v4270_v54, %v1368_v5  ;;  %v5129_v6 = vadd.f32 %v3459_v57, %v1418_v56 }
 0xa31   :  { %v1419_v2 = vmul.f32 %v3458_v51, %v1408_v39 }
 0xa32   :  { %v4272_v41 = vpop.eup %4271 }
 0xa33   :  { %v1409_v29 = vmul.f32 %v4272_v41, %v1369_v13  ;;  %v5131_v35 = vadd.f32 %v3459_v57, %v1419_v2  ;;  %v3460_v13 = vld [vmem:[%s5821_s16] ss:$0 sm:$0xff] }
 0xa34   :  { %v4274_v4 = vpop.eup %4273 }
 0xa35   :  { %v1410_v45 = vmul.f32 %v4274_v4, %v1370_v62  ;;  %v1434_v48 = vpack.c.bf16 %v5131_v35, %v5129_v6  ;;  %v1420_v27 = vmul.f32 %v3458_v51, %v1409_v29 }
 0xa37   :  { %3893 = vmatmul.mubr.msk.bf16.vlgmr.msra.gmra.mrb[52].mxu0 %vm317_vm2, %v1434_v48  ;;  %v1421_v63 = vmul.f32 %v3458_v51, %v1410_v45  ;;  %v5140_v21 = vadd.f32 %v3459_v57, %v1420_v27 }
 0xa38   :  { %3896 = vmatprep.mubr.msk.bf16.mxu0 %vm4428_vm0, %v4427_v1 }
 0xa39   :  { %v5138_v46 = vadd.f32 %v3459_v57, %v1421_v63 }
 0xa3b   :  { %v1435_v11 = vpack.c.bf16 %v5138_v46, %v5140_v21 }
 0xa3f   :  { %3897 = vmatmul.mubr.msk.bf16.gmra.mrb[56].mxu0 %vm317_vm2, %v1435_v11 }
 0xa40   :  { %3900 = vmatprep.mubr.msk.bf16.mxu0 %vm4428_vm0, %v4427_v1 }
 0xa57   :  { %v1391_v3 = vpop.xlane.xlu0 %1390 }
 0xa58   :  { %v1396_v15 = vmul.f32 0.03125, %v1391_v3 }
 0xa5a   :  { %v1401_v53 = vadd.f32 1e-05, %v1396_v15 }
 0xa5c   :  { %4275 = vrsqrt.f32 %v1401_v53 }
 0xa66   :  { %v4276_v58 = vpop.eup %4275 }
 0xa67   :  { %v1411_v5 = vmul.f32 %v4276_v58, %v1371_v20 }
 0xa69   :  { %v1422_v8 = vmul.f32 %v3458_v51, %v1411_v5 }
 0xa6b   :  { %v5147_v7 = vadd.f32 %v3459_v57, %v1422_v8 }
 0xa6d   :  { %v1436_v61 = vpack.c.bf16 %v5147_v7, %v5147_v7 }
 0xa6f   :  { %3901 = vmatmul.mubr.msk.bf16.gmra.mrb[60].mxu0 %vm317_vm2, %v1436_v61 }
 0xa70   :  { %3928 = vmatprep.mubr.msk.bf16.mxu0 %vm4428_vm0, %v4427_v1 }
 0xb0a   :  { %v1503_v60 = vpop.f32.mrb[52].mxu0 }
 0xb0b   :  { %v1504_v16 = vadd.f32 %v3460_v13, %v1503_v60  ;;  %v3894_v62 = vpop.f32.mrb[53].mxu0 }
 0xb0c   :  { %v1506_v17 = vpop.f32.mrb[54].mxu0 }
 0xb0d   :  { %v1507_v18 = vadd.f32 %v3460_v13, %v1506_v17  ;;  %v3895_v14 = vpop.f32.mrb[55].mxu0  ;;  %v1525_v55 = vmax.f32 %v1504_v16, 0.0 }
 0xb0f   :  { %v1526_v25 = vmax.f32 %v1507_v18, 0.0 }
 0xb11   :  { %v1530_v33 = vpack.c.bf16 %v1526_v25, %v1525_v55 }
 0xb12   :  { %v1511_v19 = vpop.f32.mrb[56].mxu0 }
 0xb13   :  { %v1512_v44 = vadd.f32 %v3460_v13, %v1511_v19  ;;  %v3898_v20 = vpop.f32.mrb[57].mxu0  ;;  %3913 = vmatmul.mubr.msk.bf16.vlgmr.msra.gmra.mrb[68].mxu1 %vm1572_vm8, %v1530_v33 }
 0xb14   :  { %v1514_v22 = vpop.f32.mrb[58].mxu0  ;;  %3916 = vmatprep.mubr.msk.bf16.mxu1 %vm4428_vm0, %v4427_v1 }
 0xb15   :  { %v1515_v24 = vadd.f32 %v3460_v13, %v1514_v22  ;;  %v3899_v47 = vpop.f32.mrb[59].mxu0  ;;  %v1527_v28 = vmax.f32 %v1512_v44, 0.0 }
 0xb16   :  { %v4175_v47 = vld [vmem:[%s5822_s20 + $0x10] sm:$0xff]  }
 0xb17   :  { %v1528_v30 = vmax.f32 %v1515_v24, 0.0  ;;  %3925 = vmatpush3.bf16.msra.mxu0 %v4175_v47 }
 0xb18   :  { %3926 = vmatprep.subr.bf16.mxu0 %v4427_v1 }
 0xb19   :  { %v1531_v26 = vpack.c.bf16 %v1528_v30, %v1527_v28  ;;  %v4176_v28 = vld [vmem:[%s5792_s4 + $0x10] sm:$0xff]   ;;  %v4177_v30 = vld [vmem:[%s5822_s20 + $0x18] sm:$0xff]  }
 0xb1a   :  { %3941 = vmatpush3.bf16.msra.mxu1 %v4176_v28 }
 0xb1b   :  { %3917 = vmatmul.mubr.msk.bf16.gmra.mrb[72].mxu1 %vm1572_vm8, %v1531_v26  ;;  %3942 = vmatprep.subr.bf16.mxu1 %v4427_v1  ;;  %v4178_v26 = vld [vmem:[%s5792_s4 + $0x18] sm:$0xff]  }
 0xb1c   :  { %3920 = vmatprep.mubr.msk.bf16.mxu1 %vm4428_vm0, %v4427_v1  ;;  %3927 = vmatpush3.bf16.msra.mxu0 %v4177_v30 }
 0xb1d   :  { %3956 = vmatprep.subr.bf16.mxu0 %v4427_v1 }
 0xb1e   :  { %3943 = vmatpush3.bf16.msra.mxu1 %v4178_v26 }
 0xb1f   :  { %3974 = vmatprep.subr.bf16.mxu1 %v4427_v1 }
 0xb42   :  { %v1519_v31 = vpop.f32.mrb[60].mxu0 }
 0xb43   :  { %v1520_v32 = vadd.f32 %v3460_v13, %v1519_v31  ;;  %v3902_v34 = vpop.f32.mrb[61].mxu0 }
 0xb44   :  { %v1522_v36 = vpop.f32.mrb[62].mxu0 }
 0xb45   :  { %v1529_v38 = vmax.f32 %v1520_v32, 0.0  ;;  %v3903_v40 = vpop.f32.mrb[63].mxu0 }
 0xb47   :  { %v1532_v42 = vpack.c.bf16 %v1529_v38, %v1529_v38 }
 0xb49   :  { %3921 = vmatmul.mubr.msk.bf16.gmra.mrb[76].mxu1 %vm1572_vm8, %v1532_v42 }
 0xb4a   :  { %3944 = vmatprep.mubr.msk.bf16.mxu1 %vm4428_vm0, %v4427_v1 }
 0xbe6   :  { %v1616_v23 = vpop.f32.mrb[68].mxu1 }
 0xbe7   :  { %v1617_v50 = vadd.f32 %v3466_v49, %v1616_v23  ;;  %v3914_v37 = vpop.f32.mrb[69].mxu1 }
 0xbe8   :  { %v1619_v52 = vpop.f32.mrb[70].mxu1 }
 0xbe9   :  { %v1620_v51 = vadd.f32 %v3466_v49, %v1619_v52  ;;  %v3915_v54 = vpop.f32.mrb[71].mxu1  ;;  %v1638_v56 = vadd.f32 %v1617_v50, %v5129_v6 }
 0xbeb   :  { %v1645_v39 = vsel %vm317_vm2, %v1638_v56, 0.0  ;;  %v1639_v57 = vadd.f32 %v1620_v51, %v5131_v35 }
 0xbec   :  { %1646 = vadd.xlane.f32.xlu1 %v1645_v39 }
 0xbed   :  { %v1648_v2 = vsel %vm317_vm2, %v1639_v57, 0.0 }
 0xbee   :  { %1649 = vadd.xlane.f32.xlu0 %v1648_v2  ;;  %v1624_v41 = vpop.f32.mrb[72].mxu1 }
 0xbef   :  { %v1625_v29 = vadd.f32 %v3466_v49, %v1624_v41  ;;  %v3918_v4 = vpop.f32.mrb[73].mxu1  ;;  %v3474_v41 = vld [vmem:[%s5823_s29] ss:$0 sm:$0xff] }
 0xbf0   :  { %v1627_v45 = vpop.f32.mrb[74].mxu1 }
 0xbf1   :  { %v1628_v48 = vadd.f32 %v3466_v49, %v1627_v45  ;;  %v3919_v27 = vpop.f32.mrb[75].mxu1  ;;  %v1640_v63 = vadd.f32 %v1625_v29, %v5140_v21 }
 0xbf2   :  { %v3475_v27 = vld [vmem:[%s5824_s9] ss:$0 sm:$0xff] }
 0xbf3   :  { %v1651_v11 = vsel %vm317_vm2, %v1640_v63, 0.0  ;;  %v1641_v6 = vadd.f32 %v1628_v48, %v5138_v46 }
 0xbf4   :  { %1652 = vadd.xlane.f32.xlu1 %v1651_v11 }
 0xbf5   :  { %v1654_v3 = vsel %vm317_vm2, %v1641_v6, 0.0 }
 0xbf6   :  { %1655 = vadd.xlane.f32.xlu0 %v1654_v3 }
 0xc1c   :  { %v1632_v35 = vpop.f32.mrb[76].mxu1 }
 0xc1d   :  { %v1633_v15 = vadd.f32 %v3466_v49, %v1632_v35  ;;  %v3922_v53 = vpop.f32.mrb[77].mxu1 }
 0xc1e   :  { %v1635_v58 = vpop.f32.mrb[78].mxu1 }
 0xc1f   :  { %v3923_v5 = vpop.f32.mrb[79].mxu1  ;;  %v1642_v8 = vadd.f32 %v1633_v15, %v5147_v7 }
 0xc21   :  { %v1657_v61 = vsel %vm1357_vm7, %v1642_v8, 0.0 }
 0xc22   :  { %1658 = vadd.xlane.f32.xlu1 %v1657_v61 }
 0xc79   :  { %v1647_v9 = vpop.xlane.xlu1 %1646 }
 0xc7a   :  { %v1660_v21 = vmul.f32 0.03125, %v1647_v9 }
 0xc7b   :  { %v1650_v12 = vpop.xlane.xlu0 %1649 }
 0xc7c   :  { %v1665_v13 = vsub.f32 %v1638_v56, %v1660_v21  ;;  %v1661_v60 = vmul.f32 0.03125, %v1650_v12 }
 0xc7e   :  { %v1666_v46 = vsub.f32 %v1639_v57, %v1661_v60  ;;  %v1670_v16 = vmul.f32 %v1665_v13, %v1665_v13 }
 0xc80   :  { %v1675_v62 = vsel %vm317_vm2, %v1670_v16, 0.0  ;;  %v1671_v17 = vmul.f32 %v1666_v46, %v1666_v46 }
 0xc81   :  { %v1653_v18 = vpop.xlane.xlu1 %1652  ;;  %1676 = vadd.xlane.f32.xlu0 %v1675_v62 }
 0xc82   :  { %v1662_v14 = vmul.f32 0.03125, %v1653_v18  ;;  %v1678_v55 = vsel %vm317_vm2, %v1671_v17, 0.0 }
 0xc83   :  { %v1656_v25 = vpop.xlane.xlu0 %1655  ;;  %1679 = vadd.xlane.f32.xlu1 %v1678_v55 }
 0xc84   :  { %v1667_v7 = vsub.f32 %v1640_v63, %v1662_v14  ;;  %v1663_v33 = vmul.f32 0.03125, %v1656_v25 }
 0xc86   :  { %v1668_v19 = vsub.f32 %v1641_v6, %v1663_v33  ;;  %v1672_v44 = vmul.f32 %v1667_v7, %v1667_v7 }
 0xc88   :  { %v1681_v20 = vsel %vm317_vm2, %v1672_v44, 0.0  ;;  %v1673_v22 = vmul.f32 %v1668_v19, %v1668_v19 }
 0xc89   :  { %1682 = vadd.xlane.f32.xlu0 %v1681_v20 }
 0xc8a   :  { %v1684_v24 = vsel %vm317_vm2, %v1673_v22, 0.0 }
 0xc8b   :  { %1685 = vadd.xlane.f32.xlu1 %v1684_v24 }
 0xcaf   :  { %v1659_v31 = vpop.xlane.xlu1 %1658 }
 0xcb0   :  { %v1664_v32 = vmul.f32 0.03125, %v1659_v31 }
 0xcb2   :  { %v5207_v34 = vsub.f32 %v1642_v8, %v1664_v32 }
 0xcb4   :  { %v1674_v36 = vmul.f32 %v5207_v34, %v5207_v34 }
 0xcb6   :  { %v1687_v38 = vsel %vm1357_vm7, %v1674_v36, 0.0 }
 0xcb7   :  { %1688 = vadd.xlane.f32.xlu0 %v1687_v38 }
 0xd0e   :  { %v1677_v40 = vpop.xlane.xlu0 %1676 }
 0xd0f   :  { %v1690_v42 = vmul.f32 0.03125, %v1677_v40 }
 0xd10   :  { %v1680_v49 = vpop.xlane.xlu1 %1679 }
 0xd11   :  { %v1695_v23 = vadd.f32 1e-05, %v1690_v42  ;;  %v1691_v50 = vmul.f32 0.03125, %v1680_v49 }
 0xd13   :  { %4277 = vrsqrt.f32 %v1695_v23  ;;  %v1696_v37 = vadd.f32 1e-05, %v1691_v50 }
 0xd15   :  { %4279 = vrsqrt.f32 %v1696_v37 }
 0xd16   :  { %v1683_v52 = vpop.xlane.xlu0 %1682 }
 0xd17   :  { %v1692_v51 = vmul.f32 0.03125, %v1683_v52 }
 0xd18   :  { %v1686_v54 = vpop.xlane.xlu1 %1685 }
 0xd19   :  { %v1697_v56 = vadd.f32 1e-05, %v1692_v51  ;;  %v1693_v39 = vmul.f32 0.03125, %v1686_v54 }
 0xd1b   :  { %4281 = vrsqrt.f32 %v1697_v56  ;;  %v1698_v57 = vadd.f32 1e-05, %v1693_v39 }
 0xd1d   :  { %v4278_v2 = vpop.eup %4277  ;;  %4283 = vrsqrt.f32 %v1698_v57 }
 0xd1e   :  { %v1705_v29 = vmul.f32 %v4278_v2, %v1665_v13 }
 0xd1f   :  { %v4280_v4 = vpop.eup %4279 }
 0xd20   :  { %v1716_v45 = vmul.f32 %v3474_v41, %v1705_v29  ;;  %v1706_v48 = vmul.f32 %v4280_v4, %v1666_v46 }
 0xd22   :  { %v1717_v63 = vmul.f32 %v3474_v41, %v1706_v48  ;;  %v5218_v11 = vadd.f32 %v3475_v27, %v1716_v45 }
 0xd24   :  { %v5220_v6 = vadd.f32 %v3475_v27, %v1717_v63 }
 0xd25   :  { %v4282_v3 = vpop.eup %4281 }
 0xd26   :  { %v1707_v35 = vmul.f32 %v4282_v3, %v1667_v7  ;;  %v1732_v15 = vpack.c.bf16 %v5220_v6, %v5218_v11 }
 0xd27   :  { %v4284_v53 = vpop.eup %4283 }
 0xd28   :  { %v1708_v58 = vmul.f32 %v4284_v53, %v1668_v19  ;;  %3929 = vmatmul.mubr.msk.bf16.vlgmr.msra.gmra.mrb[64].mxu0 %vm317_vm2, %v1732_v15  ;;  %3945 = vmatmul.mubr.msk.bf16.vlgmr.msra.gmra.mrb[80].mxu1 %vm317_vm2, %v1732_v15  ;;  %v5227_v5 = vsel %vm317_vm2, %v1732_v15, 0  ;;  %v1718_v8 = vmul.f32 %v3474_v41, %v1707_v35 }
 0xd29   :  { %3957 = vmatpush3.bf16.xpose.msra.mxu0 %v5227_v5  ;;  %3975 = vmatpush3.bf16.xpose.msra.mxu1 %v5227_v5 }
 0xd2a   :  { %3932 = vmatprep.mubr.msk.bf16.mxu0 %vm4428_vm0, %v4427_v1  ;;  %3948 = vmatprep.mubr.msk.bf16.mxu1 %vm4428_vm0, %v4427_v1  ;;  %v1719_v61 = vmul.f32 %v3474_v41, %v1708_v58  ;;  %v5237_v9 = vadd.f32 %v3475_v27, %v1718_v8 }
 0xd2b   :  { %3958 = vmatprep.subr.bf16.mxu0 %v4427_v1  ;;  %3976 = vmatprep.subr.bf16.mxu1 %v4427_v1 }
 0xd2c   :  { %v5239_v21 = vadd.f32 %v3475_v27, %v1719_v61 }
 0xd2e   :  { %v1733_v12 = vpack.c.bf16 %v5239_v21, %v5237_v9 }
 0xd30   :  { %3933 = vmatmul.mubr.msk.bf16.gmra.mrb[68].mxu0 %vm317_vm2, %v1733_v12  ;;  %3949 = vmatmul.mubr.msk.bf16.gmra.mrb[84].mxu1 %vm317_vm2, %v1733_v12  ;;  %v5246_v13 = vsel %vm317_vm2, %v1733_v12, 0 }
 0xd31   :  { %3959 = vmatpush3.bf16.xpose.msra.mxu0 %v5246_v13  ;;  %3977 = vmatpush3.bf16.xpose.msra.mxu1 %v5246_v13 }
 0xd32   :  { %3936 = vmatprep.mubr.msk.bf16.mxu0 %vm4428_vm0, %v4427_v1  ;;  %3952 = vmatprep.mubr.msk.bf16.mxu1 %vm4428_vm0, %v4427_v1 }
 0xd33   :  { %3960 = vmatprep.subr.bf16.mxu0 %v4427_v1  ;;  %3978 = vmatprep.subr.bf16.mxu1 %v4427_v1 }
 0xd44   :  { %v1689_v60 = vpop.xlane.xlu0 %1688 }
 0xd45   :  { %v1694_v46 = vmul.f32 0.03125, %v1689_v60 }
 0xd47   :  { %v1699_v16 = vadd.f32 1e-05, %v1694_v46 }
 0xd49   :  { %4285 = vrsqrt.f32 %v1699_v16 }
 0xd53   :  { %v4286_v62 = vpop.eup %4285 }
 0xd54   :  { %v1709_v17 = vmul.f32 %v4286_v62, %v5207_v34 }
 0xd56   :  { %v1720_v18 = vmul.f32 %v3474_v41, %v1709_v17 }
 0xd58   :  { %v5257_v14 = vadd.f32 %v3475_v27, %v1720_v18 }
 0xd5a   :  { %v1734_v55 = vpack.c.bf16 %v5257_v14, %v5257_v14 }
 0xd5c   :  { %3937 = vmatmul.mubr.msk.bf16.gmra.mrb[72].mxu0 %vm317_vm2, %v1734_v55  ;;  %3953 = vmatmul.mubr.msk.bf16.gmra.mrb[88].mxu1 %vm317_vm2, %v1734_v55  ;;  %v5264_v25 = vsel %vm317_vm2, %v1734_v55, 0 }
 0xd5d   :  { %3961 = vmatpush3.bf16.xpose.msra.mxu0 %v5264_v25  ;;  %3979 = vmatpush3.bf16.xpose.msra.mxu1 %v5264_v25 }
 0xd5e   :  { %3962 = vmatprep.mubr.msk.bf16.mxu0 %vm4428_vm0, %v4427_v1  ;;  %3980 = vmatprep.mubr.msk.bf16.mxu1 %vm4428_vm0, %v4427_v1 }
 0xd5f   :  { %4010 = vmatprep.subr.bf16.mxu1 %v4427_v1  ;;  %3992 = vmatprep.subr.bf16.mxu0 %v4427_v1 }
 0xdfb   :  { %v1795_v7 = vpop.f32.mrb[64].mxu0  ;;  %v1868_v33 = vpop.f32.mrb[80].mxu1 }
 0xdfc   :  { %v3930_v19 = vpop.f32.mrb[65].mxu0  ;;  %v3946_v44 = vpop.f32.mrb[81].mxu1 }
 0xdfd   :  { %v1798_v20 = vpop.f32.mrb[66].mxu0  ;;  %v1871_v22 = vpop.f32.mrb[82].mxu1 }
 0xdfe   :  { %v5274_v24 = vpack.c.bf16 %v1798_v20, %v1795_v7  ;;  %v5276_v47 = vpack.c.bf16 %v1871_v22, %v1868_v33  ;;  %v3931_v28 = vpop.f32.mrb[67].mxu0  ;;  %v3947_v30 = vpop.f32.mrb[83].mxu1 }
 0xe00   :  { %2032 = vrot.lane.b32.xlu1 %v5274_v24, %s4429_s26  ;;  %3963 = vmatmul.mubr.msk.bf16.vlgmr.msra.gmra.mrb[76].mxu0 %vm317_vm2, %v5274_v24 }
 0xe01   :  { %3966 = vmatprep.mubr.msk.bf16.mxu0 %vm4428_vm0, %v4427_v1 }
 0xe03   :  { %v1803_v26 = vpop.f32.mrb[68].mxu0  ;;  %v1876_v31 = vpop.f32.mrb[84].mxu1 }
 0xe04   :  { %v3934_v32 = vpop.f32.mrb[69].mxu0  ;;  %v3950_v34 = vpop.f32.mrb[85].mxu1 }
 0xe05   :  { %v1806_v36 = vpop.f32.mrb[70].mxu0  ;;  %v1879_v38 = vpop.f32.mrb[86].mxu1 }
 0xe06   :  { %v5284_v40 = vpack.c.bf16 %v1806_v36, %v1803_v26  ;;  %v5286_v42 = vpack.c.bf16 %v1879_v38, %v1876_v31  ;;  %v3935_v49 = vpop.f32.mrb[71].mxu0  ;;  %v3951_v23 = vpop.f32.mrb[87].mxu1 }
 0xe08   :  { %2034 = vrot.lane.b32.xlu0 %v5284_v40, %s4429_s26  ;;  %3967 = vmatmul.mubr.msk.bf16.gmra.mrb[80].mxu0 %vm317_vm2, %v5284_v40 }
 0xe09   :  { %3970 = vmatprep.mubr.msk.bf16.mxu0 %vm4428_vm0, %v4427_v1 }
 0xe2f   :  { %v1811_v50 = vpop.f32.mrb[72].mxu0  ;;  %v1884_v37 = vpop.f32.mrb[88].mxu1 }
 0xe30   :  { %v5294_v52 = vpack.c.bf16 %v1811_v50, %v1811_v50  ;;  %v3938_v51 = vpop.f32.mrb[73].mxu0  ;;  %v3954_v54 = vpop.f32.mrb[89].mxu1  ;;  %v5307_v29 = vpack.c.bf16 %v1884_v37, %v1884_v37 }
 0xe31   :  { %v1814_v56 = vpop.f32.mrb[74].mxu0  ;;  %v1887_v39 = vpop.f32.mrb[90].mxu1 }
 0xe32   :  { %v3955_v57 = vpop.f32.mrb[91].mxu1  ;;  %2036 = vrot.lane.b32.xlu1 %v5294_v52, %s4429_s26  ;;  %v3939_v2 = vpop.f32.mrb[75].mxu0  ;;  %3971 = vmatmul.mubr.msk.bf16.gmra.mrb[84].mxu0 %vm317_vm2, %v5294_v52  ;;  %v2260_v45 = vsel %vm758_vm3, %v5307_v29, 0 }
 0xe33   :  { %3998 = vmatprep.mubr.msk.bf16.mxu0 %vm4428_vm0, %v4427_v1 }
 0xe72   :  { %v2033_v41 = vpop.permute.xlu1 %2032 }
 0xe73   :  { %3981 = vmatmul.mubr.msk.bf16.vlgmr.msra.gmra.mrb[92].mxu1 %vm317_vm2, %v2033_v41 }
 0xe74   :  { %4011 = vmatpush3.bf16.msra.mxu1 %v5276_v47  ;;  %3984 = vmatprep.mubr.msk.bf16.mxu1 %vm4428_vm0, %v4427_v1 }
 0xe75   :  { %4012 = vmatprep.subr.bf16.mxu1 %v4427_v1 }
 0xe78   :  { %4013 = vmatpush3.bf16.msra.mxu1 %v5286_v42 }
 0xe79   :  { %4014 = vmatprep.subr.bf16.mxu1 %v4427_v1 }
 0xe7a   :  { %v2035_v4 = vpop.permute.xlu0 %2034 }
 0xe7b   :  { %3985 = vmatmul.mubr.msk.bf16.gmra.mrb[96].mxu1 %vm317_vm2, %v2035_v4 }
 0xe7c   :  { %4015 = vmatpush3.bf16.msra.mxu1 %v2260_v45  ;;  %3988 = vmatprep.mubr.msk.bf16.mxu1 %vm4428_vm0, %v4427_v1 }
 0xe7d   :  { %4046 = vmatprep.subr.bf16.mxu1 %v4427_v1 }
 0xea4   :  { %v2037_v48 = vpop.permute.xlu1 %2036 }
 0xea5   :  { %3989 = vmatmul.mubr.msk.bf16.gmra.mrb[100].mxu1 %vm317_vm2, %v2037_v48 }
 0xea6   :  { %4016 = vmatprep.mubr.msk.bf16.mxu1 %vm4428_vm0, %v4427_v1 }
 0xed3   :  { %v5320_v27 = vpop.f32.mrb[76].mxu0 }
 0xed4   :  { %v3964_v63 = vpop.f32.mrb[77].mxu0 }
 0xed5   :  { %v5322_v3 = vpop.f32.mrb[78].mxu0 }
 0xed6   :  { %v3965_v35 = vpop.f32.mrb[79].mxu0 }
 0xedb   :  { %v5324_v15 = vpop.f32.mrb[80].mxu0 }
 0xedc   :  { %v3968_v53 = vpop.f32.mrb[81].mxu0 }
 0xedd   :  { %v5326_v58 = vpop.f32.mrb[82].mxu0 }
 0xede   :  { %v3969_v8 = vpop.f32.mrb[83].mxu0 }
 0xf05   :  { %v5328_v61 = vpop.f32.mrb[84].mxu0 }
 0xf06   :  { %v3972_v12 = vpop.f32.mrb[85].mxu0 }
 0xf07   :  { %v1958_v60 = vpop.f32.mrb[86].mxu0 }
 0xf08   :  { %v3973_v46 = vpop.f32.mrb[87].mxu0 }
 0xf46   :  { %v2081_v16 = vpop.f32.mrb[92].mxu1 }
 0xf47   :  { %v2103_v62 = vmul.f32 0.17677669, %v2081_v16  ;;  %v3982_v17 = vpop.f32.mrb[93].mxu1 }
 0xf48   :  { %v2084_v18 = vpop.f32.mrb[94].mxu1 }
 0xf49   :  { %v2104_v55 = vmul.f32 0.17677669, %v2084_v18  ;;  %v3983_v7 = vpop.f32.mrb[95].mxu1  ;;  %v2108_v33 = vadd.f32 %v2103_v62, %v4802_v43 }
 0xf4b   :  { %v2113_v19 = vsel %vm536_vm5, %v2108_v33, -inf  ;;  %v2109_v44 = vadd.f32 %v2104_v55, %v4802_v43 }
 0xf4c   :  { %2114 = vmax.xlane.f32.xlu1 %v2113_v19 }
 0xf4d   :  { %v2116_v20 = vsel %vm536_vm5, %v2109_v44, -inf }
 0xf4e   :  { %2117 = vmax.xlane.f32.xlu0 %v2116_v20  ;;  %v2089_v22 = vpop.f32.mrb[96].mxu1 }
 0xf4f   :  { %v2105_v28 = vmul.f32 0.17677669, %v2089_v22  ;;  %v3986_v30 = vpop.f32.mrb[97].mxu1 }
 0xf50   :  { %v2092_v26 = vpop.f32.mrb[98].mxu1  ;;  %v1961_v30 = vmul.f32 0.17677669, %v5320_v27 }
 0xf51   :  { %v2106_v31 = vmul.f32 0.17677669, %v2092_v26  ;;  %v3987_v32 = vpop.f32.mrb[99].mxu1  ;;  %v2110_v34 = vadd.f32 %v2105_v28, %v4813_v59 }
 0xf52   :  { %v5377_v26 = vadd.f32 %v1961_v30, %v4802_v43 }
 0xf53   :  { %v2119_v36 = vsel %vm536_vm5, %v2110_v34, -inf  ;;  %v2111_v38 = vadd.f32 %v2106_v31, %v4816_v0  ;;  %v1963_v31 = vmul.f32 0.17677669, %v5324_v15 }
 0xf54   :  { %2120 = vmax.xlane.f32.xlu0 %v2119_v36  ;;  %v1965_v36 = vmul.f32 0.17677669, %v5328_v61 }
 0xf55   :  { %v2122_v49 = vsel %vm536_vm5, %v2111_v38, -inf  ;;  %v5381_v32 = vadd.f32 %v1963_v31, %v4813_v59 }
 0xf56   :  { %2123 = vmax.xlane.f32.xlu1 %v2122_v49 }
 0xf57   :  { %v1977_v27 = vsel %vm536_vm5, %v5381_v32, -inf }
 0xf78   :  { %v2097_v23 = vpop.f32.mrb[100].mxu1 }
 0xf79   :  { %v2107_v50 = vmul.f32 0.17677669, %v2097_v23  ;;  %v3990_v37 = vpop.f32.mrb[101].mxu1 }
 0xf7a   :  { %v2100_v51 = vpop.f32.mrb[102].mxu1 }
 0xf7b   :  { %v3991_v54 = vpop.f32.mrb[103].mxu1  ;;  %v2112_v56 = vadd.f32 %v2107_v50, %v4823_v10 }
 0xf7d   :  { %v2125_v39 = vsel %vm549_vm6, %v2112_v56, -inf }
 0xf7e   :  { %2126 = vmax.xlane.f32.xlu0 %v2125_v39 }
 0xfd9   :  { %v2115_v57 = vpop.xlane.xlu1 %2114 }
 0xfda   :  { %v2128_v2 = vsub.f32 %v2108_v33, %v2115_v57 }
 0xfdb   :  { %v2118_v41 = vpop.xlane.xlu0 %2117 }
 0xfdc   :  { %v2133_v4 = vmul.f32 1.442695, %v2128_v2  ;;  %v2129_v45 = vsub.f32 %v2109_v44, %v2118_v41 }
 0xfde   :  { %4287 = vpow2.f32 %v2133_v4  ;;  %v2135_v48 = vmul.f32 1.442695, %v2129_v45 }
 0xfe0   :  { %4289 = vpow2.f32 %v2135_v48 }
 0xfe1   :  { %v2121_v17 = vpop.xlane.xlu0 %2120 }
 0xfe2   :  { %v2130_v18 = vsub.f32 %v2110_v34, %v2121_v17  ;;  %v1964_v34 = vmul.f32 0.17677669, %v5326_v58 }
 0xfe3   :  { %v2124_v63 = vpop.xlane.xlu1 %2123 }
 0xfe4   :  { %v2131_v35 = vsub.f32 %v2111_v38, %v2124_v63  ;;  %v2137_v33 = vmul.f32 1.442695, %v2130_v18  ;;  %v5399_v38 = vadd.f32 %v1965_v36, %v4823_v10 }
 0xfe6   :  { %v2139_v53 = vmul.f32 1.442695, %v2131_v35  ;;  %v1983_v49 = vsel %vm549_vm6, %v5399_v38, -inf }
 0xfe8   :  { %v5340_v8 = vpop.eup %4287  ;;  %4291 = vpow2.f32 %v2139_v53 }
 0xfe9   :  { %v2143_v12 = vsel %vm536_vm5, %v5340_v8, 0.0 }
 0xfea   :  { %v5344_v60 = vpop.eup %4289  ;;  %2144 = vadd.xlane.f32.xlu1 %v2143_v12 }
 0xfeb   :  { %v2146_v46 = vsel %vm536_vm5, %v5344_v60, 0.0 }
 0xfec   :  { %2147 = vadd.xlane.f32.xlu0 %v2146_v46 }
 0xff2   :  { %v5348_v16 = vpop.eup %4291 }
 0xff3   :  { %v2152_v62 = vsel %vm536_vm5, %v5348_v16, 0.0 }
 0xff4   :  { %2153 = vadd.xlane.f32.xlu0 %v2152_v62 }
 0xffb   :  { %2174 = vrot.lane.b32.xlu1 %v5276_v47, %s4429_s26 }
0x100b   :  { %v2127_v55 = vpop.xlane.xlu0 %2126 }
0x100c   :  { %v2132_v7 = vsub.f32 %v2112_v56, %v2127_v55 }
0x100e   :  { %v2141_v19 = vmul.f32 1.442695, %v2132_v7 }
0x1010   :  { %4293 = vpow2.f32 %v2141_v19 }
0x1011   :  { %4295 = vpow2.f32 %v2137_v33 }
0x101a   :  { %v5354_v44 = vpop.eup %4293 }
0x101b   :  { %v4296_v20 = vpop.eup %4295  ;;  %v2155_v22 = vsel %vm549_vm6, %v5354_v44, 0.0 }
0x101c   :  { %2156 = vadd.xlane.f32.xlu0 %v2155_v22  ;;  %v2149_v28 = vsel %vm536_vm5, %v4296_v20, 0.0 }
0x101f   :  { %2150 = vadd.xlane.f32.xlu1 %v2149_v28 }
0x1030   :  { %2178 = vrot.lane.b32.xlu1 %v5307_v29, %s4429_s26 }
0x1032   :  { %2176 = vrot.lane.b32.xlu0 %v5286_v42, %s4429_s26 }
0x1034   :  { %2318 = vrot.lane.b32.xlu1 %v5274_v24, %s4431_s14 }
0x1036   :  { %2322 = vrot.lane.b32.xlu0 %v5294_v52, %s4431_s14 }
0x1038   :  { %2320 = vrot.lane.b32.xlu1 %v5284_v40, %s4431_s14 }
0x103a   :  { %2540 = vrot.lane.b32.xlu0 %v5284_v40, %s4432_s17  ;;  %v1971_v40 = vsel %vm536_vm5, %v5377_v26, -inf }
0x103c   :  { %2538 = vrot.lane.b32.xlu1 %v5274_v24, %s4432_s17  ;;  %v1962_v24 = vmul.f32 0.17677669, %v5322_v3 }
0x103e   :  { %v5393_v15 = vadd.f32 %v1962_v24, %v4802_v43 }
0x1040   :  { %2542 = vrot.lane.b32.xlu1 %v5294_v52, %s4432_s17  ;;  %v5388_v52 = vadd.f32 %v1964_v34, %v4816_v0  ;;  %v1974_v3 = vsel %vm536_vm5, %v5393_v15, -inf }
0x1042   :  { %v1980_v58 = vsel %vm536_vm5, %v5388_v52, -inf }
0x1059   :  { %1972 = vmax.xlane.f32.xlu0 %v1971_v40 }
0x105d   :  { %1978 = vmax.xlane.f32.xlu0 %v1977_v27 }
0x1061   :  { %1981 = vmax.xlane.f32.xlu0 %v1980_v58 }
0x1064   :  { %1975 = vmax.xlane.f32.xlu1 %v1974_v3 }
0x1068   :  { %1984 = vmax.xlane.f32.xlu1 %v1983_v49 }
0x1077   :  { %v2145_v23 = vpop.xlane.xlu1 %2144 }
0x1079   :  { %v2148_v61 = vpop.xlane.xlu0 %2147 }
0x107a   :  { %4297 = vrcp.f32 %v2148_v61 }
0x107b   :  { %v2175_v50 = vpop.permute.xlu1 %2174  ;;  %4299 = vrcp.f32 %v2145_v23 }
0x107c   :  { %3993 = vmatpush3.bf16.msra.mxu0 %v2175_v50 }
0x107d   :  { %3994 = vmatprep.subr.bf16.mxu0 %v4427_v1 }
0x1081   :  { %v2154_v37 = vpop.xlane.xlu0 %2153 }
0x1082   :  { %4301 = vrcp.f32 %v2154_v37 }
0x1084   :  { %v4298_v54 = vpop.eup %4297 }
0x1085   :  { %v4300_v57 = vpop.eup %4299  ;;  %v2164_v2 = vmul.f32 %v4298_v54, %v5344_v60 }
0x1086   :  { %v2163_v4 = vmul.f32 %v4300_v57, %v5340_v8 }
0x1088   :  { %v2168_v48 = vpack.c.bf16 %v2164_v2, %v2163_v4 }
0x108c   :  { %v4302_v63 = vpop.eup %4301 }
0x108d   :  { %v2166_v12 = vmul.f32 %v4302_v63, %v5348_v16 }
0x10a9   :  { %v2157_v51 = vpop.xlane.xlu0 %2156 }
0x10ac   :  { %v2151_v56 = vpop.xlane.xlu1 %2150 }
0x10ad   :  { %4303 = vrcp.f32 %v2151_v56  ;;  %v2177_v39 = vpop.permute.xlu0 %2176 }
0x10ae   :  { %3995 = vmatpush3.bf16.msra.mxu0 %v2177_v39  ;;  %4305 = vrcp.f32 %v2157_v51 }
0x10af   :  { %3996 = vmatprep.subr.bf16.mxu0 %v4427_v1 }
0x10b0   :  { %v2179_v41 = vpop.permute.xlu1 %2178 }
0x10b1   :  { %v2192_v45 = vsel %vm758_vm3, %v2179_v41, 0  ;;  %v2323_v18 = vpop.permute.xlu0 %2322 }
0x10b2   :  { %3997 = vmatpush3.bf16.msra.mxu0 %v2192_v45 }
0x10b3   :  { %4028 = vmatprep.subr.bf16.mxu0 %v4427_v1 }
0x10b4   :  { %v2319_v16 = vpop.permute.xlu1 %2318 }
0x10b5   :  { %3999 = vmatmul.mubr.msk.bf16.vlgmr.msra.gmra.mrb[88].mxu0 %vm536_vm5, %v2168_v48  ;;  %v2541_v55 = vpop.permute.xlu0 %2540 }
0x10b6   :  { %4002 = vmatprep.mubr.msk.bf16.mxu0 %vm4428_vm0, %v4427_v1 }
0x10b7   :  { %v4304_v35 = vpop.eup %4303 }
0x10b8   :  { %v2165_v53 = vmul.f32 %v4304_v35, %v4296_v20  ;;  %v4306_v8 = vpop.eup %4305  ;;  %v2321_v17 = vpop.permute.xlu1 %2320 }
0x10b9   :  { %v2167_v46 = vmul.f32 %v4306_v8, %v5354_v44 }
0x10ba   :  { %v2169_v60 = vpack.c.bf16 %v2166_v12, %v2165_v53 }
0x10bb   :  { %4029 = vmatpush3.bf16.xpose.msra.mxu0 %v5227_v5  ;;  %v2170_v62 = vpack.c.bf16 %v2167_v46, %v2167_v46 }
0x10bc   :  { %4030 = vmatprep.subr.bf16.mxu0 %v4427_v1  ;;  %v2539_v7 = vpop.permute.xlu1 %2538 }
0x10bd   :  { %4003 = vmatmul.mubr.msk.bf16.gmra.mrb[92].mxu0 %vm536_vm5, %v2169_v60 }
0x10be   :  { %4006 = vmatprep.mubr.msk.bf16.mxu0 %vm4428_vm0, %v4427_v1 }
0x10c3   :  { %4031 = vmatpush3.bf16.xpose.msra.mxu0 %v5246_v13 }
0x10c4   :  { %4032 = vmatprep.subr.bf16.mxu0 %v4427_v1 }
0x10c5   :  { %4007 = vmatmul.mubr.msk.bf16.gmra.mrb[96].mxu0 %vm536_vm5, %v2170_v62 }
0x10c6   :  { %4034 = vmatprep.mubr.msk.bf16.mxu0 %vm4428_vm0, %v4427_v1 }
0x10cb   :  { %4033 = vmatpush3.bf16.xpose.msra.mxu0 %v5264_v25 }
0x10cc   :  { %4064 = vmatprep.subr.bf16.mxu0 %v4427_v1 }
0x10d2   :  { %4035 = vmatmul.mubr.msk.bf16.vlgmr.msra.gmra.mrb[100].mxu0 %vm317_vm2, %v2319_v16 }
0x10d3   :  { %4065 = vmatpush3.bf16.xpose.msra.mxu0 %v5227_v5  ;;  %4038 = vmatprep.mubr.msk.bf16.mxu0 %vm4428_vm0, %v4427_v1 }
0x10d4   :  { %4066 = vmatprep.subr.bf16.mxu0 %v4427_v1 }
0x10da   :  { %4039 = vmatmul.mubr.msk.bf16.gmra.mrb[104].mxu0 %vm317_vm2, %v2321_v17 }
0x10db   :  { %4067 = vmatpush3.bf16.xpose.msra.mxu0 %v5246_v13  ;;  %4042 = vmatprep.mubr.msk.bf16.mxu0 %vm4428_vm0, %v4427_v1 }
0x10dc   :  { %4068 = vmatprep.subr.bf16.mxu0 %v4427_v1 }
0x10e2   :  { %4043 = vmatmul.mubr.msk.bf16.gmra.mrb[108].mxu0 %vm317_vm2, %v2323_v18 }
0x10e3   :  { %4069 = vmatpush3.bf16.xpose.msra.mxu0 %v5264_v25  ;;  %4070 = vmatprep.mubr.msk.bf16.mxu0 %vm4428_vm0, %v4427_v1  ;;  %v2543_v25 = vpop.permute.xlu1 %2542 }
0x10e4   :  { %4100 = vmatprep.subr.bf16.mxu0 %v4427_v1 }
0x10e6   :  { %v1973_v5 = vpop.xlane.xlu0 %1972 }
0x10e7   :  { %v1986_v13 = vsub.f32 %v5377_v26, %v1973_v5 }
0x10e9   :  { %v1991_v33 = vmul.f32 1.442695, %v1986_v13 }
0x10ea   :  { %4071 = vmatmul.mubr.msk.bf16.vlgmr.msra.gmra.mrb[112].mxu0 %vm317_vm2, %v2539_v7  ;;  %v1979_v19 = vpop.xlane.xlu0 %1978 }
0x10eb   :  { %4307 = vpow2.f32 %v1991_v33  ;;  %v1988_v44 = vsub.f32 %v5381_v32, %v1979_v19  ;;  %4074 = vmatprep.mubr.msk.bf16.mxu0 %vm4428_vm0, %v4427_v1 }
0x10ed   :  { %v1995_v20 = vmul.f32 1.442695, %v1988_v44 }
0x10ee   :  { %v1982_v22 = vpop.xlane.xlu0 %1981 }
0x10ef   :  { %4309 = vpow2.f32 %v1995_v20  ;;  %v1989_v28 = vsub.f32 %v5388_v52, %v1982_v22 }
0x10f1   :  { %v1976_v30 = vpop.xlane.xlu1 %1975  ;;  %v1997_v26 = vmul.f32 1.442695, %v1989_v28 }
0x10f2   :  { %v1987_v31 = vsub.f32 %v5393_v15, %v1976_v30  ;;  %4075 = vmatmul.mubr.msk.bf16.gmra.mrb[116].mxu0 %vm317_vm2, %v2541_v55 }
0x10f3   :  { %4078 = vmatprep.mubr.msk.bf16.mxu0 %vm4428_vm0, %v4427_v1 }
0x10f4   :  { %v1993_v34 = vmul.f32 1.442695, %v1987_v31 }
0x10f5   :  { %v4308_v32 = vpop.eup %4307  ;;  %v1985_v23 = vpop.xlane.xlu1 %1984 }
0x10f6   :  { %4311 = vpow2.f32 %v1993_v34  ;;  %v2001_v40 = vsel %vm536_vm5, %v4308_v32, 0.0  ;;  %v1990_v48 = vsub.f32 %v5399_v38, %v1985_v23 }
0x10f7   :  { %2002 = vadd.xlane.f32.xlu0 %v2001_v40  ;;  %4313 = vpow2.f32 %v1997_v26 }
0x10f8   :  { %v1999_v46 = vmul.f32 1.442695, %v1990_v48 }
0x10f9   :  { %v4310_v24 = vpop.eup %4309 }
0x10fa   :  { %4079 = vmatmul.mubr.msk.bf16.gmra.mrb[120].mxu0 %vm317_vm2, %v2543_v25  ;;  %v2007_v52 = vsel %vm536_vm5, %v4310_v24, 0.0 }
0x10fb   :  { %2008 = vadd.xlane.f32.xlu0 %v2007_v52  ;;  %4104 = vmatprep.mubr.msk.bf16.mxu0 %vm4428_vm0, %v4427_v1 }
0x1100   :  { %v4312_v27 = vpop.eup %4311 }
0x1101   :  { %v2004_v15 = vsel %vm536_vm5, %v4312_v27, 0.0  ;;  %v4314_v36 = vpop.eup %4313 }
0x1102   :  { %2005 = vadd.xlane.f32.xlu1 %v2004_v15  ;;  %v2010_v58 = vsel %vm536_vm5, %v4314_v36, 0.0 }
0x1106   :  { %2011 = vadd.xlane.f32.xlu1 %v2010_v58 }
0x1184   :  { %v2003_v61 = vpop.xlane.xlu0 %2002 }
0x1185   :  { %4315 = vrcp.f32 %v2003_v61 }
0x1188   :  { %v5460_v3 = vpop.f32.mrb[88].mxu0  ;;  %v2009_v39 = vpop.xlane.xlu0 %2008 }
0x1189   :  { %v4000_v49 = vpop.f32.mrb[89].mxu0 }
0x118a   :  { %v5462_v50 = vpop.f32.mrb[90].mxu0 }
0x118b   :  { %v4001_v37 = vpop.f32.mrb[91].mxu0 }
0x118f   :  { %v2006_v51 = vpop.xlane.xlu1 %2005  ;;  %v4316_v4 = vpop.eup %4315 }
0x1190   :  { %4317 = vrcp.f32 %v2006_v51  ;;  %v5464_v54 = vpop.f32.mrb[92].mxu0  ;;  %v2021_v12 = vmul.f32 %v4316_v4, %v4308_v32 }
0x1191   :  { %v4004_v56 = vpop.f32.mrb[93].mxu0 }
0x1192   :  { %v5466_v57 = vpop.f32.mrb[94].mxu0 }
0x1193   :  { %v2012_v2 = vpop.xlane.xlu1 %2011  ;;  %v4005_v41 = vpop.f32.mrb[95].mxu0 }
0x1194   :  { %4319 = vrcp.f32 %v2012_v2 }
0x1195   :  { %4321 = vrcp.f32 %v2009_v39 }
0x1196   :  { %4323 = vpow2.f32 %v1999_v46 }
0x1198   :  { %v5468_v45 = vpop.f32.mrb[96].mxu0 }
0x1199   :  { %v4008_v63 = vpop.f32.mrb[97].mxu0 }
0x119a   :  { %v4318_v35 = vpop.eup %4317  ;;  %v2247_v53 = vpop.f32.mrb[98].mxu0 }
0x119b   :  { %v2022_v60 = vmul.f32 %v4318_v35, %v4312_v27  ;;  %v4009_v8 = vpop.f32.mrb[99].mxu0 }
0x119d   :  { %v2026_v62 = vpack.c.bf16 %v2022_v60, %v2021_v12 }
0x119e   :  { %v4320_v16 = vpop.eup %4319 }
0x119f   :  { %4017 = vmatmul.mubr.msk.bf16.vlgmr.msra.gmra.mrb[104].mxu1 %vm536_vm5, %v2026_v62  ;;  %v4322_v17 = vpop.eup %4321  ;;  %v2024_v18 = vmul.f32 %v4320_v16, %v4314_v36 }
0x11a0   :  { %4020 = vmatprep.mubr.msk.bf16.mxu1 %vm4428_vm0, %v4427_v1  ;;  %v2023_v55 = vmul.f32 %v4322_v17, %v4310_v24  ;;  %v5485_v28 = vpop.eup %4323 }
0x11a1   :  { %v2013_v32 = vsel %vm549_vm6, %v5485_v28, 0.0 }
0x11a2   :  { %v2027_v38 = vpack.c.bf16 %v2024_v18, %v2023_v55 }
0x11a5   :  { %v2367_v5 = vpop.f32.mrb[100].mxu0 }
0x11a6   :  { %v2389_v7 = vmul.f32 0.17677669, %v2367_v5  ;;  %v4036_v13 = vpop.f32.mrb[101].mxu0 }
0x11a7   :  { %4021 = vmatmul.mubr.msk.bf16.gmra.mrb[108].mxu1 %vm536_vm5, %v2027_v38  ;;  %v2370_v33 = vpop.f32.mrb[102].mxu0 }
0x11a8   :  { %v5476_v19 = vadd.f32 %v2389_v7, %v4802_v43  ;;  %v2390_v44 = vmul.f32 0.17677669, %v2370_v33  ;;  %v4037_v25 = vpop.f32.mrb[103].mxu0  ;;  %4024 = vmatprep.mubr.msk.bf16.mxu1 %vm4428_vm0, %v4427_v1 }
0x11aa   :  { %v5481_v20 = vadd.f32 %v2390_v44, %v4802_v43  ;;  %v2399_v22 = vsel %vm536_vm5, %v5476_v19, -inf }
0x11ab   :  { %2400 = vmax.xlane.f32.xlu0 %v2399_v22 }
0x11ac   :  { %v2402_v30 = vsel %vm536_vm5, %v5481_v20, -inf }
0x11ad   :  { %2403 = vmax.xlane.f32.xlu1 %v2402_v30  ;;  %v2375_v31 = vpop.f32.mrb[104].mxu0 }
0x11ae   :  { %v2391_v26 = vmul.f32 0.17677669, %v2375_v31  ;;  %v4040_v34 = vpop.f32.mrb[105].mxu0 }
0x11af   :  { %2014 = vadd.xlane.f32.xlu0 %v2013_v32  ;;  %v2378_v40 = vpop.f32.mrb[106].mxu0 }
0x11b0   :  { %v5492_v24 = vadd.f32 %v2391_v26, %v4813_v59  ;;  %v2392_v52 = vmul.f32 0.17677669, %v2378_v40  ;;  %v4041_v27 = vpop.f32.mrb[107].mxu0 }
0x11b2   :  { %v5495_v15 = vadd.f32 %v2392_v52, %v4816_v0  ;;  %v2405_v36 = vsel %vm536_vm5, %v5492_v24, -inf }
0x11b3   :  { %2406 = vmax.xlane.f32.xlu0 %v2405_v36 }
0x11b4   :  { %v2408_v58 = vsel %vm536_vm5, %v5495_v15, -inf }
0x11b5   :  { %2409 = vmax.xlane.f32.xlu1 %v2408_v58  ;;  %v2383_v49 = vpop.f32.mrb[108].mxu0 }
0x11b6   :  { %v2393_v23 = vmul.f32 0.17677669, %v2383_v49  ;;  %v4044_v61 = vpop.f32.mrb[109].mxu0 }
0x11b7   :  { %v2386_v37 = vpop.f32.mrb[110].mxu0 }
0x11b8   :  { %v5502_v51 = vadd.f32 %v2393_v23, %v4823_v10  ;;  %v4045_v56 = vpop.f32.mrb[111].mxu0 }
0x11ba   :  { %v2411_v39 = vsel %vm549_vm6, %v5502_v51, -inf }
0x11bb   :  { %2412 = vmax.xlane.f32.xlu0 %v2411_v39 }
0x11bd   :  { %v2587_v2 = vpop.f32.mrb[112].mxu0 }
0x11be   :  { %v2609_v41 = vmul.f32 0.17677669, %v2587_v2  ;;  %v4072_v4 = vpop.f32.mrb[113].mxu0 }
0x11bf   :  { %v2590_v48 = vpop.f32.mrb[114].mxu0 }
0x11c0   :  { %v5507_v63 = vadd.f32 %v2609_v41, %v4802_v43  ;;  %v2610_v35 = vmul.f32 0.17677669, %v2590_v48  ;;  %v4073_v53 = vpop.f32.mrb[115].mxu0 }
0x11c2   :  { %v5510_v12 = vadd.f32 %v2610_v35, %v4802_v43  ;;  %v2619_v60 = vsel %vm536_vm5, %v5507_v63, -inf }
0x11c3   :  { %2620 = vmax.xlane.f32.xlu1 %v2619_v60 }
0x11c4   :  { %v2622_v8 = vsel %vm536_vm5, %v5510_v12, -inf }
0x11c5   :  { %2623 = vmax.xlane.f32.xlu0 %v2622_v8  ;;  %v2595_v46 = vpop.f32.mrb[116].mxu0 }
0x11c6   :  { %v2611_v62 = vmul.f32 0.17677669, %v2595_v46  ;;  %v4076_v16 = vpop.f32.mrb[117].mxu0 }
0x11c7   :  { %v2598_v17 = vpop.f32.mrb[118].mxu0 }
0x11c8   :  { %v5517_v18 = vadd.f32 %v2611_v62, %v4813_v59  ;;  %v2612_v55 = vmul.f32 0.17677669, %v2598_v17  ;;  %v4077_v5 = vpop.f32.mrb[119].mxu0 }
0x11ca   :  { %v5520_v43 = vadd.f32 %v2612_v55, %v4816_v0  ;;  %v2625_v38 = vsel %vm536_vm5, %v5517_v18, -inf }
0x11cb   :  { %2626 = vmax.xlane.f32.xlu1 %v2625_v38 }
0x11cc   :  { %v2628_v7 = vsel %vm536_vm5, %v5520_v43, -inf }
0x11cd   :  { %2629 = vmax.xlane.f32.xlu0 %v2628_v7  ;;  %v2603_v13 = vpop.f32.mrb[120].mxu0 }
0x11ce   :  { %v4080_v33 = vpop.f32.mrb[121].mxu0  ;;  %v2613_v59 = vmul.f32 0.17677669, %v2603_v13 }
0x11cf   :  { %v2606_v44 = vpop.f32.mrb[122].mxu0 }
0x11d0   :  { %v4081_v25 = vpop.f32.mrb[123].mxu0  ;;  %v5531_v0 = vadd.f32 %v2613_v59, %v4823_v10 }
0x11d2   :  { %v2631_v22 = vsel %vm549_vm6, %v5531_v0, -inf }
0x11dc   :  { %2459 = vrot.lane.b32.xlu1 %v5286_v42, %s4431_s14 }
0x11e3   :  { %2457 = vrot.lane.b32.xlu0 %v5276_v47, %s4431_s14 }
0x1200   :  { %2632 = vmax.xlane.f32.xlu1 %v2631_v22 }
0x1238   :  { %v2401_v30 = vpop.xlane.xlu0 %2400 }
0x1239   :  { %v2414_v31 = vsub.f32 %v5476_v19, %v2401_v30 }
0x123a   :  { %v2404_v26 = vpop.xlane.xlu1 %2403 }
0x123b   :  { %v2419_v34 = vmul.f32 1.442695, %v2414_v31  ;;  %v2415_v32 = vsub.f32 %v5481_v20, %v2404_v26 }
0x123c   :  { %v2015_v40 = vpop.xlane.xlu0 %2014 }
0x123d   :  { %4325 = vpow2.f32 %v2419_v34  ;;  %v2421_v52 = vmul.f32 1.442695, %v2415_v32 }
0x123e   :  { %4327 = vrcp.f32 %v2015_v40 }
0x123f   :  { %4329 = vpow2.f32 %v2421_v52 }
0x1240   :  { %v2407_v27 = vpop.xlane.xlu0 %2406 }
0x1241   :  { %v2416_v10 = vsub.f32 %v5492_v24, %v2407_v27 }
0x1242   :  { %v2410_v36 = vpop.xlane.xlu1 %2409 }
0x1243   :  { %v2423_v58 = vmul.f32 1.442695, %v2416_v10  ;;  %v2417_v49 = vsub.f32 %v5495_v15, %v2410_v36 }
0x1245   :  { %4331 = vpow2.f32 %v2423_v58  ;;  %v2425_v23 = vmul.f32 1.442695, %v2417_v49 }
0x1247   :  { %v5539_v61 = vpop.eup %4325  ;;  %4333 = vpow2.f32 %v2425_v23 }
0x1248   :  { %v4328_v19 = vpop.eup %4327  ;;  %v2413_v37 = vpop.xlane.xlu0 %2412  ;;  %v2429_v20 = vsel %vm536_vm5, %v5539_v61, 0.0 }
0x1249   :  { %v5543_v56 = vpop.eup %4329  ;;  %v2418_v39 = vsub.f32 %v5502_v51, %v2413_v37  ;;  %2430 = vadd.xlane.f32.xlu1 %v2429_v20  ;;  %v2025_v24 = vmul.f32 %v4328_v19, %v5485_v28 }
0x124a   :  { %v2432_v15 = vsel %vm536_vm5, %v5543_v56, 0.0 }
0x124b   :  { %v2427_v2 = vmul.f32 1.442695, %v2418_v39  ;;  %2433 = vadd.xlane.f32.xlu0 %v2432_v15  ;;  %v2028_v41 = vpack.c.bf16 %v2025_v24, %v2025_v24 }
0x124d   :  { %4335 = vpow2.f32 %v2427_v2  ;;  %4025 = vmatmul.mubr.msk.bf16.gmra.mrb[112].mxu1 %vm536_vm5, %v2028_v41 }
0x124e   :  { %4052 = vmatprep.mubr.msk.bf16.mxu1 %vm4428_vm0, %v4427_v1 }
0x124f   :  { %v5552_v4 = vpop.eup %4331 }
0x1250   :  { %v2621_v48 = vpop.xlane.xlu1 %2620  ;;  %v2435_v51 = vsel %vm536_vm5, %v5552_v4, 0.0 }
0x1251   :  { %v5556_v35 = vpop.eup %4333  ;;  %v2634_v28 = vsub.f32 %v5507_v63, %v2621_v48  ;;  %2436 = vadd.xlane.f32.xlu1 %v2435_v51 }
0x1252   :  { %v2624_v53 = vpop.xlane.xlu0 %2623  ;;  %v2438_v60 = vsel %vm536_vm5, %v5556_v35, 0.0 }
0x1253   :  { %v2639_v8 = vmul.f32 1.442695, %v2634_v28  ;;  %v2635_v46 = vsub.f32 %v5510_v12, %v2624_v53  ;;  %2439 = vadd.xlane.f32.xlu0 %v2438_v60 }
0x1255   :  { %4337 = vpow2.f32 %v2639_v8  ;;  %v2641_v62 = vmul.f32 1.442695, %v2635_v46 }
0x1257   :  { %v5562_v16 = vpop.eup %4335  ;;  %4339 = vpow2.f32 %v2641_v62 }
0x1258   :  { %v2441_v17 = vsel %vm549_vm6, %v5562_v16, 0.0  ;;  %v2627_v63 = vpop.xlane.xlu1 %2626 }
0x1259   :  { %2442 = vadd.xlane.f32.xlu1 %v2441_v17  ;;  %v2636_v52 = vsub.f32 %v5517_v18, %v2627_v63 }
0x125a   :  { %v2630_v55 = vpop.xlane.xlu0 %2629 }
0x125b   :  { %v2643_v27 = vmul.f32 1.442695, %v2636_v52 }
0x125c   :  { %v2460_v13 = vpop.permute.xlu1 %2459 }
0x125d   :  { %4341 = vpow2.f32 %v2643_v27 }
0x125e   :  { %v2458_v5 = vpop.permute.xlu0 %2457 }
0x125f   :  { %v5566_v38 = vpop.eup %4337  ;;  %4047 = vmatpush3.bf16.msra.mxu1 %v2458_v5 }
0x1260   :  { %v2649_v7 = vsel %vm536_vm5, %v5566_v38, 0.0  ;;  %4048 = vmatprep.subr.bf16.mxu1 %v4427_v1 }
0x1261   :  { %v5571_v12 = vpop.eup %4339  ;;  %2650 = vadd.xlane.f32.xlu1 %v2649_v7 }
0x1262   :  { %v2652_v33 = vsel %vm536_vm5, %v5571_v12, 0.0 }
0x1263   :  { %2653 = vadd.xlane.f32.xlu0 %v2652_v33  ;;  %4049 = vmatpush3.bf16.msra.mxu1 %v2460_v13 }
0x1264   :  { %4050 = vmatprep.subr.bf16.mxu1 %v4427_v1 }
0x1272   :  { %v2296_v44 = vpop.f32.mrb[104].mxu1  ;;  %2677 = vrot.lane.b32.xlu1 %v5276_v47, %s4432_s17 }
0x1273   :  { %v5579_v25 = vadd.f32 %v2296_v44, %v5460_v3  ;;  %v4018_v59 = vpop.f32.mrb[105].mxu1 }
0x1274   :  { %v2299_v22 = vpop.f32.mrb[106].mxu1 }
0x1275   :  { %v5582_v30 = vadd.f32 %v2299_v22, %v5462_v50  ;;  %v4019_v31 = vpop.f32.mrb[107].mxu1  ;;  %v2637_v50 = vsub.f32 %v5520_v43, %v2630_v55 }
0x1277   :  { %v2645_v10 = vmul.f32 1.442695, %v2637_v50 }
0x1279   :  { %2461 = vrot.lane.b32.xlu0 %v5307_v29, %s4431_s14  ;;  %4343 = vpow2.f32 %v2645_v10 }
0x127a   :  { %v2304_v26 = vpop.f32.mrb[108].mxu1 }
0x127b   :  { %v5587_v34 = vadd.f32 %v2304_v26, %v5464_v54  ;;  %v4022_v32 = vpop.f32.mrb[109].mxu1  ;;  %v5595_v54 = vpop.eup %4341 }
0x127c   :  { %v2307_v40 = vpop.f32.mrb[110].mxu1 }
0x127d   :  { %v5590_v47 = vadd.f32 %v2307_v40, %v5466_v57  ;;  %v4023_v3 = vpop.f32.mrb[111].mxu1  ;;  %v2655_v57 = vsel %vm536_vm5, %v5595_v54, 0.0 }
0x1283   :  { %v5599_v23 = vpop.eup %4343 }
0x1284   :  { %v2658_v18 = vsel %vm536_vm5, %v5599_v23, 0.0 }
0x128d   :  { %v2633_v36 = vpop.xlane.xlu1 %2632 }
0x128e   :  { %v2638_v58 = vsub.f32 %v5531_v0, %v2633_v36 }
0x1290   :  { %v2647_v49 = vmul.f32 1.442695, %v2638_v58 }
0x1292   :  { %4345 = vpow2.f32 %v2647_v49 }
0x1296   :  { %2656 = vadd.xlane.f32.xlu1 %v2655_v57 }
0x129a   :  { %2659 = vadd.xlane.f32.xlu1 %v2658_v18 }
0x129c   :  { %v5603_v43 = vpop.eup %4345 }
0x129d   :  { %v2661_v19 = vsel %vm549_vm6, %v5603_v43, 0.0 }
0x129e   :  { %2662 = vadd.xlane.f32.xlu0 %v2661_v19 }
0x12ab   :  { %2679 = vrot.lane.b32.xlu1 %v5286_v42, %s4432_s17 }
0x12af   :  { %2681 = vrot.lane.b32.xlu1 %v5307_v29, %s4432_s17 }
0x12d6   :  { %v2431_v37 = vpop.xlane.xlu1 %2430 }
0x12d8   :  { %v2434_v0 = vpop.xlane.xlu0 %2433 }
0x12d9   :  { %4347 = vrcp.f32 %v2434_v0 }
0x12da   :  { %4349 = vrcp.f32 %v2431_v37 }
0x12de   :  { %v2437_v20 = vpop.xlane.xlu1 %2436 }
0x12e0   :  { %v2440_v39 = vpop.xlane.xlu0 %2439 }
0x12e1   :  { %4351 = vrcp.f32 %v2440_v39 }
0x12e2   :  { %4353 = vrcp.f32 %v2437_v20 }
0x12e3   :  { %v4348_v15 = vpop.eup %4347 }
0x12e4   :  { %v4350_v41 = vpop.eup %4349  ;;  %v2450_v48 = vmul.f32 %v4348_v15, %v5543_v56 }
0x12e5   :  { %v2449_v42 = vmul.f32 %v4350_v41, %v5539_v61 }
0x12e6   :  { %v2443_v24 = vpop.xlane.xlu1 %2442 }
0x12e7   :  { %4355 = vrcp.f32 %v2443_v24  ;;  %v2454_v53 = vpack.c.bf16 %v2450_v48, %v2449_v42 }
0x12eb   :  { %v4352_v60 = vpop.eup %4351 }
0x12ec   :  { %v4354_v46 = vpop.eup %4353  ;;  %v2452_v56 = vmul.f32 %v4352_v60, %v5556_v35 }
0x12ed   :  { %v2451_v61 = vmul.f32 %v4354_v46, %v5552_v4 }
0x12ee   :  { %v2651_v51 = vpop.xlane.xlu1 %2650 }
0x12ef   :  { %v2455_v62 = vpack.c.bf16 %v2452_v56, %v2451_v61 }
0x12f0   :  { %v2654_v2 = vpop.xlane.xlu0 %2653 }
0x12f1   :  { %v4356_v17 = vpop.eup %4355  ;;  %4357 = vrcp.f32 %v2654_v2 }
0x12f2   :  { %v2678_v8 = vpop.permute.xlu1 %2677  ;;  %v2453_v55 = vmul.f32 %v4356_v17, %v5562_v16  ;;  %4359 = vrcp.f32 %v2651_v51 }
0x12f4   :  { %v2462_v28 = vpop.permute.xlu0 %2461  ;;  %v2456_v63 = vpack.c.bf16 %v2453_v55, %v2453_v55 }
0x12f5   :  { %v2475_v29 = vsel %vm758_vm3, %v2462_v28, 0 }
0x12f6   :  { %4051 = vmatpush3.bf16.msra.mxu1 %v2475_v29 }
0x12f7   :  { %4082 = vmatprep.subr.bf16.mxu1 %v4427_v1 }
0x12f9   :  { %4053 = vmatmul.mubr.msk.bf16.vlgmr.msra.gmra.mrb[116].mxu1 %vm536_vm5, %v2454_v53 }
0x12fa   :  { %4083 = vmatpush3.bf16.msra.mxu1 %v2678_v8  ;;  %4056 = vmatprep.mubr.msk.bf16.mxu1 %vm4428_vm0, %v4427_v1 }
0x12fb   :  { %4084 = vmatprep.subr.bf16.mxu1 %v4427_v1  ;;  %v4358_v59 = vpop.eup %4357 }
0x12fc   :  { %v4360_v22 = vpop.eup %4359  ;;  %v2670_v31 = vmul.f32 %v4358_v59, %v5571_v12 }
0x1301   :  { %4057 = vmatmul.mubr.msk.bf16.gmra.mrb[120].mxu1 %vm536_vm5, %v2455_v62 }
0x1302   :  { %4060 = vmatprep.mubr.msk.bf16.mxu1 %vm4428_vm0, %v4427_v1 }
0x1309   :  { %4061 = vmatmul.mubr.msk.bf16.gmra.mrb[124].mxu1 %vm536_vm5, %v2456_v63 }
0x130a   :  { %4088 = vmatprep.mubr.msk.bf16.mxu1 %vm4428_vm0, %v4427_v1 }
0x1320   :  { %v2312_v35 = vpop.f32.mrb[112].mxu1 }
0x1321   :  { %v2313_v5 = vadd.f32 %v2312_v35, %v5468_v45  ;;  %v4026_v4 = vpop.f32.mrb[113].mxu1  ;;  %v2669_v45 = vmul.f32 %v4360_v22, %v5566_v38 }
0x1322   :  { %v2315_v7 = vpop.f32.mrb[114].mxu1 }
0x1323   :  { %v4027_v13 = vpop.f32.mrb[115].mxu1  ;;  %v2657_v33 = vpop.xlane.xlu1 %2656  ;;  %v2674_v3 = vpack.c.bf16 %v2670_v31, %v2669_v45 }
0x1327   :  { %v2660_v44 = vpop.xlane.xlu1 %2659 }
0x1328   :  { %4361 = vrcp.f32 %v2660_v44 }
0x1329   :  { %4363 = vrcp.f32 %v2657_v33 }
0x132b   :  { %v2680_v16 = vpop.permute.xlu1 %2679  ;;  %v2663_v26 = vpop.xlane.xlu0 %2662 }
0x132c   :  { %4085 = vmatpush3.bf16.msra.mxu1 %v2680_v16  ;;  %4365 = vrcp.f32 %v2663_v26 }
0x132d   :  { %4086 = vmatprep.subr.bf16.mxu1 %v4427_v1 }
0x132f   :  { %v2682_v32 = vpop.permute.xlu1 %2681 }
0x1330   :  { %v2695_v40 = vsel %vm758_vm3, %v2682_v32, 0 }
0x1331   :  { %4087 = vmatpush3.bf16.msra.mxu1 %v2695_v40 }
0x1332   :  { %4116 = vmatprep.subr.bf16.mxu1 %v4427_v1  ;;  %v4362_v52 = vpop.eup %4361 }
0x1333   :  { %v4364_v27 = vpop.eup %4363  ;;  %v2672_v12 = vmul.f32 %v4362_v52, %v5599_v23 }
0x1334   :  { %4089 = vmatmul.mubr.msk.bf16.vlgmr.msra.gmra.mrb[128].mxu1 %vm536_vm5, %v2674_v3  ;;  %v2671_v50 = vmul.f32 %v4364_v27, %v5595_v54 }
0x1335   :  { %4092 = vmatprep.mubr.msk.bf16.mxu1 %vm4428_vm0, %v4427_v1 }
0x1336   :  { %v2675_v10 = vpack.c.bf16 %v2672_v12, %v2671_v50  ;;  %v4366_v38 = vpop.eup %4365 }
0x1337   :  { %v2673_v36 = vmul.f32 %v4366_v38, %v5603_v43 }
0x1339   :  { %v2676_v58 = vpack.c.bf16 %v2673_v36, %v2673_v36 }
0x133c   :  { %4093 = vmatmul.mubr.msk.bf16.gmra.mrb[132].mxu1 %vm536_vm5, %v2675_v10 }
0x133d   :  { %4096 = vmatprep.mubr.msk.bf16.mxu1 %vm4428_vm0, %v4427_v1 }
0x1344   :  { %4097 = vmatmul.mubr.msk.bf16.gmra.mrb[136].mxu1 %vm536_vm5, %v2676_v58 }
0x1345   :  { %4124 = vmatprep.mubr.msk.bf16.mxu1 %vm4428_vm0, %v4427_v1 }
0x13cc   :  { %v2511_v49 = vpop.f32.mrb[116].mxu1 }
0x13cd   :  { %v2533_v57 = vadd.f32 %v2511_v49, %v5579_v25  ;;  %v4054_v23 = vpop.f32.mrb[117].mxu1  ;;  %v3519_v25 = vld [vmem:[%s5793_s5 + $0x1] ss:$0 sm:$0xff]  ;;  %s5826_s5 = sld [smem:[#allocation12_spill]] }
0x13ce   :  { %v2514_v54 = vpop.f32.mrb[118].mxu1 }
0x13cf   :  { %v2534_v18 = vadd.f32 %v2514_v54, %v5582_v30  ;;  %v4055_v19 = vpop.f32.mrb[119].mxu1 }
0x13d4   :  { %v2519_v0 = vpop.f32.mrb[120].mxu1 }
0x13d5   :  { %v2535_v37 = vadd.f32 %v2519_v0, %v5587_v34  ;;  %v4058_v20 = vpop.f32.mrb[121].mxu1 }
0x13d6   :  { %v2522_v39 = vpop.f32.mrb[122].mxu1 }
0x13d7   :  { %v2536_v43 = vadd.f32 %v2522_v39, %v5590_v47  ;;  %v4059_v24 = vpop.f32.mrb[123].mxu1 }
0x13dc   :  { %v2527_v15 = vpop.f32.mrb[124].mxu1 }
0x13dd   :  { %v2537_v2 = vadd.f32 %v2527_v15, %v2313_v5  ;;  %v4062_v41 = vpop.f32.mrb[125].mxu1  ;;  %v4179_v15 = vld [vmem:[%s5796_s8 + $0x10] sm:$0xff]  }
0x13de   :  { %v2530_v48 = vpop.f32.mrb[126].mxu1  ;;  %4101 = vmatpush3.bf16.msra.mxu0 %v4179_v15  ;;  %v4181_v41 = vld [vmem:[%s5798_s10 + $0x20] sm:$0xff]  }
0x13df   :  { %v4063_v51 = vpop.f32.mrb[127].mxu1  ;;  %4102 = vmatprep.subr.bf16.mxu0 %v4427_v1  ;;  %4117 = vmatpush3.bf16.msra.mxu1 %v4181_v41  ;;  %v4182_v48 = vld [vmem:[%s5798_s10 + $0x28] sm:$0xff]  }
0x13e0   :  { %4118 = vmatprep.subr.bf16.mxu1 %v4427_v1 }
0x13e3   :  { %4119 = vmatpush3.bf16.msra.mxu1 %v4182_v48 }
0x13e4   :  { %4120 = vmatprep.subr.bf16.mxu1 %v4427_v1 }
0x1407   :  { %v2731_v28 = vpop.f32.mrb[128].mxu1 }
0x1408   :  { %v2753_v30 = vadd.f32 %v2731_v28, %v2533_v57  ;;  %v4090_v42 = vpop.f32.mrb[129].mxu1 }
0x1409   :  { %v2734_v29 = vpop.f32.mrb[130].mxu1 }
0x140a   :  { %v2766_v53 = vadd.f32 %v3519_v25, %v2753_v30  ;;  %v2754_v34 = vadd.f32 %v2734_v29, %v2534_v18  ;;  %v4091_v60 = vpop.f32.mrb[131].mxu1 }
0x140c   :  { %v2767_v8 = vadd.f32 %v3519_v25, %v2754_v34  ;;  %v2771_v47 = vadd.f32 %v2766_v53, %v5218_v11 }
0x140e   :  { %v2780_v46 = vsel %vm317_vm2, %v2771_v47, 0.0  ;;  %v2772_v56 = vadd.f32 %v2767_v8, %v5220_v6 }
0x140f   :  { %2781 = vadd.xlane.f32.xlu1 %v2780_v46  ;;  %v2739_v61 = vpop.f32.mrb[132].mxu1 }
0x1410   :  { %v2755_v62 = vadd.f32 %v2739_v61, %v2535_v37  ;;  %v4094_v17 = vpop.f32.mrb[133].mxu1  ;;  %v2783_v55 = vsel %vm317_vm2, %v2772_v56, 0.0 }
0x1411   :  { %2784 = vadd.xlane.f32.xlu0 %v2783_v55  ;;  %v2742_v63 = vpop.f32.mrb[134].mxu1 }
0x1412   :  { %v2768_v35 = vadd.f32 %v3519_v25, %v2755_v62  ;;  %v2756_v5 = vadd.f32 %v2742_v63, %v2536_v43  ;;  %v4095_v4 = vpop.f32.mrb[135].mxu1 }
0x1413   :  { %v3523_v4 = vld [vmem:[%s5795_s7 + $0x1] ss:$0 sm:$0xff] }
0x1414   :  { %v2769_v7 = vadd.f32 %v3519_v25, %v2756_v5  ;;  %v2773_v13 = vadd.f32 %v2768_v35, %v5237_v9 }
0x1416   :  { %v2786_v11 = vsel %vm317_vm2, %v2773_v13, 0.0  ;;  %v2774_v33 = vadd.f32 %v2769_v7, %v5239_v21 }
0x1417   :  { %2787 = vadd.xlane.f32.xlu0 %v2786_v11  ;;  %v2747_v6 = vpop.f32.mrb[136].mxu1 }
0x1418   :  { %v2757_v44 = vadd.f32 %v2747_v6, %v2537_v2  ;;  %v4098_v59 = vpop.f32.mrb[137].mxu1  ;;  %v2789_v26 = vsel %vm317_vm2, %v2774_v33, 0.0  ;;  %v4180_v2 = vld [vmem:[%s5796_s8 + $0x18] sm:$0xff]  }
0x1419   :  { %v2750_v16 = vpop.f32.mrb[138].mxu1  ;;  %4103 = vmatpush3.bf16.msra.mxu0 %v4180_v2 }
0x141a   :  { %v2770_v22 = vadd.f32 %v3519_v25, %v2757_v44  ;;  %v4099_v31 = vpop.f32.mrb[139].mxu1  ;;  %4136 = vmatprep.subr.bf16.mxu0 %v4427_v1 }
0x141b   :  { %2790 = vadd.xlane.f32.xlu0 %v2789_v26 }
0x141c   :  { %v2775_v32 = vadd.f32 %v2770_v22, %v5257_v14 }
0x141e   :  { %v2792_v45 = vsel %vm1357_vm7, %v2775_v32, 0.0 }
0x141f   :  { %2793 = vadd.xlane.f32.xlu0 %v2792_v45 }
0x149c   :  { %v2782_v9 = vpop.xlane.xlu1 %2781 }
0x149d   :  { %v2795_v40 = vmul.f32 0.03125, %v2782_v9 }
0x149e   :  { %v2785_v3 = vpop.xlane.xlu0 %2784 }
0x149f   :  { %v2800_v52 = vsub.f32 %v2771_v47, %v2795_v40  ;;  %v2796_v21 = vmul.f32 0.03125, %v2785_v3 }
0x14a1   :  { %v2801_v27 = vsub.f32 %v2772_v56, %v2796_v21  ;;  %v2805_v12 = vmul.f32 %v2800_v52, %v2800_v52  ;;  %v3522_v56 = vld [vmem:[%s5794_s6 + $0x1] ss:$0 sm:$0xff] }
0x14a3   :  { %v2810_v50 = vsel %vm317_vm2, %v2805_v12, 0.0  ;;  %v2806_v10 = vmul.f32 %v2801_v27, %v2801_v27  ;;  %v4183_v12 = vld [vmem:[%s5798_s10 + $0x30] sm:$0xff]  }
0x14a4   :  { %v2788_v38 = vpop.xlane.xlu0 %2787  ;;  %2811 = vadd.xlane.f32.xlu0 %v2810_v50  ;;  %4121 = vmatpush3.bf16.msra.mxu1 %v4183_v12  ;;  %v4184_v50 = vld [vmem:[%s5798_s10 + $0x38] sm:$0xff]  }
0x14a5   :  { %v2797_v36 = vmul.f32 0.03125, %v2788_v38  ;;  %v2813_v58 = vsel %vm317_vm2, %v2806_v10, 0.0  ;;  %4122 = vmatprep.subr.bf16.mxu1 %v4427_v1  ;;  %v3529_v10 = vld [vmem:[%s5821_s16 + $0x1] ss:$0 sm:$0xff] }
0x14a6   :  { %2814 = vadd.xlane.f32.xlu1 %v2813_v58 }
0x14a7   :  { %v2802_v14 = vsub.f32 %v2773_v13, %v2797_v36 }
0x14a8   :  { %v2791_v49 = vpop.xlane.xlu0 %2790  ;;  %4123 = vmatpush3.bf16.msra.mxu1 %v4184_v50 }
0x14a9   :  { %v2798_v57 = vmul.f32 0.03125, %v2791_v49  ;;  %v2807_v23 = vmul.f32 %v2802_v14, %v2802_v14 }
0x14ab   :  { %v2803_v54 = vsub.f32 %v2774_v33, %v2798_v57  ;;  %v2816_v18 = vsel %vm317_vm2, %v2807_v23, 0.0 }
0x14ac   :  { %2817 = vadd.xlane.f32.xlu0 %v2816_v18  ;;  %v2794_v19 = vpop.xlane.xlu0 %2793 }
0x14ad   :  { %v2799_v0 = vmul.f32 0.03125, %v2794_v19  ;;  %v2808_v37 = vmul.f32 %v2803_v54, %v2803_v54 }
0x14af   :  { %v2804_v20 = vsub.f32 %v2775_v32, %v2799_v0  ;;  %v2819_v39 = vsel %vm317_vm2, %v2808_v37, 0.0 }
0x14b0   :  { %2820 = vadd.xlane.f32.xlu1 %v2819_v39 }
0x14b1   :  { %v2809_v43 = vmul.f32 %v2804_v20, %v2804_v20 }
0x14b3   :  { %v2822_v24 = vsel %vm1357_vm7, %v2809_v43, 0.0 }
0x14b4   :  { %2823 = vadd.xlane.f32.xlu0 %v2822_v24 }
0x1531   :  { %v2812_v51 = vpop.xlane.xlu0 %2811 }
0x1532   :  { %v2825_v28 = vmul.f32 0.03125, %v2812_v51 }
0x1533   :  { %v2815_v25 = vpop.xlane.xlu1 %2814 }
0x1534   :  { %v2830_v30 = vadd.f32 1e-05, %v2825_v28  ;;  %v2826_v42 = vmul.f32 0.03125, %v2815_v25 }
0x1536   :  { %4367 = vrsqrt.f32 %v2830_v30  ;;  %v2831_v29 = vadd.f32 1e-05, %v2826_v42 }
0x1538   :  { %4369 = vrsqrt.f32 %v2831_v29  ;;  %v3544_v29 = vld [vmem:[%s5799_s11 + $0x1] ss:$0 sm:$0xff] }
0x1539   :  { %v2818_v53 = vpop.xlane.xlu0 %2817 }
0x153a   :  { %v2827_v34 = vmul.f32 0.03125, %v2818_v53 }
0x153c   :  { %v2832_v60 = vadd.f32 1e-05, %v2827_v34 }
0x153d   :  { %v2821_v8 = vpop.xlane.xlu1 %2820 }
0x153e   :  { %4371 = vrsqrt.f32 %v2832_v60  ;;  %v2828_v47 = vmul.f32 0.03125, %v2821_v8 }
0x1540   :  { %v4368_v46 = vpop.eup %4367  ;;  %v2833_v61 = vadd.f32 1e-05, %v2828_v47 }
0x1541   :  { %v2840_v62 = vmul.f32 %v4368_v46, %v2800_v52  ;;  %v2824_v17 = vpop.xlane.xlu0 %2823 }
0x1542   :  { %v4370_v55 = vpop.eup %4369  ;;  %4373 = vrsqrt.f32 %v2833_v61  ;;  %v2829_v63 = vmul.f32 0.03125, %v2824_v17 }
0x1543   :  { %v2851_v35 = vmul.f32 %v3522_v56, %v2840_v62  ;;  %v2841_v5 = vmul.f32 %v4370_v55, %v2801_v27 }
0x1544   :  { %v2834_v7 = vadd.f32 1e-05, %v2829_v63 }
0x1545   :  { %v2852_v13 = vmul.f32 %v3522_v56, %v2841_v5  ;;  %v5690_v11 = vadd.f32 %v3523_v4, %v2851_v35 }
0x1546   :  { %4375 = vrsqrt.f32 %v2834_v7 }
0x1547   :  { %v5692_v33 = vadd.f32 %v3523_v4, %v2852_v13 }
0x1548   :  { %v4372_v6 = vpop.eup %4371 }
0x1549   :  { %v2842_v44 = vmul.f32 %v4372_v6, %v2802_v14  ;;  %v2867_v59 = vpack.c.bf16 %v5692_v33, %v5690_v11 }
0x154b   :  { %4105 = vmatmul.mubr.msk.bf16.vlgmr.msra.gmra.mrb[124].mxu0 %vm317_vm2, %v2867_v59  ;;  %v2853_v31 = vmul.f32 %v3522_v56, %v2842_v44 }
0x154c   :  { %v4374_v16 = vpop.eup %4373  ;;  %4108 = vmatprep.mubr.msk.bf16.mxu0 %vm4428_vm0, %v4427_v1 }
0x154d   :  { %v2843_v22 = vmul.f32 %v4374_v16, %v2803_v54  ;;  %v5699_v9 = vadd.f32 %v3523_v4, %v2853_v31 }
0x154f   :  { %v2854_v26 = vmul.f32 %v3522_v56, %v2843_v22 }
0x1550   :  { %v4376_v32 = vpop.eup %4375 }
0x1551   :  { %v2844_v45 = vmul.f32 %v4376_v32, %v2804_v20  ;;  %v5701_v40 = vadd.f32 %v3523_v4, %v2854_v26 }
0x1553   :  { %v2868_v3 = vpack.c.bf16 %v5701_v40, %v5699_v9  ;;  %v2855_v52 = vmul.f32 %v3522_v56, %v2844_v45 }
0x1555   :  { %4109 = vmatmul.mubr.msk.bf16.gmra.mrb[128].mxu0 %vm317_vm2, %v2868_v3  ;;  %v5708_v21 = vadd.f32 %v3523_v4, %v2855_v52 }
0x1556   :  { %4112 = vmatprep.mubr.msk.bf16.mxu0 %vm4428_vm0, %v4427_v1 }
0x1557   :  { %v2869_v27 = vpack.c.bf16 %v5708_v21, %v5708_v21 }
0x155d   :  { %4113 = vmatmul.mubr.msk.bf16.gmra.mrb[132].mxu0 %vm317_vm2, %v2869_v27 }
0x155e   :  { %4140 = vmatprep.mubr.msk.bf16.mxu0 %vm4428_vm0, %v4427_v1 }
0x161e   :  { %v2938_v38 = vpop.f32.mrb[124].mxu0 }
0x161f   :  { %v2939_v36 = vadd.f32 %v3529_v10, %v2938_v38  ;;  %v4106_v58 = vpop.f32.mrb[125].mxu0 }
0x1620   :  { %v2941_v14 = vpop.f32.mrb[126].mxu0 }
0x1621   :  { %v2942_v49 = vadd.f32 %v3529_v10, %v2941_v14  ;;  %v4107_v57 = vpop.f32.mrb[127].mxu0  ;;  %v2960_v23 = vmax.f32 %v2939_v36, 0.0 }
0x1623   :  { %v2961_v54 = vmax.f32 %v2942_v49, 0.0 }
0x1625   :  { %v2965_v18 = vpack.c.bf16 %v2961_v54, %v2960_v23 }
0x1627   :  { %4125 = vmatmul.mubr.msk.bf16.vlgmr.msra.gmra.mrb[140].mxu1 %vm1572_vm8, %v2965_v18 }
0x1628   :  { %v2946_v19 = vpop.f32.mrb[128].mxu0  ;;  %4128 = vmatprep.mubr.msk.bf16.mxu1 %vm4428_vm0, %v4427_v1 }
0x1629   :  { %v2947_v0 = vadd.f32 %v3529_v10, %v2946_v19  ;;  %v4110_v37 = vpop.f32.mrb[129].mxu0 }
0x162a   :  { %v2949_v20 = vpop.f32.mrb[130].mxu0 }
0x162b   :  { %v2950_v39 = vadd.f32 %v3529_v10, %v2949_v20  ;;  %v4111_v43 = vpop.f32.mrb[131].mxu0  ;;  %v2962_v24 = vmax.f32 %v2947_v0, 0.0 }
0x162d   :  { %v2963_v15 = vmax.f32 %v2950_v39, 0.0 }
0x162f   :  { %v2966_v2 = vpack.c.bf16 %v2963_v15, %v2962_v24  ;;  %v4185_v24 = vld [vmem:[%s5825_s24] sm:$0xff]   ;;  %v4186_v15 = vld [vmem:[%s5825_s24 + $0x8] sm:$0xff]  }
0x1630   :  { %v2954_v41 = vpop.f32.mrb[132].mxu0  ;;  %4137 = vmatpush3.bf16.msra.mxu0 %v4185_v24 }
0x1631   :  { %v2955_v48 = vadd.f32 %v3529_v10, %v2954_v41  ;;  %v4114_v51 = vpop.f32.mrb[133].mxu0  ;;  %4129 = vmatmul.mubr.msk.bf16.gmra.mrb[144].mxu1 %vm1572_vm8, %v2966_v2  ;;  %4138 = vmatprep.subr.bf16.mxu0 %v4427_v1 }
0x1632   :  { %v2957_v28 = vpop.f32.mrb[134].mxu0  ;;  %4132 = vmatprep.mubr.msk.bf16.mxu1 %vm4428_vm0, %v4427_v1 }
0x1633   :  { %v2964_v25 = vmax.f32 %v2955_v48, 0.0  ;;  %v4115_v30 = vpop.f32.mrb[135].mxu0 }
0x1634   :  { %4139 = vmatpush3.bf16.msra.mxu0 %v4186_v15 }
0x1635   :  { %v2967_v42 = vpack.c.bf16 %v2964_v25, %v2964_v25 }
0x1639   :  { %4133 = vmatmul.mubr.msk.bf16.gmra.mrb[148].mxu1 %vm1572_vm8, %v2967_v42 }
0x16fa   :  { %v3052_v53 = vpop.f32.mrb[140].mxu1 }
0x16fb   :  { %v3053_v34 = vadd.f32 %v3544_v29, %v3052_v53  ;;  %v4126_v60 = vpop.f32.mrb[141].mxu1 }
0x16fc   :  { %v3055_v8 = vpop.f32.mrb[142].mxu1 }
0x16fd   :  { %v3074_v47 = vadd.f32 %v3053_v34, %v5690_v11  ;;  %v3056_v46 = vadd.f32 %v3544_v29, %v3055_v8  ;;  %v4127_v56 = vpop.f32.mrb[143].mxu1  ;;  %v3554_v8 = vld [vmem:[%s5823_s29 + $0x1] ss:$0 sm:$0xff] }
0x16ff   :  { %v3075_v61 = vadd.f32 %v3056_v46, %v5692_v33  ;;  %v3083_v62 = vsel %vm317_vm2, %v3074_v47, 0.0 }
0x1700   :  { %3084 = vadd.xlane.f32.xlu1 %v3083_v62 }
0x1701   :  { %v3086_v17 = vsel %vm317_vm2, %v3075_v61, 0.0 }
0x1702   :  { %3087 = vadd.xlane.f32.xlu0 %v3086_v17 }
0x1704   :  { %v3060_v55 = vpop.f32.mrb[144].mxu1 }
0x1705   :  { %v3061_v63 = vadd.f32 %v3544_v29, %v3060_v55  ;;  %v4130_v35 = vpop.f32.mrb[145].mxu1  ;;  %v3555_v55 = vld [vmem:[%s5824_s9 + $0x1] ss:$0 sm:$0xff] }
0x1706   :  { %v3063_v5 = vpop.f32.mrb[146].mxu1 }
0x1707   :  { %v3076_v4 = vadd.f32 %v3061_v63, %v5699_v9  ;;  %v3064_v7 = vadd.f32 %v3544_v29, %v3063_v5  ;;  %v4131_v13 = vpop.f32.mrb[147].mxu1 }
0x1709   :  { %v3077_v11 = vadd.f32 %v3064_v7, %v5701_v40  ;;  %v3089_v6 = vsel %vm317_vm2, %v3076_v4, 0.0 }
0x170a   :  { %3090 = vadd.xlane.f32.xlu1 %v3089_v6 }
0x170b   :  { %v3092_v33 = vsel %vm317_vm2, %v3077_v11, 0.0 }
0x170c   :  { %3093 = vadd.xlane.f32.xlu0 %v3092_v33  ;;  %v3068_v44 = vpop.f32.mrb[148].mxu1 }
0x170d   :  { %v3069_v59 = vadd.f32 %v3544_v29, %v3068_v44  ;;  %v4134_v16 = vpop.f32.mrb[149].mxu1 }
0x170e   :  { %v3071_v22 = vpop.f32.mrb[150].mxu1 }
0x170f   :  { %v3078_v31 = vadd.f32 %v3069_v59, %v5708_v21  ;;  %v4135_v26 = vpop.f32.mrb[151].mxu1 }
0x1711   :  { %v3095_v32 = vsel %vm1357_vm7, %v3078_v31, 0.0 }
0x1712   :  { %3096 = vadd.xlane.f32.xlu1 %v3095_v32 }
0x178d   :  { %v3085_v45 = vpop.xlane.xlu1 %3084 }
0x178e   :  { %v3098_v9 = vmul.f32 0.03125, %v3085_v45 }
0x178f   :  { %v3088_v3 = vpop.xlane.xlu0 %3087 }
0x1790   :  { %v3103_v40 = vsub.f32 %v3074_v47, %v3098_v9  ;;  %v3099_v52 = vmul.f32 0.03125, %v3088_v3 }
0x1792   :  { %v3104_v27 = vsub.f32 %v3075_v61, %v3099_v52  ;;  %v3108_v12 = vmul.f32 %v3103_v40, %v3103_v40  ;;  %v3556_v52 = vld [vmem:[%s5826_s5] ss:$0 sm:$0xff] }
0x1794   :  { %v3113_v50 = vsel %vm317_vm2, %v3108_v12, 0.0  ;;  %v3109_v10 = vmul.f32 %v3104_v27, %v3104_v27 }
0x1795   :  { %3114 = vadd.xlane.f32.xlu0 %v3113_v50 }
0x1796   :  { %v3116_v38 = vsel %vm317_vm2, %v3109_v10, 0.0 }
0x1797   :  { %v3091_v36 = vpop.xlane.xlu1 %3090  ;;  %3117 = vadd.xlane.f32.xlu1 %v3116_v38 }
0x1798   :  { %v3100_v21 = vmul.f32 0.03125, %v3091_v36 }
0x1799   :  { %v3094_v58 = vpop.xlane.xlu0 %3093 }
0x179a   :  { %v3105_v14 = vsub.f32 %v3076_v4, %v3100_v21  ;;  %v3101_v49 = vmul.f32 0.03125, %v3094_v58 }
0x179c   :  { %v3106_v57 = vsub.f32 %v3077_v11, %v3101_v49  ;;  %v3110_v23 = vmul.f32 %v3105_v14, %v3105_v14 }
0x179e   :  { %v3119_v54 = vsel %vm317_vm2, %v3110_v23, 0.0  ;;  %v3111_v18 = vmul.f32 %v3106_v57, %v3106_v57 }
0x179f   :  { %3120 = vadd.xlane.f32.xlu0 %v3119_v54  ;;  %v3097_v19 = vpop.xlane.xlu1 %3096 }
0x17a0   :  { %v3102_v0 = vmul.f32 0.03125, %v3097_v19  ;;  %v3122_v37 = vsel %vm317_vm2, %v3111_v18, 0.0 }
0x17a1   :  { %3123 = vadd.xlane.f32.xlu1 %v3122_v37 }
0x17a2   :  { %v3107_v20 = vsub.f32 %v3078_v31, %v3102_v0 }
0x17a4   :  { %v3112_v39 = vmul.f32 %v3107_v20, %v3107_v20 }
0x17a6   :  { %v3125_v43 = vsel %vm1357_vm7, %v3112_v39, 0.0 }
0x17a7   :  { %3126 = vadd.xlane.f32.xlu0 %v3125_v43 }
0x1822   :  { %v3115_v2 = vpop.xlane.xlu0 %3114 }
0x1823   :  { %v3128_v41 = vmul.f32 0.03125, %v3115_v2 }
0x1824   :  { %v3118_v48 = vpop.xlane.xlu1 %3117 }
0x1825   :  { %v3133_v51 = vadd.f32 1e-05, %v3128_v41  ;;  %v3129_v28 = vmul.f32 0.03125, %v3118_v48 }
0x1827   :  { %4377 = vrsqrt.f32 %v3133_v51  ;;  %v3134_v25 = vadd.f32 1e-05, %v3129_v28 }
0x1829   :  { %4379 = vrsqrt.f32 %v3134_v25 }
0x182c   :  { %v3121_v30 = vpop.xlane.xlu0 %3120 }
0x182d   :  { %v3130_v42 = vmul.f32 0.03125, %v3121_v30 }
0x182e   :  { %v3124_v29 = vpop.xlane.xlu1 %3123 }
0x182f   :  { %v3135_v53 = vadd.f32 1e-05, %v3130_v42  ;;  %v3131_v34 = vmul.f32 0.03125, %v3124_v29 }
0x1831   :  { %v4378_v60 = vpop.eup %4377  ;;  %4381 = vrsqrt.f32 %v3135_v53  ;;  %v3136_v47 = vadd.f32 1e-05, %v3131_v34 }
0x1832   :  { %v3143_v46 = vmul.f32 %v4378_v60, %v3103_v40 }
0x1833   :  { %v4380_v56 = vpop.eup %4379  ;;  %4383 = vrsqrt.f32 %v3136_v47 }
0x1834   :  { %v3154_v61 = vmul.f32 %v3554_v8, %v3143_v46  ;;  %v3144_v62 = vmul.f32 %v4380_v56, %v3104_v27  ;;  %v3127_v17 = vpop.xlane.xlu0 %3126 }
0x1835   :  { %v3132_v63 = vmul.f32 0.03125, %v3127_v17 }
0x1836   :  { %v3155_v35 = vmul.f32 %v3554_v8, %v3144_v62  ;;  %v3165_v4 = vadd.f32 %v3555_v55, %v3154_v61 }
0x1837   :  { %v3137_v5 = vadd.f32 1e-05, %v3132_v63 }
0x1838   :  { %v3166_v7 = vadd.f32 %v3555_v55, %v3155_v35 }
0x1839   :  { %4385 = vrsqrt.f32 %v3137_v5 }
0x183a   :  { %v3170_v13 = vpack.c.bf16 %v3166_v7, %v3165_v4 }
0x183b   :  { %v4382_v11 = vpop.eup %4381 }
0x183c   :  { %v3145_v6 = vmul.f32 %v4382_v11, %v3105_v14  ;;  %4141 = vmatmul.mubr.msk.bf16.vlgmr.msra.gmra.mrb[136].mxu0 %vm317_vm2, %v3170_v13 }
0x183d   :  { %v4384_v33 = vpop.eup %4383  ;;  %4144 = vmatprep.mubr.msk.bf16.mxu0 %vm4428_vm0, %v4427_v1 }
0x183e   :  { %v3146_v44 = vmul.f32 %v4384_v33, %v3106_v57  ;;  %v3156_v59 = vmul.f32 %v3554_v8, %v3145_v6 }
0x1840   :  { %v3157_v16 = vmul.f32 %v3554_v8, %v3146_v44  ;;  %v3167_v22 = vadd.f32 %v3555_v55, %v3156_v59 }
0x1842   :  { %v3168_v31 = vadd.f32 %v3555_v55, %v3157_v16 }
0x1843   :  { %v4386_v26 = vpop.eup %4385 }
0x1844   :  { %v3147_v32 = vmul.f32 %v4386_v26, %v3107_v20  ;;  %v3171_v45 = vpack.c.bf16 %v3168_v31, %v3167_v22 }
0x1846   :  { %4145 = vmatmul.mubr.msk.bf16.gmra.mrb[140].mxu0 %vm317_vm2, %v3171_v45  ;;  %v3158_v9 = vmul.f32 %v3554_v8, %v3147_v32 }
0x1847   :  { %4148 = vmatprep.mubr.msk.bf16.mxu0 %vm4428_vm0, %v4427_v1 }
0x1848   :  { %v3169_v3 = vadd.f32 %v3555_v55, %v3158_v9 }
0x184a   :  { %v3172_v40 = vpack.c.bf16 %v3169_v3, %v3169_v3 }
0x184e   :  { %4149 = vmatmul.mubr.msk.bf16.gmra.mrb[144].mxu0 %vm317_vm2, %v3172_v40 }
0x190f   :  { %v3239_v27 = vpop.f32.mrb[136].mxu0 }
0x1910   :  { %v3240_v12 = vadd.f32 %v3556_v52, %v3239_v27  ;;  %v4142_v50 = vpop.f32.mrb[137].mxu0 }
0x1911   :  { %v3242_v10 = vpop.f32.mrb[138].mxu0 }
0x1912   :  { %v3562_v38 = vmul.f32 -1.442695, %v3240_v12  ;;  %v3243_v36 = vadd.f32 %v3556_v52, %v3242_v10  ;;  %v4143_v21 = vpop.f32.mrb[139].mxu0 }
0x1914   :  { %4387 = vpow2.f32 %v3562_v38  ;;  %v3563_v58 = vmul.f32 -1.442695, %v3243_v36 }
0x1916   :  { %4389 = vpow2.f32 %v3563_v58 }
0x1919   :  { %v3247_v14 = vpop.f32.mrb[140].mxu0 }
0x191a   :  { %v3248_v1 = vadd.f32 %v3556_v52, %v3247_v14  ;;  %v4146_v49 = vpop.f32.mrb[141].mxu0 }
0x191b   :  { %v3250_v57 = vpop.f32.mrb[142].mxu0 }
0x191c   :  { %v3564_v23 = vmul.f32 -1.442695, %v3248_v1  ;;  %v3251_v54 = vadd.f32 %v3556_v52, %v3250_v57  ;;  %v4147_v18 = vpop.f32.mrb[143].mxu0 }
0x191e   :  { %v4388_v19 = vpop.eup %4387  ;;  %4391 = vpow2.f32 %v3564_v23  ;;  %v3565_v0 = vmul.f32 -1.442695, %v3251_v54 }
0x191f   :  { %v3276_v37 = vadd.f32 1.0, %v4388_v19 }
0x1920   :  { %v4390_v20 = vpop.eup %4389  ;;  %4393 = vpow2.f32 %v3565_v0 }
0x1921   :  { %4395 = vrcp.f32 %v3276_v37  ;;  %v3277_v39 = vadd.f32 1.0, %v4390_v20  ;;  %v3255_v43 = vpop.f32.mrb[144].mxu0 }
0x1922   :  { %v3256_v24 = vadd.f32 %v3556_v52, %v3255_v43  ;;  %v4150_v15 = vpop.f32.mrb[145].mxu0 }
0x1923   :  { %4397 = vrcp.f32 %v3277_v39  ;;  %v3258_v2 = vpop.f32.mrb[146].mxu0 }
0x1924   :  { %v3566_v41 = vmul.f32 -1.442695, %v3256_v24  ;;  %v4151_v48 = vpop.f32.mrb[147].mxu0 }
0x1926   :  { %4399 = vpow2.f32 %v3566_v41 }
0x1928   :  { %v4392_v51 = vpop.eup %4391 }
0x1929   :  { %v3278_v28 = vadd.f32 1.0, %v4392_v51 }
0x192a   :  { %v4394_v25 = vpop.eup %4393 }
0x192b   :  { %v4396_v30 = vpop.eup %4395  ;;  %4401 = vrcp.f32 %v3278_v28  ;;  %v3279_v42 = vadd.f32 1.0, %v4394_v25 }
0x192c   :  { %3291 = vst [vmem:[%s5827_s1] sm:$0xff] %v4396_v30 }
0x192d   :  { %v4398_v29 = vpop.eup %4397  ;;  %4403 = vrcp.f32 %v3279_v42 }
0x192e   :  { %3292 = vst [vmem:[%s5827_s1 + $0x8] sm:$0xff] %v4398_v29 }
0x1930   :  { %v4400_v53 = vpop.eup %4399 }
0x1931   :  { %v3280_v34 = vadd.f32 1.0, %v4400_v53 }
0x1933   :  { %4405 = vrcp.f32 %v3280_v34 }
0x1935   :  { %v4402_v60 = vpop.eup %4401 }
0x1936   :  { %3293 = vst [vmem:[%s5827_s1 + $0x10] sm:$0xff] %v4402_v60 }
0x1937   :  { %v4404_v8 = vpop.eup %4403 }
0x1938   :  { %3294 = vst [vmem:[%s5827_s1 + $0x18] sm:$0xff] %v4404_v8 }
0x193d   :  { %v4406_v47 = vpop.eup %4405 }
0x193e   :  { %3295 = vst [vmem:[%s5827_s1 + $0x20] sm:$0x3] %v4406_v47 }

</bundles_post_ra>
